<compile_context>
chip_gen: v7x
topology: tpu7x:2x2x1
jax: 0.10.0
libtpu: 0.0.40
codegen_flags: <defaults>
</compile_context>

<pallas_src>
import numpy as np
import jax
import jax.numpy as jnp
from jax import lax
from jax.experimental import pallas as pl
from jax.experimental.pallas import tpu as pltpu

NEG_SLOPE = 0.01  # F.leaky_relu default


def _round_up(x, m):
    return ((x + m - 1) // m) * m


def gat_e_to_r_kernel(
    x_e_ref,     # [Np, Einp]  f32   resident: zero-padded entity features
    wh_ref,      # [Einp, Dp]  f32   resident: w_h.weight.T (zero-padded)
    wt_ref,      # [Einp, Dp]  f32   resident: w_t.weight.T (zero-padded)
    a_ref,       # [8, Dp]     f32   resident: rows 0..3 = a_h1, a_h2, a_t1, a_t2
    oh_h_ref,    # [tE, Np]    bf16  edge tile: one-hot of head index (zero rows = pad)
    oh_t_ref,    # [tE, Np]    bf16  edge tile: one-hot of tail index
    oh_r_ref,    # [tE, Rp]    bf16  edge tile: one-hot of relation id
    out_ref,     # [Rp, Dp]    f32   output (resident block, written at the last step)
    xh_ref,      # [Np, Dp]    bf16  scratch: w_h(x_e)
    xt_ref,      # [Np, Dp]    bf16  scratch: w_t(x_e)
    acc_ref,     # [Rp, 2*Dp]  f32   scratch: unnormalized scatter sums (head | tail)
    den1_ref,    # [Rp, 1]     f32   scratch: softmax denominator (head side)
    den2_ref,    # [Rp, 1]     f32   scratch: softmax denominator (tail side)
    m_ref,       # [1, 1]      f32   scratch: running global max of leaky_relu(e)
):
    f32 = jnp.float32
    step = pl.program_id(0)
    last = pl.num_programs(0) - 1

    # ----- one-time projections + accumulator init ---------------------------------
    @pl.when(step == 0)
    def _init():
        xh = jnp.dot(x_e_ref[...], wh_ref[...], preferred_element_type=f32)  # [Np,Dp]
        xt = jnp.dot(x_e_ref[...], wt_ref[...], preferred_element_type=f32)
        xh_ref[...] = xh.astype(jnp.bfloat16)
        xt_ref[...] = xt.astype(jnp.bfloat16)
        acc_ref[...] = jnp.zeros_like(acc_ref)
        den1_ref[...] = jnp.zeros_like(den1_ref)
        den2_ref[...] = jnp.zeros_like(den2_ref)
        m_ref[...] = jnp.full_like(m_ref, -1e30)

    # ----- gather projected features at head / tail (bf16 MXU, f32 accumulate) -----
    gh = jnp.dot(oh_h_ref[...], xh_ref[...], preferred_element_type=f32)     # [tE,Dp]
    gt = jnp.dot(oh_t_ref[...], xt_ref[...], preferred_element_type=f32)     # [tE,Dp]

    # ----- attention logits: VPU multiply + lane reduction (f32) --------------------
    a = a_ref[...]
    e1 = jnp.sum(gh * a[0:1, :] + gt * a[1:2, :], axis=1, keepdims=True)     # [tE,1]
    e2 = jnp.sum(gh * a[2:3, :] + gt * a[3:4, :], axis=1, keepdims=True)     # [tE,1]
    e1 = jnp.where(e1 >= 0, e1, NEG_SLOPE * e1)                              # leaky_relu
    e2 = jnp.where(e2 >= 0, e2, NEG_SLOPE * e2)

    # ----- online global-max rescaling (segment softmax is shift-invariant) ---------
    # Note: a single global shift is exact math-wise; groups whose max lies far below
    # the global max could underflow (benign for typical leaky_relu(linear) ranges).
    m_old = m_ref[...]                                                       # [1,1]
    tile_max = jnp.max(jnp.maximum(e1, e2), axis=0, keepdims=True)           # [1,1]
    m_new = jnp.maximum(m_old, tile_max)
    rescale = jnp.exp(m_old - m_new)                                         # [1,1]
    acc_ref[...] = acc_ref[...] * rescale
    den1_ref[...] = den1_ref[...] * rescale
    den2_ref[...] = den2_ref[...] * rescale
    m_ref[...] = m_new

    ex1 = jnp.exp(e1 - m_new)                                                # [tE,1]
    ex2 = jnp.exp(e2 - m_new)

    # ----- scatter-add into relation rows: one wide bf16 MXU pass --------------------
    w_big = jnp.concatenate([ex1 * gh, ex2 * gt], axis=1).astype(jnp.bfloat16)  # [tE,2Dp]
    ohr = oh_r_ref[...]                                                      # [tE,Rp] bf16
    acc_ref[...] += lax.dot_general(ohr, w_big, (((0,), (0,)), ((), ())),
                                    preferred_element_type=f32)              # [Rp,2Dp]
    # softmax denominators kept on an f32 path
    ohr32 = ohr.astype(f32)
    den1_ref[...] += lax.dot_general(ohr32, ex1, (((0,), (0,)), ((), ())),
                                     preferred_element_type=f32)             # [Rp,1]
    den2_ref[...] += lax.dot_general(ohr32, ex2, (((0,), (0,)), ((), ())),
                                     preferred_element_type=f32)             # [Rp,1]

    # ----- finalize: normalize after the scatter, add head/tail halves ---------------
    @pl.when(step == last)
    def _finalize():
        d = out_ref.shape[1]
        acc = acc_ref[...]
        inv1 = pl.reciprocal(den1_ref[...] + 1e-16, approx=True)             # [Rp,1]
        inv2 = pl.reciprocal(den2_ref[...] + 1e-16, approx=True)
        out_ref[...] = acc[:, :d] * inv1 + acc[:, d:] * inv2


def gat_e_to_r_forward(x_e, edge_index, rel, params, *, tile_e=512):
    """Host-side glue: padding, one-hot construction (bf16), pallas_call, un-padding."""
    x_e_np = np.asarray(x_e, np.float32)
    N, e_hidden = x_e_np.shape
    h = np.asarray(edge_index[0], np.int32)
    t = np.asarray(edge_index[1], np.int32)
    rel_np = np.asarray(rel, np.int32)
    E = int(h.shape[0])
    R = int(rel_np.max()) + 1                       # rel.max() + 1 output rows
    r_hidden = int(np.asarray(params["w_h"]).shape[0])

    # lane-dense padding (exact: zero padding everywhere)
    Dp = _round_up(r_hidden, 128)
    Einp = _round_up(e_hidden, 128)
    Np = _round_up(N, 128)
    Rp = _round_up(R, 128)
    tile_e = max(8, min(_round_up(tile_e, 8), _round_up(E, 8)))
    Ep = _round_up(E, tile_e)
    n_tiles = Ep // tile_e

    def _pad2(a, rows, cols):
        out = np.zeros((rows, cols), np.float32)
        a = np.asarray(a, np.float32)
        out[: a.shape[0], : a.shape[1]] = a
        return out

    # torch Linear stores weight as [out, in] -> transpose for x @ W
    wh = _pad2(np.asarray(params["w_h"], np.float32).T, Einp, Dp)
    wt = _pad2(np.asarray(params["w_t"], np.float32).T, Einp, Dp)
    a_rows = _pad2(
        np.stack([np.asarray(params[k], np.float32).reshape(-1)
                  for k in ("a_h1", "a_h2", "a_t1", "a_t2")]), 8, Dp)
    x_pad = _pad2(x_e_np, Np, Einp)

    # one-hot gather/scatter operators (0/1 exact in bf16); padded edge rows are zero
    idx = np.arange(E)
    oh_h = np.zeros((Ep, Np), np.float32); oh_h[idx, h] = 1.0
    oh_t = np.zeros((Ep, Np), np.float32); oh_t[idx, t] = 1.0
    oh_r = np.zeros((Ep, Rp), np.float32); oh_r[idx, rel_np] = 1.0

    grid_spec = pltpu.PrefetchScalarGridSpec(
        num_scalar_prefetch=0,
        grid=(n_tiles,),
        in_specs=[
            pl.BlockSpec((Np, Einp), lambda i: (0, 0)),      # x_e        (resident)
            pl.BlockSpec((Einp, Dp), lambda i: (0, 0)),      # w_h^T      (resident)
            pl.BlockSpec((Einp, Dp), lambda i: (0, 0)),      # w_t^T      (resident)
            pl.BlockSpec((8, Dp), lambda i: (0, 0)),         # a_* rows   (resident)
            pl.BlockSpec((tile_e, Np), lambda i: (i, 0)),    # oh_head    (edge-tiled)
            pl.BlockSpec((tile_e, Np), lambda i: (i, 0)),    # oh_tail    (edge-tiled)
            pl.BlockSpec((tile_e, Rp), lambda i: (i, 0)),    # oh_rel     (edge-tiled)
        ],
        out_specs=pl.BlockSpec((Rp, Dp), lambda i: (0, 0)),  # resident accumulator
        scratch_shapes=[
            pltpu.VMEM((Np, Dp), jnp.bfloat16),              # x_r_h (bf16)
            pltpu.VMEM((Np, Dp), jnp.bfloat16),              # x_r_t (bf16)
            pltpu.VMEM((Rp, 2 * Dp), jnp.float32),           # unnormalized scatter sums
            pltpu.VMEM((Rp, 1), jnp.float32),                # denom (head softmax)
            pltpu.VMEM((Rp, 1), jnp.float32),                # denom (tail softmax)
            pltpu.VMEM((1, 1), jnp.float32),                 # running global max
        ],
    )

    out_pad = pl.pallas_call(
        gat_e_to_r_kernel,
        out_shape=jax.ShapeDtypeStruct((Rp, Dp), jnp.float32),
        grid_spec=grid_spec,
        compiler_params=pltpu.CompilerParams(
            dimension_semantics=("arbitrary",),              # edge axis is a reduction
            vmem_limit_bytes=32 * 1024 * 1024,               # safe on v5e/v6e/v7x
        ),
    )(
        jnp.asarray(x_pad), jnp.asarray(wh), jnp.asarray(wt), jnp.asarray(a_rows),
        jnp.asarray(oh_h, jnp.bfloat16), jnp.asarray(oh_t, jnp.bfloat16),
        jnp.asarray(oh_r, jnp.bfloat16),
    )
    return out_pad[:R, :r_hidden]


def reference_forward(x_e, edge_index, rel, params):
    """Pure-JAX reference (exact f32 gathers), mirrors the torch forward."""
    f32 = jnp.float32
    x_e = jnp.asarray(x_e, f32)
    h = jnp.asarray(np.asarray(edge_index[0], np.int32))
    t = jnp.asarray(np.asarray(edge_index[1], np.int32))
    rel = jnp.asarray(np.asarray(rel, np.int32))
    R = int(np.asarray(rel).max()) + 1

    xh = x_e @ jnp.asarray(params["w_h"], f32).T
    xt = x_e @ jnp.asarray(params["w_t"], f32).T
    sh1 = (xh @ jnp.asarray(params["a_h1"], f32).T)[:, 0]
    sh2 = (xt @ jnp.asarray(params["a_h2"], f32).T)[:, 0]
    st1 = (xh @ jnp.asarray(params["a_t1"], f32).T)[:, 0]
    st2 = (xt @ jnp.asarray(params["a_t2"], f32).T)[:, 0]
    e1 = sh1[h] + sh2[t]
    e2 = st1[h] + st2[t]

    def seg_softmax(z, seg):
        z = jnp.where(z >= 0, z, NEG_SLOPE * z)
        zmax = jax.ops.segment_max(z, seg, num_segments=R)
        ex = jnp.exp(z - zmax[seg])
        den = jax.ops.segment_sum(ex, seg, num_segments=R)
        return ex / (den[seg] + 1e-16)

    a1 = seg_softmax(e1, rel)
    a2 = seg_softmax(e2, rel)
    out_h = jax.ops.segment_sum(a1[:, None] * xh[h], rel, num_segments=R)
    out_t = jax.ops.segment_sum(a2[:, None] * xt[t], rel, num_segments=R)
    return out_h + out_t


if __name__ == "__main__":
    key = jax.random.PRNGKey(0)
    kx, kh, kt, kp1, kp2, kp3, kp4, kp5, kp6, kperm = jax.random.split(key, 10)

    # small shapes consistent with the module: GAT_E_to_R(e_hidden=300, r_hidden=100)
    N, E, R = 16, 48, 8
    e_hidden, r_hidden = 300, 100

    x_e = jax.random.normal(kx, (N, e_hidden), jnp.float32)
    edge_index = np.stack([
        np.asarray(jax.random.randint(kh, (E,), 0, N)),
        np.asarray(jax.random.randint(kt, (E,), 0, N)),
    ]).astype(np.int32)
    # every relation id appears at least once (matches typical KG data)
    rel = np.asarray(jax.random.permutation(kperm, np.arange(E) % R)).astype(np.int32)

    sc = 0.05
    params = {
        "w_h":  jax.random.normal(kp1, (r_hidden, e_hidden), jnp.float32) * sc,
        "w_t":  jax.random.normal(kp2, (r_hidden, e_hidden), jnp.float32) * sc,
        "a_h1": jax.random.normal(kp3, (1, r_hidden), jnp.float32) * sc,
        "a_h2": jax.random.normal(kp4, (1, r_hidden), jnp.float32) * sc,
        "a_t1": jax.random.normal(kp5, (1, r_hidden), jnp.float32) * sc,
        "a_t2": jax.random.normal(kp6, (1, r_hidden), jnp.float32) * sc,
    }

    # tile_e=32 -> 2 edge tiles: exercises init/accumulate/rescale/finalize across the grid
    out = gat_e_to_r_forward(x_e, edge_index, rel, params, tile_e=32)
    out = jax.block_until_ready(out)
    assert out.shape == (R, r_hidden) and out.dtype == jnp.float32

    ref = np.asarray(reference_forward(x_e, edge_index, rel, params))
    diff = float(np.max(np.abs(np.asarray(out) - ref)))
    assert np.allclose(np.asarray(out), ref, rtol=5e-2, atol=5e-2), f"max |diff|={diff}"
    print("KERNEL_OK")
</pallas_src>

<mosaic_0001>
module attributes {stable_mosaic.version = 11 : i64} {
  func.func @gat_e_to_r_kernel(%arg0: i32, %arg1: memref<128x384xf32, #tpu.memory_space<vmem>>, %arg2: memref<384x128xf32, #tpu.memory_space<vmem>>, %arg3: memref<384x128xf32, #tpu.memory_space<vmem>>, %arg4: memref<8x128xf32, #tpu.memory_space<vmem>>, %arg5: memref<32x128xbf16, #tpu.memory_space<vmem>>, %arg6: memref<32x128xbf16, #tpu.memory_space<vmem>>, %arg7: memref<32x128xbf16, #tpu.memory_space<vmem>>, %arg8: memref<128x128xf32, #tpu.memory_space<vmem>>, %arg9: memref<128x128xbf16, #tpu.memory_space<vmem>>, %arg10: memref<128x128xbf16, #tpu.memory_space<vmem>>, %arg11: memref<128x256xf32, #tpu.memory_space<vmem>>, %arg12: memref<128x1xf32, #tpu.memory_space<vmem>>, %arg13: memref<128x1xf32, #tpu.memory_space<vmem>>, %arg14: memref<1x1xf32, #tpu.memory_space<vmem>>) attributes {dimension_semantics = [#tpu.dimension_semantics<arbitrary>], iteration_bounds = array<i64: 2>, scalar_prefetch = 0 : i64, scratch_operands = 6 : i64, tpu.core_type = #tpu.core_type<tc>, window_params = [{pipeline_mode = #tpu.pipeline_mode<synchronous>, transform_indices = @transform_0, window_bounds = array<i64: 128, 384>}, {pipeline_mode = #tpu.pipeline_mode<synchronous>, transform_indices = @transform_1, window_bounds = array<i64: 384, 128>}, {pipeline_mode = #tpu.pipeline_mode<synchronous>, transform_indices = @transform_2, window_bounds = array<i64: 384, 128>}, {pipeline_mode = #tpu.pipeline_mode<synchronous>, transform_indices = @transform_3, window_bounds = array<i64: 8, 128>}, {transform_indices = @transform_4, window_bounds = array<i64: 32, 128>}, {transform_indices = @transform_5, window_bounds = array<i64: 32, 128>}, {transform_indices = @transform_6, window_bounds = array<i64: 32, 128>}, {pipeline_mode = #tpu.pipeline_mode<synchronous>, transform_indices = @transform_7, window_bounds = array<i64: 128, 128>}]} {
    %c0_i32 = arith.constant 0 : i32
    %0 = arith.cmpi eq, %arg0, %c0_i32 : i32
    %1 = arith.extui %0 : i1 to i32
    %c0_i32_0 = arith.constant 0 : i32
    %2 = arith.cmpi ne, %1, %c0_i32_0 : i32
    scf.if %2 {
      %c0_52 = arith.constant 0 : index
      %c0_53 = arith.constant 0 : index
      %87 = vector.load %arg1[%c0_52, %c0_53] : memref<128x384xf32, #tpu.memory_space<vmem>>, vector<128x384xf32>
      %c0_54 = arith.constant 0 : index
      %c0_55 = arith.constant 0 : index
      %88 = vector.load %arg2[%c0_54, %c0_55] : memref<384x128xf32, #tpu.memory_space<vmem>>, vector<384x128xf32>
      %cst_56 = arith.constant dense<0.000000e+00> : vector<128x128xf32>
      %89 = tpu.matmul %87, %88, %cst_56 {dimension_numbers = #tpu.dot_dimension_numbers<[1], [0], [0], [1], [0, 0, 1, 1], [], []>} : vector<128x384xf32>, vector<384x128xf32>, vector<128x128xf32> -> vector<128x128xf32>
      %c0_57 = arith.constant 0 : index
      %c0_58 = arith.constant 0 : index
      %90 = vector.load %arg1[%c0_57, %c0_58] : memref<128x384xf32, #tpu.memory_space<vmem>>, vector<128x384xf32>
      %c0_59 = arith.constant 0 : index
      %c0_60 = arith.constant 0 : index
      %91 = vector.load %arg3[%c0_59, %c0_60] : memref<384x128xf32, #tpu.memory_space<vmem>>, vector<384x128xf32>
      %cst_61 = arith.constant dense<0.000000e+00> : vector<128x128xf32>
      %92 = tpu.matmul %90, %91, %cst_61 {dimension_numbers = #tpu.dot_dimension_numbers<[1], [0], [0], [1], [0, 0, 1, 1], [], []>} : vector<128x384xf32>, vector<384x128xf32>, vector<128x128xf32> -> vector<128x128xf32>
      %93 = arith.truncf %89 : vector<128x128xf32> to vector<128x128xbf16>
      %c0_62 = arith.constant 0 : index
      %c0_63 = arith.constant 0 : index
      %94 = vector.load %arg9[%c0_62, %c0_63] : memref<128x128xbf16, #tpu.memory_space<vmem>>, vector<128x128xbf16>
      tpu.vector_store %arg9[%c0_62, %c0_63], %93 {strides = array<i32>} : memref<128x128xbf16, #tpu.memory_space<vmem>>, vector<128x128xbf16>,
      %95 = arith.truncf %92 : vector<128x128xf32> to vector<128x128xbf16>
      %c0_64 = arith.constant 0 : index
      %c0_65 = arith.constant 0 : index
      %96 = vector.load %arg10[%c0_64, %c0_65] : memref<128x128xbf16, #tpu.memory_space<vmem>>, vector<128x128xbf16>
      tpu.vector_store %arg10[%c0_64, %c0_65], %95 {strides = array<i32>} : memref<128x128xbf16, #tpu.memory_space<vmem>>, vector<128x128xbf16>,
      %cst_66 = arith.constant 0.000000e+00 : f32
      %97 = vector.broadcast %cst_66 : f32 to vector<128x256xf32>
      %c0_67 = arith.constant 0 : index
      %c0_68 = arith.constant 0 : index
      %98 = vector.load %arg11[%c0_67, %c0_68] : memref<128x256xf32, #tpu.memory_space<vmem>>, vector<128x256xf32>
      tpu.vector_store %arg11[%c0_67, %c0_68], %97 {strides = array<i32>} : memref<128x256xf32, #tpu.memory_space<vmem>>, vector<128x256xf32>,
      %cst_69 = arith.constant 0.000000e+00 : f32
      %99 = vector.broadcast %cst_69 : f32 to vector<128x1xf32>
      %c0_70 = arith.constant 0 : index
      %c0_71 = arith.constant 0 : index
      %100 = vector.load %arg12[%c0_70, %c0_71] : memref<128x1xf32, #tpu.memory_space<vmem>>, vector<128x1xf32>
      tpu.vector_store %arg12[%c0_70, %c0_71], %99 {strides = array<i32>} : memref<128x1xf32, #tpu.memory_space<vmem>>, vector<128x1xf32>,
      %cst_72 = arith.constant 0.000000e+00 : f32
      %101 = vector.broadcast %cst_72 : f32 to vector<128x1xf32>
      %c0_73 = arith.constant 0 : index
      %c0_74 = arith.constant 0 : index
      %102 = vector.load %arg13[%c0_73, %c0_74] : memref<128x1xf32, #tpu.memory_space<vmem>>, vector<128x1xf32>
      tpu.vector_store %arg13[%c0_73, %c0_74], %101 {strides = array<i32>} : memref<128x1xf32, #tpu.memory_space<vmem>>, vector<128x1xf32>,
      %cst_75 = arith.constant -1.000000e+30 : f32
      %103 = vector.broadcast %cst_75 : f32 to vector<1x1xf32>
      %c0_76 = arith.constant 0 : index
      %c0_77 = arith.constant 0 : index
      %104 = vector.load %arg14[%c0_76, %c0_77] : memref<1x1xf32, #tpu.memory_space<vmem>>, vector<1x1xf32>
      tpu.vector_store %arg14[%c0_76, %c0_77], %103 {strides = array<i32>} : memref<1x1xf32, #tpu.memory_space<vmem>>, vector<1x1xf32>,
    } else {
    }
    %c0 = arith.constant 0 : index
    %c0_1 = arith.constant 0 : index
    %3 = vector.load %arg5[%c0, %c0_1] : memref<32x128xbf16, #tpu.memory_space<vmem>>, vector<32x128xbf16>
    %c0_2 = arith.constant 0 : index
    %c0_3 = arith.constant 0 : index
    %4 = vector.load %arg9[%c0_2, %c0_3] : memref<128x128xbf16, #tpu.memory_space<vmem>>, vector<128x128xbf16>
    %cst = arith.constant dense<0.000000e+00> : vector<32x128xf32>
    %5 = tpu.matmul %3, %4, %cst {dimension_numbers = #tpu.dot_dimension_numbers<[1], [0], [0], [1], [0, 0, 1, 1], [], []>} : vector<32x128xbf16>, vector<128x128xbf16>, vector<32x128xf32> -> vector<32x128xf32>
    %c0_4 = arith.constant 0 : index
    %c0_5 = arith.constant 0 : index
    %6 = vector.load %arg6[%c0_4, %c0_5] : memref<32x128xbf16, #tpu.memory_space<vmem>>, vector<32x128xbf16>
    %c0_6 = arith.constant 0 : index
    %c0_7 = arith.constant 0 : index
    %7 = vector.load %arg10[%c0_6, %c0_7] : memref<128x128xbf16, #tpu.memory_space<vmem>>, vector<128x128xbf16>
    %cst_8 = arith.constant dense<0.000000e+00> : vector<32x128xf32>
    %8 = tpu.matmul %6, %7, %cst_8 {dimension_numbers = #tpu.dot_dimension_numbers<[1], [0], [0], [1], [0, 0, 1, 1], [], []>} : vector<32x128xbf16>, vector<128x128xbf16>, vector<32x128xf32> -> vector<32x128xf32>
    %c0_9 = arith.constant 0 : index
    %c0_10 = arith.constant 0 : index
    %9 = vector.load %arg4[%c0_9, %c0_10] : memref<8x128xf32, #tpu.memory_space<vmem>>, vector<8x128xf32>
    %10 = vector.extract_strided_slice %9 {offsets = [0, 0], sizes = [1, 128], strides = [1, 1]} : vector<8x128xf32> to vector<1x128xf32>
    %11 = vector.broadcast %10 : vector<1x128xf32> to vector<32x128xf32>
    %12 = arith.mulf %5, %11 : vector<32x128xf32>
    %13 = vector.extract_strided_slice %9 {offsets = [1, 0], sizes = [1, 128], strides = [1, 1]} : vector<8x128xf32> to vector<1x128xf32>
    %14 = vector.broadcast %13 : vector<1x128xf32> to vector<32x128xf32>
    %15 = arith.mulf %8, %14 : vector<32x128xf32>
    %16 = arith.addf %12, %15 : vector<32x128xf32>
    %cst_11 = arith.constant dense<0.000000e+00> : vector<32xf32>
    %17 = vector.multi_reduction <add>, %16, %cst_11 [1] : vector<32x128xf32> to vector<32xf32>
    %18 = vector.shape_cast %17 : vector<32xf32> to vector<32x1xf32>
    %19 = vector.extract_strided_slice %9 {offsets = [2, 0], sizes = [1, 128], strides = [1, 1]} : vector<8x128xf32> to vector<1x128xf32>
    %20 = vector.broadcast %19 : vector<1x128xf32> to vector<32x128xf32>
    %21 = arith.mulf %5, %20 : vector<32x128xf32>
    %22 = vector.extract_strided_slice %9 {offsets = [3, 0], sizes = [1, 128], strides = [1, 1]} : vector<8x128xf32> to vector<1x128xf32>
    %23 = vector.broadcast %22 : vector<1x128xf32> to vector<32x128xf32>
    %24 = arith.mulf %8, %23 : vector<32x128xf32>
    %25 = arith.addf %21, %24 : vector<32x128xf32>
    %cst_12 = arith.constant dense<0.000000e+00> : vector<32xf32>
    %26 = vector.multi_reduction <add>, %25, %cst_12 [1] : vector<32x128xf32> to vector<32xf32>
    %27 = vector.shape_cast %26 : vector<32xf32> to vector<32x1xf32>
    %cst_13 = arith.constant 0.000000e+00 : f32
    %28 = vector.broadcast %cst_13 : f32 to vector<32x1xf32>
    %29 = arith.cmpf oge, %18, %28 : vector<32x1xf32>
    %cst_14 = arith.constant 0.00999999977 : f32
    %30 = vector.broadcast %cst_14 : f32 to vector<32x1xf32>
    %31 = arith.mulf %30, %18 : vector<32x1xf32>
    %32 = arith.select %29, %18, %31 : vector<32x1xi1>, vector<32x1xf32>
    %cst_15 = arith.constant 0.000000e+00 : f32
    %33 = vector.broadcast %cst_15 : f32 to vector<32x1xf32>
    %34 = arith.cmpf oge, %27, %33 : vector<32x1xf32>
    %cst_16 = arith.constant 0.00999999977 : f32
    %35 = vector.broadcast %cst_16 : f32 to vector<32x1xf32>
    %36 = arith.mulf %35, %27 : vector<32x1xf32>
    %37 = arith.select %34, %27, %36 : vector<32x1xi1>, vector<32x1xf32>
    %c0_17 = arith.constant 0 : index
    %c0_18 = arith.constant 0 : index
    %38 = vector.load %arg14[%c0_17, %c0_18] : memref<1x1xf32, #tpu.memory_space<vmem>>, vector<1x1xf32>
    %39 = arith.maximumf %32, %37 : vector<32x1xf32>
    %cst_19 = arith.constant dense<0xFF800000> : vector<1xf32>
    %40 = vector.multi_reduction <maximumf>, %39, %cst_19 [0] : vector<32x1xf32> to vector<1xf32>
    %41 = vector.shape_cast %40 : vector<1xf32> to vector<1x1xf32>
    %42 = arith.maximumf %38, %41 : vector<1x1xf32>
    %43 = arith.subf %38, %42 : vector<1x1xf32>
    %44 = math.exp %43 : vector<1x1xf32>
    %c0_20 = arith.constant 0 : index
    %c0_21 = arith.constant 0 : index
    %45 = vector.load %arg11[%c0_20, %c0_21] : memref<128x256xf32, #tpu.memory_space<vmem>>, vector<128x256xf32>
    %46 = vector.broadcast %44 : vector<1x1xf32> to vector<128x256xf32>
    %47 = arith.mulf %45, %46 : vector<128x256xf32>
    %c0_22 = arith.constant 0 : index
    %c0_23 = arith.constant 0 : index
    %48 = vector.load %arg11[%c0_22, %c0_23] : memref<128x256xf32, #tpu.memory_space<vmem>>, vector<128x256xf32>
    tpu.vector_store %arg11[%c0_22, %c0_23], %47 {strides = array<i32>} : memref<128x256xf32, #tpu.memory_space<vmem>>, vector<128x256xf32>,
    %c0_24 = arith.constant 0 : index
    %c0_25 = arith.constant 0 : index
    %49 = vector.load %arg12[%c0_24, %c0_25] : memref<128x1xf32, #tpu.memory_space<vmem>>, vector<128x1xf32>
    %50 = vector.broadcast %44 : vector<1x1xf32> to vector<128x1xf32>
    %51 = arith.mulf %49, %50 : vector<128x1xf32>
    %c0_26 = arith.constant 0 : index
    %c0_27 = arith.constant 0 : index
    %52 = vector.load %arg12[%c0_26, %c0_27] : memref<128x1xf32, #tpu.memory_space<vmem>>, vector<128x1xf32>
    tpu.vector_store %arg12[%c0_26, %c0_27], %51 {strides = array<i32>} : memref<128x1xf32, #tpu.memory_space<vmem>>, vector<128x1xf32>,
    %c0_28 = arith.constant 0 : index
    %c0_29 = arith.constant 0 : index
    %53 = vector.load %arg13[%c0_28, %c0_29] : memref<128x1xf32, #tpu.memory_space<vmem>>, vector<128x1xf32>
    %54 = vector.broadcast %44 : vector<1x1xf32> to vector<128x1xf32>
    %55 = arith.mulf %53, %54 : vector<128x1xf32>
    %c0_30 = arith.constant 0 : index
    %c0_31 = arith.constant 0 : index
    %56 = vector.load %arg13[%c0_30, %c0_31] : memref<128x1xf32, #tpu.memory_space<vmem>>, vector<128x1xf32>
    tpu.vector_store %arg13[%c0_30, %c0_31], %55 {strides = array<i32>} : memref<128x1xf32, #tpu.memory_space<vmem>>, vector<128x1xf32>,
    %c0_32 = arith.constant 0 : index
    %c0_33 = arith.constant 0 : index
    %57 = vector.load %arg14[%c0_32, %c0_33] : memref<1x1xf32, #tpu.memory_space<vmem>>, vector<1x1xf32>
    tpu.vector_store %arg14[%c0_32, %c0_33], %42 {strides = array<i32>} : memref<1x1xf32, #tpu.memory_space<vmem>>, vector<1x1xf32>,
    %58 = vector.broadcast %42 : vector<1x1xf32> to vector<32x1xf32>
    %59 = arith.subf %32, %58 : vector<32x1xf32>
    %60 = math.exp %59 : vector<32x1xf32>
    %61 = vector.broadcast %42 : vector<1x1xf32> to vector<32x1xf32>
    %62 = arith.subf %37, %61 : vector<32x1xf32>
    %63 = math.exp %62 : vector<32x1xf32>
    %64 = vector.broadcast %60 : vector<32x1xf32> to vector<32x128xf32>
    %65 = arith.mulf %64, %5 : vector<32x128xf32>
    %66 = vector.broadcast %63 : vector<32x1xf32> to vector<32x128xf32>
    %67 = arith.mulf %66, %8 : vector<32x128xf32>
    %68 = tpu.concatenate %65, %67 in 1 : vector<32x128xf32>, vector<32x128xf32> -> vector<32x256xf32>
    %69 = arith.truncf %68 : vector<32x256xf32> to vector<32x256xbf16>
    %c0_34 = arith.constant 0 : index
    %c0_35 = arith.constant 0 : index
    %70 = vector.load %arg7[%c0_34, %c0_35] : memref<32x128xbf16, #tpu.memory_space<vmem>>, vector<32x128xbf16>
    %c0_36 = arith.constant 0 : index
    %c0_37 = arith.constant 0 : index
    %71 = vector.load %arg11[%c0_36, %c0_37] : memref<128x256xf32, #tpu.memory_space<vmem>>, vector<128x256xf32>
    %cst_38 = arith.constant dense<0.000000e+00> : vector<128x256xf32>
    %72 = tpu.matmul %70, %69, %cst_38 {dimension_numbers = #tpu.dot_dimension_numbers<[0], [0], [1], [1], [0, 1, 1, 1], [], []>} : vector<32x128xbf16>, vector<32x256xbf16>, vector<128x256xf32> -> vector<128x256xf32>
    %73 = arith.addf %71, %72 : vector<128x256xf32>
    %c0_39 = arith.constant 0 : index
    %c0_40 = arith.constant 0 : index
    %74 = vector.load %arg11[%c0_39, %c0_40] : memref<128x256xf32, #tpu.memory_space<vmem>>, vector<128x256xf32>
    tpu.vector_store %arg11[%c0_39, %c0_40], %73 {strides = array<i32>} : memref<128x256xf32, #tpu.memory_space<vmem>>, vector<128x256xf32>,
    %75 = arith.extf %70 : vector<32x128xbf16> to vector<32x128xf32>
    %c0_41 = arith.constant 0 : index
    %c0_42 = arith.constant 0 : index
    %76 = vector.load %arg12[%c0_41, %c0_42] : memref<128x1xf32, #tpu.memory_space<vmem>>, vector<128x1xf32>
    %cst_43 = arith.constant dense<0.000000e+00> : vector<128x1xf32>
    %77 = tpu.matmul %75, %60, %cst_43 {dimension_numbers = #tpu.dot_dimension_numbers<[0], [0], [1], [1], [0, 1, 1, 1], [], []>} : vector<32x128xf32>, vector<32x1xf32>, vector<128x1xf32> -> vector<128x1xf32>
    %78 = arith.addf %76, %77 : vector<128x1xf32>
    %c0_44 = arith.constant 0 : index
    %c0_45 = arith.constant 0 : index
    %79 = vector.load %arg12[%c0_44, %c0_45] : memref<128x1xf32, #tpu.memory_space<vmem>>, vector<128x1xf32>
    tpu.vector_store %arg12[%c0_44, %c0_45], %78 {strides = array<i32>} : memref<128x1xf32, #tpu.memory_space<vmem>>, vector<128x1xf32>,
    %c0_46 = arith.constant 0 : index
    %c0_47 = arith.constant 0 : index
    %80 = vector.load %arg13[%c0_46, %c0_47] : memref<128x1xf32, #tpu.memory_space<vmem>>, vector<128x1xf32>
    %cst_48 = arith.constant dense<0.000000e+00> : vector<128x1xf32>
    %81 = tpu.matmul %75, %63, %cst_48 {dimension_numbers = #tpu.dot_dimension_numbers<[0], [0], [1], [1], [0, 1, 1, 1], [], []>} : vector<32x128xf32>, vector<32x1xf32>, vector<128x1xf32> -> vector<128x1xf32>
    %82 = arith.addf %80, %81 : vector<128x1xf32>
    %c0_49 = arith.constant 0 : index
    %c0_50 = arith.constant 0 : index
    %83 = vector.load %arg13[%c0_49, %c0_50] : memref<128x1xf32, #tpu.memory_space<vmem>>, vector<128x1xf32>
    tpu.vector_store %arg13[%c0_49, %c0_50], %82 {strides = array<i32>} : memref<128x1xf32, #tpu.memory_space<vmem>>, vector<128x1xf32>,
    %c1_i32 = arith.constant 1 : i32
    %84 = arith.cmpi eq, %arg0, %c1_i32 : i32
    %85 = arith.extui %84 : i1 to i32
    %c0_i32_51 = arith.constant 0 : i32
    %86 = arith.cmpi ne, %85, %c0_i32_51 : i32
    scf.if %86 {
      %c0_52 = arith.constant 0 : index
      %c0_53 = arith.constant 0 : index
      %87 = vector.load %arg11[%c0_52, %c0_53] : memref<128x256xf32, #tpu.memory_space<vmem>>, vector<128x256xf32>
      %c0_54 = arith.constant 0 : index
      %c0_55 = arith.constant 0 : index
      %88 = vector.load %arg12[%c0_54, %c0_55] : memref<128x1xf32, #tpu.memory_space<vmem>>, vector<128x1xf32>
      %cst_56 = arith.constant 1.000000e-16 : f32
      %89 = vector.broadcast %cst_56 : f32 to vector<128x1xf32>
      %90 = arith.addf %88, %89 : vector<128x1xf32>
      %91 = tpu.reciprocal %90 {approx = true} : vector<128x1xf32> -> vector<128x1xf32>
      %c0_57 = arith.constant 0 : index
      %c0_58 = arith.constant 0 : index
      %92 = vector.load %arg13[%c0_57, %c0_58] : memref<128x1xf32, #tpu.memory_space<vmem>>, vector<128x1xf32>
      %cst_59 = arith.constant 1.000000e-16 : f32
      %93 = vector.broadcast %cst_59 : f32 to vector<128x1xf32>
      %94 = arith.addf %92, %93 : vector<128x1xf32>
      %95 = tpu.reciprocal %94 {approx = true} : vector<128x1xf32> -> vector<128x1xf32>
      %96 = vector.extract_strided_slice %87 {offsets = [0, 0], sizes = [128, 128], strides = [1, 1]} : vector<128x256xf32> to vector<128x128xf32>
      %97 = vector.broadcast %91 : vector<128x1xf32> to vector<128x128xf32>
      %98 = arith.mulf %96, %97 : vector<128x128xf32>
      %99 = vector.extract_strided_slice %87 {offsets = [0, 128], sizes = [128, 128], strides = [1, 1]} : vector<128x256xf32> to vector<128x128xf32>
      %100 = vector.broadcast %95 : vector<128x1xf32> to vector<128x128xf32>
      %101 = arith.mulf %99, %100 : vector<128x128xf32>
      %102 = arith.addf %98, %101 : vector<128x128xf32>
      %c0_60 = arith.constant 0 : index
      %c0_61 = arith.constant 0 : index
      %103 = vector.load %arg8[%c0_60, %c0_61] : memref<128x128xf32, #tpu.memory_space<vmem>>, vector<128x128xf32>
      tpu.vector_store %arg8[%c0_60, %c0_61], %102 {strides = array<i32>} : memref<128x128xf32, #tpu.memory_space<vmem>>, vector<128x128xf32>,
    } else {
    }
    return
  }
  func.func @transform_0(%arg0: i32) -> (i32, i32) {
    %c0_i32 = arith.constant 0 : i32
    %c0_i32_0 = arith.constant 0 : i32
    %c0_i32_1 = arith.constant 0 : i32
    return %c0_i32, %c0_i32_0 : i32, i32
  }
  func.func @transform_1(%arg0: i32) -> (i32, i32) {
    %c0_i32 = arith.constant 0 : i32
    %c0_i32_0 = arith.constant 0 : i32
    %c0_i32_1 = arith.constant 0 : i32
    return %c0_i32, %c0_i32_0 : i32, i32
  }
  func.func @transform_2(%arg0: i32) -> (i32, i32) {
    %c0_i32 = arith.constant 0 : i32
    %c0_i32_0 = arith.constant 0 : i32
    %c0_i32_1 = arith.constant 0 : i32
    return %c0_i32, %c0_i32_0 : i32, i32
  }
  func.func @transform_3(%arg0: i32) -> (i32, i32) {
    %c0_i32 = arith.constant 0 : i32
    %c0_i32_0 = arith.constant 0 : i32
    %c0_i32_1 = arith.constant 0 : i32
    return %c0_i32, %c0_i32_0 : i32, i32
  }
  func.func @transform_4(%arg0: i32) -> (i32, i32) {
    %c0_i32 = arith.constant 0 : i32
    %c0_i32_0 = arith.constant 0 : i32
    return %arg0, %c0_i32 : i32, i32
  }
  func.func @transform_5(%arg0: i32) -> (i32, i32) {
    %c0_i32 = arith.constant 0 : i32
    %c0_i32_0 = arith.constant 0 : i32
    return %arg0, %c0_i32 : i32, i32
  }
  func.func @transform_6(%arg0: i32) -> (i32, i32) {
    %c0_i32 = arith.constant 0 : i32
    %c0_i32_0 = arith.constant 0 : i32
    return %arg0, %c0_i32 : i32, i32
  }
  func.func @transform_7(%arg0: i32) -> (i32, i32) {
    %c0_i32 = arith.constant 0 : i32
    %c0_i32_0 = arith.constant 0 : i32
    %c0_i32_1 = arith.constant 0 : i32
    return %c0_i32, %c0_i32_0 : i32, i32
  }
}

</mosaic_0001>

<bundles_post_ra>
// kernel: tpu_custom_call.1
= control target key start
LH: loop header
LB: loop body
LE: loop exit
PB: predicated region body
PF: predicated region fallthrough
CT: control target
= control target key end

     0   :  { %s5056_s0 = inlined_call_operand.hbm [shape: f32[128,384], index: 0, kind: input, shape index: {}]   ;;  %s5057_s1 = inlined_call_operand.hbm [shape: f32[384,128], index: 1, kind: input, shape index: {}]   ;;  %s5058_s2 = inlined_call_operand.hbm [shape: f32[384,128], index: 2, kind: input, shape index: {}]   ;;  %s5059_s3 = inlined_call_operand.vmem [shape: f32[8,128], index: 3, kind: input, shape index: {}]   ;;  %s5060_s4 = inlined_call_operand.hbm [shape: bf16[64,128], index: 4, kind: input, shape index: {}]   ;;  %s5061_s5 = inlined_call_operand.hbm [shape: bf16[64,128], index: 5, kind: input, shape index: {}]   ;;  %s5062_s6 = inlined_call_operand.hbm [shape: bf16[64,128], index: 6, kind: input, shape index: {}]   ;;  %s5063_s7 = inlined_call_operand.hbm [shape: f32[128,128], index: 7, kind: output, shape index: {}]  }
   0x1   :  { %5085 = sst [smem:[#allocation27_spill]] %s5057_s1 }
   0x2   :  { %5086 = sst [smem:[#allocation28_spill]] %s5059_s3 }
   0x3   :  { %5087 = sst [smem:[#allocation29_spill]] %s5060_s4 }
   0x4   :  { %5088 = sst [smem:[#allocation30_spill]] %s5063_s7 }
   0x5   :  { %12 = vsyncpa [#allocation9], 0 }
   0x6   :  { %13 = vsyncpa [#allocation12], 0 }
   0x7   :  { %14 = vsyncpa [#allocation15], 0 }
   0x8   :  { %16 = vsyncpa [#allocation15 + $0x1], 0 }
   0x9   :  { %17 = vsyncpa [#allocation18], 0 }
   0xa   :  { %19 = vsyncpa [#allocation18 + $0x1], 0 }
   0xb   :  { %20 = vsyncpa [#allocation10], 0  ;;  %s4220_s24 = smov 0   ;;  %s4222_s25 = smov 0  }
   0xc   :  { %s4224_s26 = smov 0   ;;  %s4226_s27 = smov 0  }
   0xd LB: > { %s4239_s28 = sadd.s32 4294967295, %s4159_s27   ;;  %s4242_s29 = sadd.s32 1, %s4159_s27   ;;  %s4159_s27 = sphi %s4226_s27, %s5120_s27   ;;  %s4155_s26 = sphi %s4224_s26, %s5124_s26   ;;  %s4151_s25 = sphi %s4222_s25, %s5123_s25   ;;  %s4147_s24 = sphi %s4220_s24, %s5122_s24  }
   0xe   : > { %5089 = sst [smem:[#allocation25_spill]] %s4242_s29  ;;  %s114_s30 = ssub.s32 %s4159_s27, %s4242_s29 }
   0xf   : > { %s117_s8 = sadd.s32 1, %s4155_s26  ;;  %p115_p0 = scmp.eq.s32.totalorder %s114_s30, 0 }
  0x10   : > { %p124_p1 = scmp.ne.s32.totalorder %s4155_s26, %s4151_s25  ;;  %p125_p2 = scmp.eq.s32.totalorder %s4159_s27, 0 }
  0x11   : > { %p130_p3 = scmp.ne.s32.totalorder %s4151_s25, %s4147_s24  ;;  %p5064_p5 = scmp.eq.s32.totalorder %s4239_s28, 0 }
  0x12   : > { %s4252_s9 = scalar_select %p115_p0, %s4155_s26, %s117_s8  }
  0x13   : > { %p4254_p4 = por %p125_p2, %p124_p1  ;;  %p2995_p6 = scmp.ge.s32.totalorder %s4159_s27, 1 }
  0x14   : > { %5090 = sst [smem:[#allocation26_spill]] %s4252_s9  ;;  %p214_p7 = scmp.lt.s32.totalorder %s4159_s27, 3 }
  0x15   : > { %s5091_s10 = scalar_select %p4254_p4, 1, 0 }
  0x16   : > { %p4263_p8 = por %p5064_p5, %p130_p3  ;;  %p4268_p10 = pnand %p2995_p6, %p214_p7 }
  0x17   : > { %s4161_s13 = smov [#allocation11]   ;;  %s269_s16 = sand.u32 1, %s4159_s27  }
  0x18   : > { %s5092_s11 = scalar_select %p4263_p8, 1, 0 }
  0x19   : > { %s5093_s12 = scalar_select %p4268_p10, 1, 0 }
  0x1a   : > { %s239_s14 = sshll.u32 %s4161_s13, 4  ;;  %p3737_p11 = pneg %p4268_p10  ;;  %s240_s14 = int_to_ptr.vmem [resolvable:$true] %s239_s14 }
  0x1b   : > { %s5069_s17 = sand.u32 1, %s4155_s26   ;;  %s5095_s1 = sld [smem:[#allocation27_spill]] }
  0x1c   : > { %p4276_p12 = pnand %p3737_p11, %p5064_p5 }
  0x1e   : > { %s5094_s15 = scalar_select %p4276_p12, 1, 0 }
  0x1f   : > { %p4291_p1 = pneg %p4276_p12 }
  0x21   : > { %s3909_s20 = scalar_lea.hbm %s5095_s1, 6144 }
  0x22   : > { %p3910_p0 = scmp.ne.s32.totalorder %s5095_s1, %s3909_s20  ;;  %p3916_p6 = scmp.lt.u32.totalorder %s3909_s20, %s5095_s1 }
  0x23   : > { %s5096_s23 = scalar_select %p4291_p1, 1, 0 }
  0x24   : > { %p3912_p2 = pnand %p4291_p1, %p3910_p0 }
  0x26   : > { %p3913_p3 = pneg %p3912_p2 }
  0x28   : > { %p3918_p7 = pnand %p3916_p6, %p3913_p3 }
  0x2a   : > { %3921 = shalt.err (!%p3918_p7)
}
  0x2b   : > { %s3922_s8 = scalar_lea.vmem %s240_s14, 6144  ;;  %p3930_p13 = scmp.lt.s32.totalorder %s240_s14, %s240_s14 }
  0x2c   : > { %p3923_p11 = scmp.ne.s32.totalorder %s240_s14, %s3922_s8  ;;  %p3931_p8 = scmp.lt.s32.totalorder %s3922_s8, %s3922_s8 }
  0x2e   : > { %p3925_p9 = pnand %p3923_p11, %p4291_p1  ;;  %p3932_p10 = por %p3931_p8, %p3930_p13 }
  0x30   : > { %p3926_p5 = pneg %p3925_p9 }
  0x32   : > { %p3933_p4 = pnand %p3932_p10, %p3926_p5 }
  0x34   : > { %3936 = shalt.err (!%p3933_p4)
}
  0x35   : > { %s5074_s13 = smov 128   ;;  %s5075_s18 = smov 8  }
  0x36   : > { %3743 = dma.hbm_to_vmem [thread:$0]  (!%p4276_p12), %s5095_s1, 6144, %s240_s14, [#allocation12], %s5074_s13, %s5074_s13, %s5075_s18  }
  0x37   : > { %s4312_s21 = sshll.u32 %s5069_s17, 4  ;;  %s4315_s22 = sshll.u32 %s4159_s27, 8 }
  0x38   : > { %s5097_s4 = sld [smem:[#allocation29_spill]]  ;;  %s273_s9 = scalar_lea.vmem [#allocation14], %s4312_s21 }
  0x39   : > { %s280_s29 = sshll.u32 %s273_s9, 4  ;;  %p5098_p4 = scmp.ne.s32.totalorder %s5091_s10, 0  ;;  %s4332_s29 = int_to_ptr.vmem [resolvable:$true] %s280_s29 }
  0x3a   : > { %p5099_p5 = scmp.lt.s32.totalorder %s4159_s27, 2  ;;  %s4334_s19 = scalar_lea.sflag [#allocation15], %s269_s16 }
  0x3c   : > { %p4328_p8 = pnand %p5099_p5, %p5098_p4 }
  0x3e   : > { %s4321_s8 = scalar_lea.hbm %s5097_s4, %s4315_s22  ;;  %p4340_p10 = pneg %p4328_p8 }
  0x3f   : > { %s5100_s14 = scalar_select %p4328_p8, 1, 0 }
  0x40   : > { %s3937_s20 = scalar_lea.hbm %s4321_s8, 256  ;;  %s3942_s10 = scalar_lea.hbm %s5097_s4, 512 }
  0x41   : > { %p3938_p9 = scmp.ne.s32.totalorder %s4321_s8, %s3937_s20  ;;  %p3943_p2 = scmp.lt.u32.totalorder %s4321_s8, %s5097_s4 }
  0x42   : > { %s5101_s24 = scalar_select %p4340_p10, 1, 0 }
  0x43   : > { %p3940_p13 = pnand %p4340_p10, %p3938_p9  ;;  %p3944_p3 = scmp.lt.u32.totalorder %s3942_s10, %s3937_s20 }
  0x44   : > { %p3946_p7 = scmp.lt.u32.totalorder %s3937_s20, %s4321_s8 }
  0x45   : > { %p3941_p0 = pneg %p3940_p13  ;;  %p3945_p6 = por %p3944_p3, %p3943_p2 }
  0x47   : > { %p3947_p11 = por %p3946_p7, %p3945_p6 }
  0x49   : > { %p3948_p4 = pnand %p3947_p11, %p3941_p0 }
  0x4b   : > { %3951 = shalt.err (!%p3948_p4)
}
  0x4c   : > { %s3952_s16 = scalar_lea.vmem %s4332_s29, 256  ;;  %s4164_s27 = smov [#allocation14]  }
  0x4d   : > { %p3953_p5 = scmp.ne.s32.totalorder %s4332_s29, %s3952_s16  ;;  %s3957_s9 = sshll.u32 %s4164_s27, 4  ;;  %s3958_s9 = int_to_ptr.vmem [resolvable:$false] %s3957_s9 }
  0x4e   : > { %s3959_s17 = scalar_lea.vmem %s3958_s9, 512  ;;  %p3960_p12 = scmp.lt.s32.totalorder %s4332_s29, %s3958_s9 }
  0x4f   : > { %p3955_p9 = pnand %p3953_p5, %p4340_p10  ;;  %p3961_p1 = scmp.lt.s32.totalorder %s3959_s17, %s3952_s16 }
  0x51   : > { %p3956_p13 = pneg %p3955_p9  ;;  %p3962_p2 = por %p3961_p1, %p3960_p12 }
  0x53   : > { %p3963_p3 = pnand %p3962_p2, %p3956_p13 }
  0x55   : > { %3966 = shalt.err (!%p3963_p3)
}
  0x56   : > { %s5078_s20 = smov 64   ;;  %s5080_s10 = smov 4  }
  0x57   : > { %3750 = dma.hbm_to_vmem [thread:$0]  (!%p4328_p8), %s4321_s8, 256, %s4332_s29, %s4334_s19, %s5078_s20, %s5078_s20, %s5080_s10  }
  0x58   : > { %s4167_s30 = smov [#allocation8]   ;;  %s3967_s17 = scalar_lea.hbm %s5056_s0, 6144 }
  0x59   : > { %s226_s27 = sshll.u32 %s4167_s30, 4  ;;  %p3968_p12 = scmp.ne.s32.totalorder %s5056_s0, %s3967_s17  ;;  %s227_s27 = int_to_ptr.vmem [resolvable:$true] %s226_s27 }
  0x5a   : > { %p5102_p1 = scmp.ne.s32.totalorder %s5096_s23, 0  ;;  %p3974_p7 = scmp.lt.u32.totalorder %s3967_s17, %s5056_s0 }
  0x5c   : > { %p3970_p0 = pnand %p3968_p12, %p5102_p1 }
  0x5e   : > { %p3971_p6 = pneg %p3970_p0 }
  0x60   : > { %p3976_p11 = pnand %p3974_p7, %p3971_p6 }
  0x62   : > { %3979 = shalt.err (!%p3976_p11)
}
  0x63   : > { %s3980_s29 = scalar_lea.vmem %s227_s27, 6144  ;;  %p3988_p13 = scmp.lt.s32.totalorder %s227_s27, %s227_s27 }
  0x64   : > { %p3981_p4 = scmp.ne.s32.totalorder %s227_s27, %s3980_s29  ;;  %p3989_p2 = scmp.lt.s32.totalorder %s3980_s29, %s3980_s29 }
  0x66   : > { %p3983_p5 = pnand %p3981_p4, %p5102_p1  ;;  %p3990_p3 = por %p3989_p2, %p3988_p13 }
  0x68   : > { %p3984_p9 = pneg %p3983_p5 }
  0x6a   : > { %p3991_p8 = pnand %p3990_p3, %p3984_p9 }
  0x6c   : > { %3994 = shalt.err (!%p3991_p8)
}
  0x6d   : > { %s4168_s13 = smov 384   ;;  %s4169_s18 = smov 24  }
  0x6e   : > { %p5103_p12 = scmp.ne.s32.totalorder %s5094_s15, 0  ;;  %s4170_s8 = smov [#allocation13]  }
  0x6f   : > { %s252_s30 = sshll.u32 %s4170_s8, 4  ;;  %s4389_s17 = scalar_lea.hbm %s5061_s5, %s4315_s22  ;;  %s253_s30 = int_to_ptr.vmem [resolvable:$true] %s252_s30 }
  0x70   : > { %3740 = dma.hbm_to_vmem [thread:$0]  (!%p5103_p12), %s5056_s0, 6144, %s227_s27, [#allocation9], %s4168_s13, %s4168_s13, %s4169_s18  }
  0x71   : > { %s3995_s10 = scalar_lea.hbm %s5058_s2, 6144 }
  0x72   : > { %p3996_p8 = scmp.ne.s32.totalorder %s5058_s2, %s3995_s10  ;;  %p4002_p7 = scmp.lt.u32.totalorder %s3995_s10, %s5058_s2 }
  0x74   : > { %p3998_p0 = pnand %p3996_p8, %p5102_p1 }
  0x76   : > { %p3999_p6 = pneg %p3998_p0 }
  0x78   : > { %p4004_p11 = pnand %p4002_p7, %p3999_p6 }
  0x7a   : > { %4007 = shalt.err (!%p4004_p11)
}
  0x7b   : > { %s4008_s18 = scalar_lea.vmem %s253_s30, 6144  ;;  %p4016_p13 = scmp.lt.s32.totalorder %s253_s30, %s253_s30 }
  0x7c   : > { %p4009_p4 = scmp.ne.s32.totalorder %s253_s30, %s4008_s18  ;;  %p4017_p2 = scmp.lt.s32.totalorder %s4008_s18, %s4008_s18 }
  0x7e   : > { %p4011_p5 = pnand %p4009_p4, %p5102_p1  ;;  %p4018_p3 = por %p4017_p2, %p4016_p13 }
  0x80   : > { %p4012_p9 = pneg %p4011_p5 }
  0x82   : > { %p4019_p10 = pnand %p4018_p3, %p4012_p9 }
  0x84   : > { %4022 = shalt.err (!%p4019_p10)
}
  0x85   : > { %s5104_s3 = smov 8   ;;  %s5105_s7 = smov 128  }
  0x86   : > { %3746 = dma.hbm_to_vmem [thread:$0]  (!%p5103_p12), %s5058_s2, 6144, %s253_s30, [#allocation12], %s5105_s7, %s5105_s7, %s5104_s3  }
  0x87   : > { %s294_s23 = scalar_lea.vmem [#allocation16], %s4312_s21  ;;  %s4023_s4 = scalar_lea.hbm %s4389_s17, 256 }
  0x88   : > { %s301_s1 = sshll.u32 %s294_s23, 4  ;;  %p4024_p10 = scmp.ne.s32.totalorder %s4389_s17, %s4023_s4  ;;  %s4413_s1 = int_to_ptr.vmem [resolvable:$true] %s301_s1 }
  0x89   : > { %p5106_p1 = scmp.ne.s32.totalorder %s5101_s24, 0  ;;  %s4028_s9 = scalar_lea.hbm %s5061_s5, 512 }
  0x8a   : > { %p4029_p6 = scmp.lt.u32.totalorder %s4389_s17, %s5061_s5  ;;  %p4030_p7 = scmp.lt.u32.totalorder %s4028_s9, %s4023_s4 }
  0x8b   : > { %p4026_p8 = pnand %p4024_p10, %p5106_p1  ;;  %p4032_p12 = scmp.lt.u32.totalorder %s4023_s4, %s4389_s17 }
  0x8c   : > { %p4031_p11 = por %p4030_p7, %p4029_p6 }
  0x8d   : > { %p4027_p0 = pneg %p4026_p8 }
  0x8e   : > { %p4033_p4 = por %p4032_p12, %p4031_p11 }
  0x90   : > { %p4034_p5 = pnand %p4033_p4, %p4027_p0 }
  0x92   : > { %4037 = shalt.err (!%p4034_p5)
}
  0x93   : > { %s4038_s30 = scalar_lea.vmem %s4413_s1, 256  ;;  %s4171_s27 = smov [#allocation16]  }
  0x94   : > { %p4039_p9 = scmp.ne.s32.totalorder %s4413_s1, %s4038_s30  ;;  %s4043_s13 = sshll.u32 %s4171_s27, 4  ;;  %s4044_s13 = int_to_ptr.vmem [resolvable:$false] %s4043_s13 }
  0x95   : > { %s4045_s18 = scalar_lea.vmem %s4044_s13, 512  ;;  %p4046_p3 = scmp.lt.s32.totalorder %s4413_s1, %s4044_s13 }
  0x96   : > { %p4041_p13 = pnand %p4039_p9, %p5106_p1  ;;  %p4047_p10 = scmp.lt.s32.totalorder %s4045_s18, %s4038_s30 }
  0x98   : > { %p4042_p2 = pneg %p4041_p13  ;;  %p4048_p8 = por %p4047_p10, %p4046_p3 }
  0x9a   : > { %p4049_p6 = pnand %p4048_p8, %p4042_p2 }
  0x9c   : > { %4052 = shalt.err (!%p4049_p6)
}
  0x9d   : > { %p5107_p0 = scmp.ne.s32.totalorder %s5100_s14, 0  ;;  %s5108_s3 = smov 4  }
  0x9e   : > { %s5109_s7 = smov 64   ;;  %s4444_s23 = scalar_lea.hbm %s5062_s6, %s4315_s22 }
  0x9f   : > { %3753 = dma.hbm_to_vmem [thread:$0]  (!%p5107_p0), %s4389_s17, 256, %s4413_s1, %s4334_s19, %s5109_s7, %s5109_s7, %s5108_s3  }
  0xa0   : > { %s315_s4 = scalar_lea.vmem [#allocation17], %s4312_s21  ;;  %s5110_s8 = sand.u32 1, %s4155_s26  }
  0xa1   : > { %s322_s15 = sshll.u32 %s315_s4, 4  ;;  %s4451_s9 = scalar_lea.sflag [#allocation18], %s5110_s8  ;;  %s4447_s15 = int_to_ptr.vmem [resolvable:$true] %s322_s15 }
  0xa2   : > { %s4053_s16 = scalar_lea.hbm %s4444_s23, 256  ;;  %s4058_s22 = scalar_lea.hbm %s5062_s6, 512 }
  0xa3   : > { %p4054_p7 = scmp.ne.s32.totalorder %s4444_s23, %s4053_s16  ;;  %p4059_p4 = scmp.lt.u32.totalorder %s4444_s23, %s5062_s6 }
  0xa4   : > { %p4060_p5 = scmp.lt.u32.totalorder %s4058_s22, %s4053_s16  ;;  %p4062_p13 = scmp.lt.u32.totalorder %s4053_s16, %s4444_s23 }
  0xa5   : > { %p4056_p11 = pnand %p4054_p7, %p5106_p1 }
  0xa6   : > { %p4061_p9 = por %p4060_p5, %p4059_p4 }
  0xa7   : > { %p4057_p12 = pneg %p4056_p11 }
  0xa8   : > { %p4063_p2 = por %p4062_p13, %p4061_p9 }
  0xaa   : > { %p4064_p3 = pnand %p4063_p2, %p4057_p12 }
  0xac   : > { %4067 = shalt.err (!%p4064_p3)
}
  0xad   : > { %s4068_s21 = scalar_lea.vmem %s4447_s15, 256  ;;  %s4172_s30 = smov [#allocation17]  }
  0xae   : > { %p4069_p10 = scmp.ne.s32.totalorder %s4447_s15, %s4068_s21  ;;  %s4073_s27 = sshll.u32 %s4172_s30, 4  ;;  %s4074_s27 = int_to_ptr.vmem [resolvable:$false] %s4073_s27 }
  0xaf   : > { %s4075_s13 = scalar_lea.vmem %s4074_s27, 512  ;;  %p4076_p7 = scmp.lt.s32.totalorder %s4447_s15, %s4074_s27 }
  0xb0   : > { %p4071_p8 = pnand %p4069_p10, %p5106_p1  ;;  %p4077_p11 = scmp.lt.s32.totalorder %s4075_s13, %s4068_s21 }
  0xb2   : > { %p4072_p6 = pneg %p4071_p8  ;;  %p4078_p4 = por %p4077_p11, %p4076_p7 }
  0xb4   : > { %p4079_p5 = pnand %p4078_p4, %p4072_p6 }
  0xb6   : > { %4082 = shalt.err (!%p4079_p5)
}
  0xb7   : > { %3756 = dma.hbm_to_vmem [thread:$0]  (!%p5107_p0), %s4444_s23, 256, %s4447_s15, %s4451_s9, %s5109_s7, %s5109_s7, %s5108_s3  }
  0xb8   : > { %p5111_p1 = scmp.ne.s32.totalorder %s5093_s12, 0 }
  0xb9   : > { %p5112_p12 = scmp.eq.s32.totalorder (!%p5111_p1), %s4239_s28, 0 }
  0xba   : > { %334 = sbr.rel (%p5111_p1) target bundleno = 1702 (0x6a6), region = 48 }
  0xc1   : > { %4126 = dma.done.wait (%p5112_p12), [#allocation9], 6144   ;;  %p5113_p9 = pmov %p5112_p12 }
  0xc3   : > { %4128 = vsyncadd (%p5113_p9), [#allocation9], 4294961152  ;;  %p5114_p13 = pmov %p5113_p9 }
  0xc4   : > { %p5115_p2 = pmov %p5113_p9 }
  0xc5   : > { %4130 = dma.done.wait (%p5114_p13), [#allocation12], 12288  }
  0xc6   : > { %4132 = vsyncadd (%p5115_p2), [#allocation12], 4294955008  ;;  %s348_s14 = sand.u32 1, %s4239_s28   ;;  %s350_s24 = sand.u32 1, %s4151_s25  }
  0xc7   : > { %s4490_s18 = sshll.u32 %s350_s24, 4  ;;  %s349_s12 = scalar_lea.sflag [#allocation15], %s348_s14 }
  0xc8   : > { %s352_s3 = scalar_lea.vmem [#allocation14], %s4490_s18  ;;  %p5116_p0 = scmp.ne.s32.totalorder %s5092_s11, 0 }
  0xca   : > { %4134 = dma.done.wait (%p5116_p0), %s349_s12, 512  }
  0xcb   : > { %4136 = vsyncadd (%p5116_p0), %s349_s12, 4294966784  ;;  %s361_s7 = scalar_lea.vmem [#allocation16], %s4490_s18  ;;  %s367_s20 = scalar_lea.sflag [#allocation18], %s350_s24 }
  0xcc   : > { %s370_s10 = scalar_lea.vmem [#allocation17], %s4490_s18 }
  0xcd   : > { %4138 = dma.done.wait (%p5116_p0), %s367_s20, 256  }
  0xce   : > { %4140 = vsyncadd (%p5116_p0), %s367_s20, 4294967040  ;;  %p5117_p3 = scmp.ne.s32.totalorder %s4239_s28, 0 }
  0xcf   : > { %v478_v0 = vld [vmem:[#allocation11 + $0x80] sm:$0xff] (!%p5117_p3)  ;;  %v479_v1 = vld [vmem:[#allocation11 + $0x88] sm:$0xff] (!%p5117_p3)  ;;  %v480_v9 = vld [vmem:[#allocation11 + $0x90] sm:$0xff] (!%p5117_p3)  ;;  %vm1202_vm0 = vcmask (!%p5117_p3), 7168   ;;  %vm1235_vm1 = vcmask (!%p5117_p3), 0  }
  0xd0   : > { %413 = sbr.rel (%p5117_p3) target bundleno = 556 (0x22c), region = 76  ;;  %v494_v2 = vld [vmem:[#allocation11 + $0x100] sm:$0xff] (!%p5117_p3)  ;;  %v3571_v3 = vpack.c.bf16 (!%p5117_p3), %v479_v1, %v478_v0  ;;  %v495_v4 = vld [vmem:[#allocation11 + $0x108] sm:$0xff] (!%p5117_p3)  ;;  %v481_v10 = vld [vmem:[#allocation11 + $0x98] sm:$0xff] (!%p5117_p3) }
  0xd1   : > { %v462_v5 = vld [vmem:[#allocation11] sm:$0xff] (!%p5117_p3)  ;;  %v463_v6 = vld [vmem:[#allocation11 + $0x8] sm:$0xff] (!%p5117_p3)  ;;  %v3603_v7 = vpack.c.bf16 (!%p5117_p3), %v495_v4, %v494_v2  ;;  %v496_v11 = vld [vmem:[#allocation11 + $0x110] sm:$0xff] (!%p5117_p3)  ;;  %v3575_v12 = vpack.c.bf16 (!%p5117_p3), %v481_v10, %v480_v9 }
  0xd2   : > { %v3573_v8 = vpack.c.bf16 (!%p5117_p3), %v463_v6, %v462_v5  ;;  %3572 = vmatprep.subr.bf16.mxu0 (!%p5117_p3), %v3571_v3  ;;  %v497_v13 = vld [vmem:[#allocation11 + $0x118] sm:$0xff] (!%p5117_p3)  ;;  %v464_v14 = vld [vmem:[#allocation11 + $0x10] sm:$0xff] (!%p5117_p3)  ;;  %v482_v18 = vld [vmem:[#allocation11 + $0xa0] sm:$0xff] (!%p5117_p3) }
  0xd3   : > { %v465_v15 = vld [vmem:[#allocation11 + $0x18] sm:$0xff] (!%p5117_p3)  ;;  %3604 = vmatprep.subr.bf16.mxu1 (!%p5117_p3), %v3603_v7  ;;  %v3607_v16 = vpack.c.bf16 (!%p5117_p3), %v497_v13, %v496_v11  ;;  %v483_v19 = vld [vmem:[#allocation11 + $0xa8] sm:$0xff] (!%p5117_p3)  ;;  %v498_v20 = vld [vmem:[#allocation11 + $0x120] sm:$0xff] (!%p5117_p3) }
  0xd4   : > { %3574 = vmatpush3.bf16.msra.mxu0 (!%p5117_p3), %v3573_v8  ;;  %v3577_v17 = vpack.c.bf16 (!%p5117_p3), %v465_v15, %v464_v14  ;;  %3606 = vmatpush3.bf16.msra.mxu1 (!%p5117_p3), %v3603_v7  ;;  %v3579_v21 = vpack.c.bf16 (!%p5117_p3), %v483_v19, %v482_v18  ;;  %v499_v22 = vld [vmem:[#allocation11 + $0x128] sm:$0xff] (!%p5117_p3)  ;;  %v466_v23 = vld [vmem:[#allocation11 + $0x20] sm:$0xff] (!%p5117_p3)  ;;  %v484_v26 = vld [vmem:[#allocation11 + $0xb0] sm:$0xff] (!%p5117_p3) }
  0xd5   : > { %3576 = vmatprep.subr.bf16.mxu0 (!%p5117_p3), %v3575_v12  ;;  %v467_v24 = vld [vmem:[#allocation11 + $0x28] sm:$0xff] (!%p5117_p3)  ;;  %3608 = vmatprep.subr.bf16.mxu1 (!%p5117_p3), %v3607_v16  ;;  %v3611_v25 = vpack.c.bf16 (!%p5117_p3), %v499_v22, %v498_v20  ;;  %v485_v27 = vld [vmem:[#allocation11 + $0xb8] sm:$0xff] (!%p5117_p3)  ;;  %v500_v28 = vld [vmem:[#allocation11 + $0x130] sm:$0xff] (!%p5117_p3) }
  0xd6   : > { %v501_v29 = vld [vmem:[#allocation11 + $0x138] sm:$0xff] (!%p5117_p3)  ;;  %v3581_v30 = vpack.c.bf16 (!%p5117_p3), %v467_v24, %v466_v23  ;;  %v3583_v31 = vpack.c.bf16 (!%p5117_p3), %v485_v27, %v484_v26  ;;  %v468_v32 = vld [vmem:[#allocation11 + $0x30] sm:$0xff] (!%p5117_p3)  ;;  %v486_v35 = vld [vmem:[#allocation11 + $0xc0] sm:$0xff] (!%p5117_p3) }
  0xd7   : > { %v469_v33 = vld [vmem:[#allocation11 + $0x38] sm:$0xff]  ;;  %v3615_v34 = vpack.c.bf16 %v501_v29, %v500_v28  ;;  %v487_v36 = vld [vmem:[#allocation11 + $0xc8] sm:$0xff]  ;;  %v502_v37 = vld [vmem:[#allocation11 + $0x140] sm:$0xff] }
  0xd8   : > { %3578 = vmatpush3.bf16.msra.mxu0 %v3577_v17  ;;  %3610 = vmatpush3.bf16.msra.mxu1 %v3607_v16  ;;  %v503_v38 = vld [vmem:[#allocation11 + $0x148] sm:$0xff]  ;;  %v3585_v39 = vpack.c.bf16 %v469_v33, %v468_v32  ;;  %v3587_v40 = vpack.c.bf16 %v487_v36, %v486_v35  ;;  %v470_v41 = vld [vmem:[#allocation11 + $0x40] sm:$0xff]  ;;  %v488_v44 = vld [vmem:[#allocation11 + $0xd0] sm:$0xff] }
  0xd9   : > { %3580 = vmatprep.subr.bf16.mxu0 %v3579_v21  ;;  %3612 = vmatprep.subr.bf16.mxu1 %v3611_v25  ;;  %v471_v42 = vld [vmem:[#allocation11 + $0x48] sm:$0xff]  ;;  %v3619_v43 = vpack.c.bf16 %v503_v38, %v502_v37  ;;  %v489_v45 = vld [vmem:[#allocation11 + $0xd8] sm:$0xff]  ;;  %v504_v46 = vld [vmem:[#allocation11 + $0x150] sm:$0xff] }
  0xda   : > { %v505_v47 = vld [vmem:[#allocation11 + $0x158] sm:$0xff]  ;;  %v3589_v48 = vpack.c.bf16 %v471_v42, %v470_v41  ;;  %v4505_v49 = vld [vmem:[#allocation8 + $0x8] sm:$0xff]  ;;  %v4507_v50 = vld [vmem:[#allocation8 + $0x10] sm:$0xff]  ;;  %v3591_v51 = vpack.c.bf16 %v489_v45, %v488_v44 }
  0xdb   : > { %v472_v52 = vld [vmem:[#allocation11 + $0x50] sm:$0xff]  ;;  %v473_v53 = vld [vmem:[#allocation11 + $0x58] sm:$0xff]  ;;  %v3623_v54 = vpack.c.bf16 %v505_v47, %v504_v46  ;;  %v490_v55 = vld [vmem:[#allocation11 + $0xe0] sm:$0xff]  ;;  %574 = vmatprep.mubr.f32.mxu0 %v4505_v49  ;;  %3387 = vmatprep.mubr.f32.mxu1 %v4507_v50 }
  0xdc   : > { %3582 = vmatpush3.bf16.msra.mxu0 %v3581_v30  ;;  %3614 = vmatpush3.bf16.msra.mxu1 %v3611_v25  ;;  %v491_v56 = vld [vmem:[#allocation11 + $0xe8] sm:$0xff]  ;;  %v506_v57 = vld [vmem:[#allocation11 + $0x160] sm:$0xff]  ;;  %v3593_v59 = vpack.c.bf16 %v473_v53, %v472_v52  ;;  %v492_v0 = vld [vmem:[#allocation11 + $0xf0] sm:$0xff] }
  0xdd   : > { %3584 = vmatprep.subr.bf16.mxu0 %v3583_v31  ;;  %3616 = vmatprep.subr.bf16.mxu1 %v3615_v34  ;;  %v507_v58 = vld [vmem:[#allocation11 + $0x168] sm:$0xff]  ;;  %v3595_v60 = vpack.c.bf16 %v491_v56, %v490_v55  ;;  %v474_v61 = vld [vmem:[#allocation11 + $0x60] sm:$0xff]  ;;  %v493_v1 = vld [vmem:[#allocation11 + $0xf8] sm:$0xff] }
  0xde   : > { %v475_v62 = vld [vmem:[#allocation11 + $0x68] sm:$0xff]  ;;  %v3627_v63 = vpack.c.bf16 %v507_v58, %v506_v57  ;;  %v508_v2 = vld [vmem:[#allocation11 + $0x170] sm:$0xff]  ;;  %v509_v3 = vld [vmem:[#allocation11 + $0x178] sm:$0xff]  ;;  %v3599_v5 = vpack.c.bf16 %v493_v1, %v492_v0 }
  0xdf   : > { %v3597_v4 = vpack.c.bf16 %v475_v62, %v474_v61  ;;  %v476_v6 = vld [vmem:[#allocation11 + $0x70] sm:$0xff]  ;;  %v477_v7 = vld [vmem:[#allocation11 + $0x78] sm:$0xff]  ;;  %v3631_v8 = vpack.c.bf16 %v509_v3, %v508_v2  ;;  %v832_v9 = vld [vmem:[#allocation13 + $0x100] sm:$0xff] }
  0xe0   : > { %3586 = vmatpush3.bf16.msra.mxu0 %v3585_v39  ;;  %3618 = vmatpush3.bf16.msra.mxu1 %v3615_v34  ;;  %v833_v10 = vld [vmem:[#allocation13 + $0x108] sm:$0xff]  ;;  %v816_v11 = vld [vmem:[#allocation13 + $0x80] sm:$0xff]  ;;  %v3601_v13 = vpack.c.bf16 %v477_v7, %v476_v6  ;;  %v818_v18 = vld [vmem:[#allocation13 + $0x90] sm:$0xff] }
  0xe1   : > { %3588 = vmatprep.subr.bf16.mxu0 %v3587_v40  ;;  %3620 = vmatprep.subr.bf16.mxu1 %v3619_v43  ;;  %v817_v12 = vld [vmem:[#allocation13 + $0x88] sm:$0xff]  ;;  %v3667_v14 = vpack.c.bf16 %v833_v10, %v832_v9  ;;  %v800_v16 = vld [vmem:[#allocation13] sm:$0xff]  ;;  %v819_v19 = vld [vmem:[#allocation13 + $0x98] sm:$0xff] }
  0xe2   : > { %v3635_v15 = vpack.c.bf16 %v817_v12, %v816_v11  ;;  %v801_v17 = vld [vmem:[#allocation13 + $0x8] sm:$0xff]  ;;  %v4511_v20 = vld [vmem:[#allocation8] sm:$0xff]  ;;  %v834_v21 = vld [vmem:[#allocation13 + $0x110] sm:$0xff]  ;;  %v3639_v27 = vpack.c.bf16 %v819_v19, %v818_v18 }
  0xe3   : > { %v835_v22 = vld [vmem:[#allocation13 + $0x118] sm:$0xff]  ;;  %v4513_v23 = vld [vmem:[#allocation8 + $0x28] sm:$0xff]  ;;  %v3637_v24 = vpack.c.bf16 %v801_v17, %v800_v16  ;;  %v4515_v25 = vld [vmem:[#allocation8 + $0x20] sm:$0xff] }
  0xe4   : > { %3590 = vmatpush3.bf16.msra.mxu0 %v3589_v48  ;;  %3622 = vmatpush3.bf16.msra.mxu1 %v3619_v43  ;;  %v4517_v26 = vld [vmem:[#allocation8 + $0x40] sm:$0xff]  ;;  %v802_v28 = vld [vmem:[#allocation13 + $0x10] sm:$0xff]  ;;  %v803_v29 = vld [vmem:[#allocation13 + $0x18] sm:$0xff]  ;;  %v3671_v32 = vpack.c.bf16 %v835_v22, %v834_v21 }
  0xe5   : > { %3592 = vmatprep.subr.bf16.mxu0 %v3591_v51  ;;  %3624 = vmatprep.subr.bf16.mxu1 %v3623_v54  ;;  %v820_v30 = vld [vmem:[#allocation13 + $0xa0] sm:$0xff]  ;;  %v821_v31 = vld [vmem:[#allocation13 + $0xa8] sm:$0xff]  ;;  %v4522_v33 = vld [vmem:[#allocation8 + $0x18] sm:$0xff]  ;;  %v3641_v37 = vpack.c.bf16 %v803_v29, %v802_v28 }
  0xe6   : > { %v836_v34 = vld [vmem:[#allocation13 + $0x120] sm:$0xff]  ;;  %v837_v35 = vld [vmem:[#allocation13 + $0x128] sm:$0xff]  ;;  %v4525_v36 = vld [vmem:[#allocation8 + $0x58] sm:$0xff]  ;;  %v3643_v40 = vpack.c.bf16 %v821_v31, %v820_v30 }
  0xe7   : > { %v4527_v38 = vld [vmem:[#allocation8 + $0x38] sm:$0xff]  ;;  %v4529_v39 = vld [vmem:[#allocation8 + $0x70] sm:$0xff]  ;;  %v804_v41 = vld [vmem:[#allocation13 + $0x20] sm:$0xff]  ;;  %v3675_v45 = vpack.c.bf16 %v837_v35, %v836_v34 }
  0xe8   : > { %3594 = vmatpush3.bf16.msra.mxu0 %v3593_v59  ;;  %3626 = vmatpush3.bf16.msra.mxu1 %v3623_v54  ;;  %v805_v42 = vld [vmem:[#allocation13 + $0x28] sm:$0xff]  ;;  %v822_v43 = vld [vmem:[#allocation13 + $0xb0] sm:$0xff]  ;;  %v823_v44 = vld [vmem:[#allocation13 + $0xb8] sm:$0xff] }
  0xe9   : > { %3596 = vmatprep.subr.bf16.mxu0 %v3595_v60  ;;  %3628 = vmatprep.subr.bf16.mxu1 %v3627_v63  ;;  %v4534_v46 = vld [vmem:[#allocation8 + $0x30] sm:$0xff]  ;;  %v839_v48 = vld [vmem:[#allocation13 + $0x138] sm:$0xff]  ;;  %v4537_v51 = vld [vmem:[#allocation8 + $0x88] sm:$0xff]  ;;  %v3645_v52 = vpack.c.bf16 %v805_v42, %v804_v41  ;;  %v3647_v55 = vpack.c.bf16 %v823_v44, %v822_v43 }
  0xea   : > { %v838_v47 = vld [vmem:[#allocation13 + $0x130] sm:$0xff]  ;;  %v4541_v54 = vld [vmem:[#allocation8 + $0xa0] sm:$0xff]  ;;  %v807_v57 = vld [vmem:[#allocation13 + $0x38] sm:$0xff] }
  0xeb   : > { %v4539_v53 = vld [vmem:[#allocation8 + $0x50] sm:$0xff]  ;;  %v824_v58 = vld [vmem:[#allocation13 + $0xc0] sm:$0xff]  ;;  %v825_v59 = vld [vmem:[#allocation13 + $0xc8] sm:$0xff]  ;;  %v3679_v60 = vpack.c.bf16 %v839_v48, %v838_v47 }
  0xec   : > { %3598 = vmatpush3.bf16.msra.mxu0 %v3597_v4  ;;  %3630 = vmatpush3.bf16.msra.mxu1 %v3627_v63  ;;  %v806_v56 = vld [vmem:[#allocation13 + $0x30] sm:$0xff]  ;;  %v4546_v61 = vld [vmem:[#allocation8 + $0x48] sm:$0xff]  ;;  %v840_v62 = vld [vmem:[#allocation13 + $0x140] sm:$0xff]  ;;  %v3651_v4 = vpack.c.bf16 %v825_v59, %v824_v58 }
  0xed   : > { %3600 = vmatprep.subr.bf16.mxu0 %v3599_v5  ;;  %3632 = vmatprep.subr.bf16.mxu1 %v3631_v8  ;;  %v841_v63 = vld [vmem:[#allocation13 + $0x148] sm:$0xff]  ;;  %v4549_v0 = vld [vmem:[#allocation8 + $0xb8] sm:$0xff]  ;;  %v3649_v1 = vpack.c.bf16 %v807_v57, %v806_v56  ;;  %v4553_v3 = vld [vmem:[#allocation8 + $0xd0] sm:$0xff] }
  0xee   : > { %v4551_v2 = vld [vmem:[#allocation8 + $0x68] sm:$0xff]  ;;  %v808_v5 = vld [vmem:[#allocation13 + $0x40] sm:$0xff]  ;;  %v826_v7 = vld [vmem:[#allocation13 + $0xd0] sm:$0xff]  ;;  %v3683_v9 = vpack.c.bf16 %v841_v63, %v840_v62 }
  0xef   : > { %v809_v6 = vld [vmem:[#allocation13 + $0x48] sm:$0xff]  ;;  %v4558_v10 = vld [vmem:[#allocation8 + $0x60] sm:$0xff]  ;;  %v842_v11 = vld [vmem:[#allocation13 + $0x150] sm:$0xff] }
  0xf0   : > { %3602 = vmatpush3.bf16.msra.mxu0 %v3601_v13  ;;  %3634 = vmatpush3.bf16.msra.mxu1 %v3631_v8  ;;  %v827_v8 = vld [vmem:[#allocation13 + $0xd8] sm:$0xff]  ;;  %v4561_v13 = vld [vmem:[#allocation8 + $0xe8] sm:$0xff]  ;;  %v4565_v16 = vld [vmem:[#allocation8 + $0x100] sm:$0xff] }
  0xf1   : > { %3668 = vmatprep.subr.bf16.mxu0 %v3667_v14  ;;  %3636 = vmatprep.subr.bf16.mxu1 %v3635_v15  ;;  %v843_v12 = vld [vmem:[#allocation13 + $0x158] sm:$0xff]  ;;  %v4563_v15 = vld [vmem:[#allocation8 + $0x80] sm:$0xff]  ;;  %v3655_v17 = vpack.c.bf16 %v827_v8, %v826_v7  ;;  %v810_v18 = vld [vmem:[#allocation13 + $0x50] sm:$0xff] }
  0xf2   : > { %v811_v19 = vld [vmem:[#allocation13 + $0x58] sm:$0xff]  ;;  %v828_v21 = vld [vmem:[#allocation13 + $0xe0] sm:$0xff]  ;;  %v829_v22 = vld [vmem:[#allocation13 + $0xe8] sm:$0xff] }
  0xf3   : > { %575 = vmatmul.mubr.f32.vlgmr.msra.gmra.mrb[0].mxu0 %v4511_v20  ;;  %3388 = vmatmul.mubr.f32.vlgmr.msra.gmra.mrb[0].mxu1 %v4513_v23  ;;  %v844_v28 = vld [vmem:[#allocation13 + $0x160] sm:$0xff]  ;;  %v845_v29 = vld [vmem:[#allocation13 + $0x168] sm:$0xff]  ;;  %v4573_v30 = vld [vmem:[#allocation8 + $0x118] sm:$0xff]  ;;  %v3657_v31 = vpack.c.bf16 %v811_v19, %v810_v18  ;;  %v3659_v35 = vpack.c.bf16 %v829_v22, %v828_v21 }
  0xf4   : > { %579 = vmatprep.mubr.f32.mxu0 %v4515_v25  ;;  %3638 = vmatpush3.bf16.msra.mxu1 %v3637_v24  ;;  %v3687_v24 = vpack.c.bf16 %v843_v12, %v842_v11  ;;  %v4577_v34 = vld [vmem:[#allocation8 + $0x130] sm:$0xff]  ;;  %v831_v42 = vld [vmem:[#allocation13 + $0xf8] sm:$0xff]  ;;  %v3691_v43 = vpack.c.bf16 %v845_v29, %v844_v28  ;;  %v4585_v48 = vld [vmem:[#allocation8 + $0x148] sm:$0xff] }
  0xf5   : > { %3390 = vmatprep.mubr.f32.mxu1 %v4517_v26  ;;  %3670 = vmatpush3.bf16.msra.mxu0 %v3667_v14  ;;  %v3653_v14 = vpack.c.bf16 %v809_v6, %v808_v5  ;;  %v830_v41 = vld [vmem:[#allocation13 + $0xf0] sm:$0xff]  ;;  %v847_v47 = vld [vmem:[#allocation13 + $0x178] sm:$0xff]  ;;  %v4589_v56 = vld [vmem:[#allocation8 + $0x160] sm:$0xff] }
  0xf6   : > { %3640 = vmatprep.subr.bf16.mxu1 %v3639_v27  ;;  %3672 = vmatprep.subr.bf16.mxu0 %v3671_v32  ;;  %v4570_v27 = vld [vmem:[#allocation8 + $0x78] sm:$0xff]  ;;  %v4582_v44 = vld [vmem:[#allocation8 + $0x90] sm:$0xff]  ;;  %v3663_v57 = vpack.c.bf16 %v831_v42, %v830_v41  ;;  %v435_v62 = vld [vmem:[#allocation8 + $0xa8] sm:$0xff] }
  0xf7   : > { %580 = vmatmul.mubr.f32.gmra.mrb[2].mxu0 %v4522_v33  ;;  %3391 = vmatmul.mubr.f32.gmra.mrb[2].mxu1 %v4525_v36  ;;  %v814_v58 = vld [vmem:[#allocation13 + $0x70] sm:$0xff]  ;;  %v815_v59 = vld [vmem:[#allocation13 + $0x78] sm:$0xff]  ;;  %v438_v5 = vld [vmem:[#allocation8 + $0xc0] sm:$0xff] }
  0xf8   : > { %584 = vmatprep.mubr.f32.mxu0 %v4527_v38  ;;  %3642 = vmatpush3.bf16.msra.mxu1 %v3641_v37  ;;  %v812_v37 = vld [vmem:[#allocation13 + $0x60] sm:$0xff]  ;;  %v4595_v63 = vld [vmem:[#allocation8 + $0x178] sm:$0xff]  ;;  %v448_v11 = vld [vmem:[#allocation8 + $0x110] sm:$0xff] }
  0xf9   : > { %3393 = vmatprep.mubr.f32.mxu1 %v4529_v39  ;;  %3644 = vmatprep.subr.bf16.mxu1 %v3643_v40  ;;  %v813_v40 = vld [vmem:[#allocation13 + $0x68] sm:$0xff]  ;;  %v442_v6 = vld [vmem:[#allocation8 + $0xe0] sm:$0xff]  ;;  %v441_v7 = vld [vmem:[#allocation8 + $0xd8] sm:$0xff] }
  0xfa   : > { %3674 = vmatpush3.bf16.msra.mxu0 %v3671_v32  ;;  %v4575_v32 = vld [vmem:[#allocation8 + $0x98] sm:$0xff] }
  0xfb   : > { %585 = vmatmul.mubr.f32.gmra.mrb[4].mxu0 %v4534_v46  ;;  %3676 = vmatprep.subr.bf16.mxu0 %v3675_v45  ;;  %v445_v8 = vld [vmem:[#allocation8 + $0xf8] sm:$0xff] }
  0xfc   : > { %3394 = vmatmul.mubr.f32.gmra.mrb[4].mxu1 %v4537_v51  ;;  %589 = vmatprep.mubr.f32.mxu0 %v4539_v53 }
  0xfd   : > { %3646 = vmatpush3.bf16.msra.mxu1 %v3645_v52  ;;  %3396 = vmatprep.mubr.f32.mxu1 %v4541_v54  ;;  %v3661_v52 = vpack.c.bf16 %v813_v40, %v812_v37 }
  0xfe   : > { %3648 = vmatprep.subr.bf16.mxu1 %v3647_v55  ;;  %3678 = vmatpush3.bf16.msra.mxu0 %v3675_v45  ;;  %v846_v45 = vld [vmem:[#allocation13 + $0x170] sm:$0xff] }
  0xff   : > { %590 = vmatmul.mubr.f32.gmra.mrb[6].mxu0 %v4546_v61  ;;  %3680 = vmatprep.subr.bf16.mxu0 %v3679_v60  ;;  %v4587_v55 = vld [vmem:[#allocation8 + $0xb0] sm:$0xff] }
 0x100   : > { %3397 = vmatmul.mubr.f32.gmra.mrb[6].mxu1 %v4549_v0  ;;  %594 = vmatprep.mubr.f32.mxu0 %v4551_v2 }
 0x101   : > { %3650 = vmatpush3.bf16.msra.mxu1 %v3649_v1  ;;  %3399 = vmatprep.mubr.f32.mxu1 %v4553_v3  ;;  %v3665_v1 = vpack.c.bf16 %v815_v59, %v814_v58 }
 0x102   : > { %3652 = vmatprep.subr.bf16.mxu1 %v3651_v4  ;;  %3682 = vmatpush3.bf16.msra.mxu0 %v3679_v60  ;;  %v3695_v60 = vpack.c.bf16 %v847_v47, %v846_v45  ;;  %v439_v4 = vld [vmem:[#allocation8 + $0xc8] sm:$0xff] }
 0x103   : > { %595 = vmatmul.mubr.f32.gmra.mrb[8].mxu0 %v4558_v10  ;;  %3684 = vmatprep.subr.bf16.mxu0 %v3683_v9 }
 0x104   : > { %3400 = vmatmul.mubr.f32.gmra.mrb[8].mxu1 %v4561_v13  ;;  %599 = vmatprep.mubr.f32.mxu0 %v4563_v15 }
 0x105   : > { %3654 = vmatpush3.bf16.msra.mxu1 %v3653_v14  ;;  %3402 = vmatprep.mubr.f32.mxu1 %v4565_v16 }
 0x106   : > { %3656 = vmatprep.subr.bf16.mxu1 %v3655_v17  ;;  %3686 = vmatpush3.bf16.msra.mxu0 %v3683_v9  ;;  %v444_v9 = vld [vmem:[#allocation8 + $0xf0] sm:$0xff] }
 0x107   : > { %600 = vmatmul.mubr.f32.gmra.mrb[10].mxu0 %v4570_v27  ;;  %3688 = vmatprep.subr.bf16.mxu0 %v3687_v24 }
 0x108   : > { %3403 = vmatmul.mubr.f32.gmra.mrb[10].mxu1 %v4573_v30  ;;  %604 = vmatprep.mubr.f32.mxu0 %v4575_v32 }
 0x109   : > { %3658 = vmatpush3.bf16.msra.mxu1 %v3657_v31  ;;  %3405 = vmatprep.mubr.f32.mxu1 %v4577_v34 }
 0x10a   : > { %3660 = vmatprep.subr.bf16.mxu1 %v3659_v35  ;;  %3690 = vmatpush3.bf16.msra.mxu0 %v3687_v24 }
 0x10b   : > { %605 = vmatmul.mubr.f32.gmra.mrb[12].mxu0 %v4582_v44  ;;  %3692 = vmatprep.subr.bf16.mxu0 %v3691_v43 }
 0x10c   : > { %3406 = vmatmul.mubr.f32.gmra.mrb[12].mxu1 %v4585_v48  ;;  %609 = vmatprep.mubr.f32.mxu0 %v4587_v55 }
 0x10d   : > { %3662 = vmatpush3.bf16.msra.mxu1 %v3661_v52  ;;  %3408 = vmatprep.mubr.f32.mxu1 %v4589_v56 }
 0x10e   : > { %3664 = vmatprep.subr.bf16.mxu1 %v3663_v57  ;;  %3694 = vmatpush3.bf16.msra.mxu0 %v3691_v43 }
 0x10f   : > { %610 = vmatmul.mubr.f32.gmra.mrb[14].mxu0 %v435_v62  ;;  %3696 = vmatprep.subr.bf16.mxu0 %v3695_v60 }
 0x110   : > { %3409 = vmatmul.mubr.f32.gmra.mrb[14].mxu1 %v4595_v63  ;;  %614 = vmatprep.mubr.f32.mxu0 %v439_v4 }
 0x111   : > { %3666 = vmatpush3.bf16.msra.mxu1 %v3665_v1  ;;  %912 = vmatprep.mubr.f32.mxu1 %v4505_v49  ;;  %v447_v49 = vld [vmem:[#allocation8 + $0x108] sm:$0xff] }
 0x112   : > { %3698 = vmatpush3.bf16.msra.mxu0 %v3695_v60 }
 0x113   : > { %615 = vmatmul.mubr.f32.gmra.mrb[16].mxu0 %v438_v5 }
 0x114   : > { %913 = vmatmul.mubr.f32.vlgmr.msra.gmra.mrb[16].mxu1 %v4511_v20  ;;  %619 = vmatprep.mubr.f32.mxu0 %v442_v6  ;;  %v451_v20 = vld [vmem:[#allocation8 + $0x128] sm:$0xff] }
 0x115   : > { %917 = vmatprep.mubr.f32.mxu1 %v4515_v25  ;;  %v450_v25 = vld [vmem:[#allocation8 + $0x120] sm:$0xff] }
 0x117   : > { %620 = vmatmul.mubr.f32.gmra.mrb[18].mxu0 %v441_v7 }
 0x118   : > { %918 = vmatmul.mubr.f32.gmra.mrb[18].mxu1 %v4522_v33  ;;  %624 = vmatprep.mubr.f32.mxu0 %v445_v8  ;;  %v454_v33 = vld [vmem:[#allocation8 + $0x140] sm:$0xff] }
 0x119   : > { %922 = vmatprep.mubr.f32.mxu1 %v4527_v38  ;;  %v453_v38 = vld [vmem:[#allocation8 + $0x138] sm:$0xff] }
 0x11b   : > { %625 = vmatmul.mubr.f32.gmra.mrb[20].mxu0 %v444_v9 }
 0x11c   : > { %923 = vmatmul.mubr.f32.gmra.mrb[20].mxu1 %v4534_v46  ;;  %629 = vmatprep.mubr.f32.mxu0 %v448_v11  ;;  %v457_v46 = vld [vmem:[#allocation8 + $0x158] sm:$0xff] }
 0x11d   : > { %927 = vmatprep.mubr.f32.mxu1 %v4539_v53  ;;  %v456_v53 = vld [vmem:[#allocation8 + $0x150] sm:$0xff] }
 0x11f   : > { %630 = vmatmul.mubr.f32.gmra.mrb[22].mxu0 %v447_v49 }
 0x120   : > { %928 = vmatmul.mubr.f32.gmra.mrb[22].mxu1 %v4546_v61  ;;  %634 = vmatprep.mubr.f32.mxu0 %v451_v20  ;;  %v460_v61 = vld [vmem:[#allocation8 + $0x170] sm:$0xff] }
 0x121   : > { %932 = vmatprep.mubr.f32.mxu1 %v4551_v2  ;;  %v459_v2 = vld [vmem:[#allocation8 + $0x168] sm:$0xff] }
 0x123   : > { %635 = vmatmul.mubr.f32.gmra.mrb[24].mxu0 %v450_v25 }
 0x124   : > { %933 = vmatmul.mubr.f32.gmra.mrb[24].mxu1 %v4558_v10  ;;  %639 = vmatprep.mubr.f32.mxu0 %v454_v33 }
 0x125   : > { %937 = vmatprep.mubr.f32.mxu1 %v4563_v15 }
 0x127   : > { %640 = vmatmul.mubr.f32.gmra.mrb[26].mxu0 %v453_v38 }
 0x128   : > { %938 = vmatmul.mubr.f32.gmra.mrb[26].mxu1 %v4570_v27  ;;  %644 = vmatprep.mubr.f32.mxu0 %v457_v46 }
 0x129   : > { %942 = vmatprep.mubr.f32.mxu1 %v4575_v32 }
 0x12b   : > { %645 = vmatmul.mubr.f32.gmra.mrb[28].mxu0 %v456_v53 }
 0x12c   : > { %943 = vmatmul.mubr.f32.gmra.mrb[28].mxu1 %v4582_v44  ;;  %649 = vmatprep.mubr.f32.mxu0 %v460_v61 }
 0x12d   : > { %947 = vmatprep.mubr.f32.mxu1 %v4587_v55 }
 0x12f   : > { %650 = vmatmul.mubr.f32.gmra.mrb[30].mxu0 %v459_v2 }
 0x130   : > { %948 = vmatmul.mubr.f32.gmra.mrb[30].mxu1 %v435_v62  ;;  %3443 = vmatprep.mubr.f32.mxu0 %v4507_v50  ;;  %v4173_v50 = vmov 0.0  }
 0x131   : > { %952 = vmatprep.mubr.f32.mxu1 %v439_v4  ;;  %1170 = vst [vmem:[#allocation4] sm:$0xff] %v4173_v50  ;;  %1171 = vst [vmem:[#allocation4 + $0x8] sm:$0xff] %v4173_v50 }
 0x132   : > { %1172 = vst [vmem:[#allocation4 + $0x10] sm:$0xff] %v4173_v50  ;;  %1173 = vst [vmem:[#allocation4 + $0x18] sm:$0xff] %v4173_v50 }
 0x133   : > { %3444 = vmatmul.mubr.f32.vlgmr.msra.gmra.mrb[32].mxu0 %v4513_v23  ;;  %1174 = vst [vmem:[#allocation4 + $0x20] sm:$0xff] %v4173_v50  ;;  %1175 = vst [vmem:[#allocation4 + $0x28] sm:$0xff] %v4173_v50  ;;  %v4174_v23 = vmov -1e+30  }
 0x134   : > { %953 = vmatmul.mubr.f32.gmra.mrb[32].mxu1 %v438_v5  ;;  %3446 = vmatprep.mubr.f32.mxu0 %v4517_v26  ;;  %1176 = vst [vmem:[#allocation4 + $0x30] sm:$0xff] %v4173_v50  ;;  %1177 = vst [vmem:[#allocation4 + $0x38] sm:$0xff] %v4173_v50 }
 0x135   : > { %957 = vmatprep.mubr.f32.mxu1 %v442_v6  ;;  %1178 = vst [vmem:[#allocation4 + $0x40] sm:$0xff] %v4173_v50  ;;  %1179 = vst [vmem:[#allocation4 + $0x48] sm:$0xff] %v4173_v50 }
 0x136   : > { %1180 = vst [vmem:[#allocation4 + $0x50] sm:$0xff] %v4173_v50  ;;  %1181 = vst [vmem:[#allocation4 + $0x58] sm:$0xff] %v4173_v50 }
 0x137   : > { %3447 = vmatmul.mubr.f32.gmra.mrb[34].mxu0 %v4525_v36  ;;  %1182 = vst [vmem:[#allocation4 + $0x60] sm:$0xff] %v4173_v50  ;;  %1183 = vst [vmem:[#allocation4 + $0x68] sm:$0xff] %v4173_v50 }
 0x138   : > { %958 = vmatmul.mubr.f32.gmra.mrb[34].mxu1 %v441_v7  ;;  %3449 = vmatprep.mubr.f32.mxu0 %v4529_v39  ;;  %1184 = vst [vmem:[#allocation4 + $0x70] sm:$0xff] %v4173_v50  ;;  %1185 = vst [vmem:[#allocation4 + $0x78] sm:$0xff] %v4173_v50 }
 0x139   : > { %962 = vmatprep.mubr.f32.mxu1 %v445_v8  ;;  %1186 = vst [vmem:[#allocation4 + $0x80] sm:$0xff] %v4173_v50  ;;  %1187 = vst [vmem:[#allocation4 + $0x88] sm:$0xff] %v4173_v50 }
 0x13a   : > { %1188 = vst [vmem:[#allocation4 + $0x90] sm:$0xff] %v4173_v50  ;;  %1189 = vst [vmem:[#allocation4 + $0x98] sm:$0xff] %v4173_v50 }
 0x13b   : > { %3450 = vmatmul.mubr.f32.gmra.mrb[36].mxu0 %v4537_v51  ;;  %1190 = vst [vmem:[#allocation4 + $0xa0] sm:$0xff] %v4173_v50  ;;  %1191 = vst [vmem:[#allocation4 + $0xa8] sm:$0xff] %v4173_v50 }
 0x13c   : > { %963 = vmatmul.mubr.f32.gmra.mrb[36].mxu1 %v444_v9  ;;  %3452 = vmatprep.mubr.f32.mxu0 %v4541_v54  ;;  %1192 = vst [vmem:[#allocation4 + $0xb0] sm:$0xff] %v4173_v50  ;;  %1193 = vst [vmem:[#allocation4 + $0xb8] sm:$0xff] %v4173_v50 }
 0x13d   : > { %967 = vmatprep.mubr.f32.mxu1 %v448_v11  ;;  %1194 = vst [vmem:[#allocation4 + $0xc0] sm:$0xff] %v4173_v50  ;;  %1195 = vst [vmem:[#allocation4 + $0xc8] sm:$0xff] %v4173_v50 }
 0x13e   : > { %1196 = vst [vmem:[#allocation4 + $0xd0] sm:$0xff] %v4173_v50  ;;  %1197 = vst [vmem:[#allocation4 + $0xd8] sm:$0xff] %v4173_v50 }
 0x13f   : > { %3453 = vmatmul.mubr.f32.gmra.mrb[38].mxu0 %v4549_v0  ;;  %1198 = vst [vmem:[#allocation4 + $0xe0] sm:$0xff] %v4173_v50  ;;  %1199 = vst [vmem:[#allocation4 + $0xe8] sm:$0xff] %v4173_v50 }
 0x140   : > { %968 = vmatmul.mubr.f32.gmra.mrb[38].mxu1 %v447_v49  ;;  %3455 = vmatprep.mubr.f32.mxu0 %v4553_v3  ;;  %1200 = vst [vmem:[#allocation4 + $0xf0] sm:$0xff] %v4173_v50  ;;  %1201 = vst [vmem:[#allocation4 + $0xf8] sm:$0xff] %v4173_v50 }
 0x141   : > { %972 = vmatprep.mubr.f32.mxu1 %v451_v20  ;;  %1203 = vst.msk [vmem:[#allocation5] sm:$0xff] %vm1202_vm0, %v4173_v50  ;;  %1204 = vst.msk [vmem:[#allocation5 + $0x8] sm:$0xff] %vm1202_vm0, %v4173_v50 }
 0x142   : > { %1205 = vst.msk [vmem:[#allocation5 + $0x10] sm:$0xff] %vm1202_vm0, %v4173_v50  ;;  %1206 = vst.msk [vmem:[#allocation5 + $0x18] sm:$0xff] %vm1202_vm0, %v4173_v50 }
 0x143   : > { %3456 = vmatmul.mubr.f32.gmra.mrb[40].mxu0 %v4561_v13  ;;  %1207 = vst.msk [vmem:[#allocation5 + $0x20] sm:$0xff] %vm1202_vm0, %v4173_v50  ;;  %1208 = vst.msk [vmem:[#allocation5 + $0x28] sm:$0xff] %vm1202_vm0, %v4173_v50 }
 0x144   : > { %973 = vmatmul.mubr.f32.gmra.mrb[40].mxu1 %v450_v25  ;;  %3458 = vmatprep.mubr.f32.mxu0 %v4565_v16  ;;  %1209 = vst.msk [vmem:[#allocation5 + $0x30] sm:$0xff] %vm1202_vm0, %v4173_v50  ;;  %1210 = vst.msk [vmem:[#allocation5 + $0x38] sm:$0xff] %vm1202_vm0, %v4173_v50 }
 0x145   : > { %977 = vmatprep.mubr.f32.mxu1 %v454_v33  ;;  %1211 = vst.msk [vmem:[#allocation5 + $0x40] sm:$0xff] %vm1202_vm0, %v4173_v50  ;;  %1212 = vst.msk [vmem:[#allocation5 + $0x48] sm:$0xff] %vm1202_vm0, %v4173_v50 }
 0x146   : > { %1213 = vst.msk [vmem:[#allocation5 + $0x50] sm:$0xff] %vm1202_vm0, %v4173_v50  ;;  %1214 = vst.msk [vmem:[#allocation5 + $0x58] sm:$0xff] %vm1202_vm0, %v4173_v50 }
 0x147   : > { %3459 = vmatmul.mubr.f32.gmra.mrb[42].mxu0 %v4573_v30  ;;  %1215 = vst.msk [vmem:[#allocation5 + $0x60] sm:$0xff] %vm1202_vm0, %v4173_v50  ;;  %1216 = vst.msk [vmem:[#allocation5 + $0x68] sm:$0xff] %vm1202_vm0, %v4173_v50 }
 0x148   : > { %978 = vmatmul.mubr.f32.gmra.mrb[42].mxu1 %v453_v38  ;;  %3461 = vmatprep.mubr.f32.mxu0 %v4577_v34  ;;  %1217 = vst.msk [vmem:[#allocation5 + $0x70] sm:$0xff] %vm1202_vm0, %v4173_v50  ;;  %1218 = vst.msk [vmem:[#allocation5 + $0x78] sm:$0xff] %vm1202_vm0, %v4173_v50 }
 0x149   : > { %982 = vmatprep.mubr.f32.mxu1 %v457_v46  ;;  %1219 = vst.msk [vmem:[#allocation6] sm:$0xff] %vm1202_vm0, %v4173_v50  ;;  %1220 = vst.msk [vmem:[#allocation6 + $0x8] sm:$0xff] %vm1202_vm0, %v4173_v50 }
 0x14a   : > { %1221 = vst.msk [vmem:[#allocation6 + $0x10] sm:$0xff] %vm1202_vm0, %v4173_v50  ;;  %1222 = vst.msk [vmem:[#allocation6 + $0x18] sm:$0xff] %vm1202_vm0, %v4173_v50 }
 0x14b   : > { %3462 = vmatmul.mubr.f32.gmra.mrb[44].mxu0 %v4585_v48  ;;  %1223 = vst.msk [vmem:[#allocation6 + $0x20] sm:$0xff] %vm1202_vm0, %v4173_v50  ;;  %1224 = vst.msk [vmem:[#allocation6 + $0x28] sm:$0xff] %vm1202_vm0, %v4173_v50 }
 0x14c   : > { %983 = vmatmul.mubr.f32.gmra.mrb[44].mxu1 %v456_v53  ;;  %3464 = vmatprep.mubr.f32.mxu0 %v4589_v56  ;;  %1225 = vst.msk [vmem:[#allocation6 + $0x30] sm:$0xff] %vm1202_vm0, %v4173_v50  ;;  %1226 = vst.msk [vmem:[#allocation6 + $0x38] sm:$0xff] %vm1202_vm0, %v4173_v50 }
 0x14d   : > { %987 = vmatprep.mubr.f32.mxu1 %v460_v61  ;;  %1227 = vst.msk [vmem:[#allocation6 + $0x40] sm:$0xff] %vm1202_vm0, %v4173_v50  ;;  %1228 = vst.msk [vmem:[#allocation6 + $0x48] sm:$0xff] %vm1202_vm0, %v4173_v50 }
 0x14e   : > { %1229 = vst.msk [vmem:[#allocation6 + $0x50] sm:$0xff] %vm1202_vm0, %v4173_v50  ;;  %1230 = vst.msk [vmem:[#allocation6 + $0x58] sm:$0xff] %vm1202_vm0, %v4173_v50 }
 0x14f   : > { %3465 = vmatmul.mubr.f32.gmra.mrb[46].mxu0 %v4595_v63  ;;  %1231 = vst.msk [vmem:[#allocation6 + $0x60] sm:$0xff] %vm1202_vm0, %v4173_v50  ;;  %1232 = vst.msk [vmem:[#allocation6 + $0x68] sm:$0xff] %vm1202_vm0, %v4173_v50 }
 0x150   : > { %988 = vmatmul.mubr.f32.gmra.mrb[46].mxu1 %v459_v2  ;;  %1233 = vst.msk [vmem:[#allocation6 + $0x70] sm:$0xff] %vm1202_vm0, %v4173_v50  ;;  %1234 = vst.msk [vmem:[#allocation6 + $0x78] sm:$0xff] %vm1202_vm0, %v4173_v50 }
 0x151   : > { %1236 = vst.msk [vmem:[#allocation7] sm:$0x1] %vm1235_vm1, %v4174_v23 }
 0x1c6   : > { %v3103_v26 = vpop.f32.mrb[0].mxu0  ;;  %v3389_v36 = vpop.f32.mrb[0].mxu1 }
 0x1c7   : > { %v3104_v39 = vpop.f32.mrb[1].mxu0  ;;  %v721_v54 = vpop.f32.mrb[1].mxu1 }
 0x1c8   : > { %v3105_v51 = vadd.f32 %v3104_v39, %v3103_v26 }
 0x1ca   : > { %v722_v0 = vadd.f32 %v3105_v51, %v721_v54  ;;  %v3106_v3 = vpop.f32.mrb[2].mxu0  ;;  %v3392_v10 = vpop.f32.mrb[2].mxu1 }
 0x1cb   : > { %v3107_v12 = vpop.f32.mrb[3].mxu0  ;;  %v731_v14 = vpop.f32.mrb[3].mxu1 }
 0x1cc   : > { %v3108_v13 = vadd.f32 %v3107_v12, %v3106_v3 }
 0x1ce   : > { %v727_v15 = vadd.f32 %v3389_v36, %v3108_v13  ;;  %v3109_v16 = vpop.f32.mrb[4].mxu0 }
 0x1cf   : > { %v3395_v17 = vpop.f32.mrb[4].mxu1  ;;  %v3110_v18 = vpop.f32.mrb[5].mxu0 }
 0x1d0   : > { %v1138_v19 = vpack.c.bf16 %v727_v15, %v722_v0  ;;  %v3111_v21 = vadd.f32 %v3110_v18, %v3109_v16  ;;  %v741_v22 = vpop.f32.mrb[5].mxu1 }
 0x1d2   : > { %1146 = vst [vmem:[#allocation2] sm:$0xff] %v1138_v19  ;;  %v732_v24 = vadd.f32 %v3111_v21, %v731_v14  ;;  %v3112_v27 = vpop.f32.mrb[6].mxu0 }
 0x1d3   : > { %v3398_v28 = vpop.f32.mrb[6].mxu1  ;;  %v3113_v29 = vpop.f32.mrb[7].mxu0 }
 0x1d4   : > { %v3114_v30 = vadd.f32 %v3113_v29, %v3112_v27  ;;  %v751_v31 = vpop.f32.mrb[7].mxu1 }
 0x1d6   : > { %v737_v32 = vadd.f32 %v3392_v10, %v3114_v30  ;;  %v3115_v34 = vpop.f32.mrb[8].mxu0 }
 0x1d7   : > { %v3401_v35 = vpop.f32.mrb[8].mxu1  ;;  %v3116_v37 = vpop.f32.mrb[9].mxu0 }
 0x1d8   : > { %v1139_v40 = vpack.c.bf16 %v737_v32, %v732_v24  ;;  %v3117_v41 = vadd.f32 %v3116_v37, %v3115_v34  ;;  %v761_v42 = vpop.f32.mrb[9].mxu1 }
 0x1da   : > { %1147 = vst [vmem:[#allocation2 + $0x8] sm:$0xff] %v1139_v40  ;;  %v742_v43 = vadd.f32 %v3117_v41, %v741_v22  ;;  %v3118_v44 = vpop.f32.mrb[10].mxu0 }
 0x1db   : > { %v3404_v45 = vpop.f32.mrb[10].mxu1  ;;  %v3119_v47 = vpop.f32.mrb[11].mxu0 }
 0x1dc   : > { %v3120_v48 = vadd.f32 %v3119_v47, %v3118_v44  ;;  %v771_v52 = vpop.f32.mrb[11].mxu1 }
 0x1de   : > { %v747_v55 = vadd.f32 %v3395_v17, %v3120_v48  ;;  %v3121_v56 = vpop.f32.mrb[12].mxu0 }
 0x1df   : > { %v3407_v57 = vpop.f32.mrb[12].mxu1  ;;  %v3122_v58 = vpop.f32.mrb[13].mxu0 }
 0x1e0   : > { %v1140_v59 = vpack.c.bf16 %v747_v55, %v742_v43  ;;  %v3123_v60 = vadd.f32 %v3122_v58, %v3121_v56  ;;  %v781_v62 = vpop.f32.mrb[13].mxu1 }
 0x1e2   : > { %1148 = vst [vmem:[#allocation2 + $0x10] sm:$0xff] %v1140_v59  ;;  %v752_v63 = vadd.f32 %v3123_v60, %v751_v31  ;;  %v3124_v1 = vpop.f32.mrb[14].mxu0 }
 0x1e3   : > { %v4726_v4 = vpop.f32.mrb[14].mxu1  ;;  %v3125_v5 = vpop.f32.mrb[15].mxu0 }
 0x1e4   : > { %v3126_v6 = vadd.f32 %v3125_v5, %v3124_v1  ;;  %v791_v7 = vpop.f32.mrb[15].mxu1 }
 0x1e6   : > { %v757_v8 = vadd.f32 %v3398_v28, %v3126_v6  ;;  %v3127_v9 = vpop.f32.mrb[16].mxu0 }
 0x1e7   : > { %v3215_v11 = vpop.f32.mrb[16].mxu1  ;;  %v3128_v49 = vpop.f32.mrb[17].mxu0 }
 0x1e8   : > { %v1141_v20 = vpack.c.bf16 %v757_v8, %v752_v63  ;;  %v3129_v25 = vadd.f32 %v3128_v49, %v3127_v9  ;;  %v3216_v33 = vpop.f32.mrb[17].mxu1 }
 0x1e9   : > { %v4728_v38 = vadd.f32 %v3216_v33, %v3215_v11 }
 0x1ea   : > { %1149 = vst [vmem:[#allocation2 + $0x18] sm:$0xff] %v1141_v20  ;;  %v762_v46 = vadd.f32 %v3129_v25, %v761_v42  ;;  %v3130_v53 = vpop.f32.mrb[18].mxu0 }
 0x1eb   : > { %v3218_v61 = vpop.f32.mrb[18].mxu1  ;;  %v3131_v2 = vpop.f32.mrb[19].mxu0 }
 0x1ec   : > { %v3132_v50 = vadd.f32 %v3131_v2, %v3130_v53  ;;  %v3219_v23 = vpop.f32.mrb[19].mxu1 }
 0x1ed   : > { %v3220_v26 = vadd.f32 %v3219_v23, %v3218_v61 }
 0x1ee   : > { %v767_v36 = vadd.f32 %v3401_v35, %v3132_v50  ;;  %v3133_v39 = vpop.f32.mrb[20].mxu0 }
 0x1ef   : > { %v3221_v51 = vpop.f32.mrb[20].mxu1  ;;  %v3134_v54 = vpop.f32.mrb[21].mxu0 }
 0x1f0   : > { %v1142_v0 = vpack.c.bf16 %v767_v36, %v762_v46  ;;  %v3135_v3 = vadd.f32 %v3134_v54, %v3133_v39  ;;  %v3222_v10 = vpop.f32.mrb[21].mxu1 }
 0x1f1   : > { %v3223_v12 = vadd.f32 %v3222_v10, %v3221_v51 }
 0x1f2   : > { %1150 = vst [vmem:[#allocation2 + $0x20] sm:$0xff] %v1142_v0  ;;  %v772_v13 = vadd.f32 %v3135_v3, %v771_v52  ;;  %v3136_v14 = vpop.f32.mrb[22].mxu0 }
 0x1f3   : > { %v3224_v15 = vpop.f32.mrb[22].mxu1  ;;  %v3137_v16 = vpop.f32.mrb[23].mxu0 }
 0x1f4   : > { %v3138_v17 = vadd.f32 %v3137_v16, %v3136_v14  ;;  %v3225_v18 = vpop.f32.mrb[23].mxu1 }
 0x1f5   : > { %v3226_v19 = vadd.f32 %v3225_v18, %v3224_v15 }
 0x1f6   : > { %v777_v21 = vadd.f32 %v3404_v45, %v3138_v17  ;;  %v3139_v22 = vpop.f32.mrb[24].mxu0 }
 0x1f7   : > { %v3227_v24 = vpop.f32.mrb[24].mxu1  ;;  %v3140_v27 = vpop.f32.mrb[25].mxu0 }
 0x1f8   : > { %v1143_v28 = vpack.c.bf16 %v777_v21, %v772_v13  ;;  %v3141_v29 = vadd.f32 %v3140_v27, %v3139_v22  ;;  %v3228_v30 = vpop.f32.mrb[25].mxu1 }
 0x1f9   : > { %v3229_v31 = vadd.f32 %v3228_v30, %v3227_v24 }
 0x1fa   : > { %1151 = vst [vmem:[#allocation2 + $0x28] sm:$0xff] %v1143_v28  ;;  %v782_v32 = vadd.f32 %v3141_v29, %v781_v62  ;;  %v3142_v34 = vpop.f32.mrb[26].mxu0 }
 0x1fb   : > { %v3230_v35 = vpop.f32.mrb[26].mxu1  ;;  %v3143_v37 = vpop.f32.mrb[27].mxu0 }
 0x1fc   : > { %v3144_v40 = vadd.f32 %v3143_v37, %v3142_v34  ;;  %v3231_v41 = vpop.f32.mrb[27].mxu1 }
 0x1fd   : > { %v3232_v42 = vadd.f32 %v3231_v41, %v3230_v35 }
 0x1fe   : > { %v787_v43 = vadd.f32 %v3407_v57, %v3144_v40  ;;  %v3145_v44 = vpop.f32.mrb[28].mxu0 }
 0x1ff   : > { %v3233_v47 = vpop.f32.mrb[28].mxu1  ;;  %v3146_v48 = vpop.f32.mrb[29].mxu0 }
 0x200   : > { %v1144_v45 = vpack.c.bf16 %v787_v43, %v782_v32  ;;  %v3147_v52 = vadd.f32 %v3146_v48, %v3145_v44  ;;  %v3234_v55 = vpop.f32.mrb[29].mxu1 }
 0x201   : > { %v3235_v56 = vadd.f32 %v3234_v55, %v3233_v47 }
 0x202   : > { %1152 = vst [vmem:[#allocation2 + $0x30] sm:$0xff] %v1144_v45  ;;  %v792_v58 = vadd.f32 %v3147_v52, %v791_v7  ;;  %v3148_v59 = vpop.f32.mrb[30].mxu0 }
 0x203   : > { %v3236_v60 = vpop.f32.mrb[30].mxu1  ;;  %v3149_v63 = vpop.f32.mrb[31].mxu0 }
 0x204   : > { %v3150_v62 = vadd.f32 %v3149_v63, %v3148_v59  ;;  %v3237_v1 = vpop.f32.mrb[31].mxu1 }
 0x205   : > { %v3238_v5 = vadd.f32 %v3237_v1, %v3236_v60 }
 0x206   : > { %v797_v6 = vadd.f32 %v4726_v4, %v3150_v62  ;;  %v3445_v8 = vpop.f32.mrb[32].mxu0 }
 0x207   : > { %v3239_v9 = vpop.f32.mrb[32].mxu1  ;;  %v1065_v57 = vadd.f32 %v3445_v8, %v3220_v26  ;;  %v1059_v11 = vpop.f32.mrb[33].mxu0 }
 0x208   : > { %v1145_v49 = vpack.c.bf16 %v797_v6, %v792_v58  ;;  %v3240_v20 = vpop.f32.mrb[33].mxu1  ;;  %v1060_v25 = vadd.f32 %v4728_v38, %v1059_v11 }
 0x209   : > { %v3241_v33 = vadd.f32 %v3240_v20, %v3239_v9 }
 0x20a   : > { %1153 = vst [vmem:[#allocation2 + $0x38] sm:$0xff] %v1145_v49  ;;  %v1154_v46 = vpack.c.bf16 %v1065_v57, %v1060_v25  ;;  %v3448_v7 = vpop.f32.mrb[34].mxu0 }
 0x20b   : > { %v3242_v53 = vpop.f32.mrb[34].mxu1  ;;  %v1075_v61 = vadd.f32 %v3448_v7, %v3226_v19  ;;  %v1069_v2 = vpop.f32.mrb[35].mxu0 }
 0x20c   : > { %1162 = vst [vmem:[#allocation3] sm:$0xff] %v1154_v46  ;;  %v3243_v50 = vpop.f32.mrb[35].mxu1  ;;  %v1070_v23 = vadd.f32 %v3223_v12, %v1069_v2 }
 0x20d   : > { %v3244_v36 = vadd.f32 %v3243_v50, %v3242_v53 }
 0x20e   : > { %v1155_v4 = vpack.c.bf16 %v1075_v61, %v1070_v23  ;;  %v3451_v39 = vpop.f32.mrb[36].mxu0 }
 0x20f   : > { %v3245_v51 = vpop.f32.mrb[36].mxu1  ;;  %v1085_v26 = vadd.f32 %v3451_v39, %v3232_v42  ;;  %v1079_v54 = vpop.f32.mrb[37].mxu0 }
 0x210   : > { %1163 = vst [vmem:[#allocation3 + $0x8] sm:$0xff] %v1155_v4  ;;  %v3246_v0 = vpop.f32.mrb[37].mxu1  ;;  %v1080_v3 = vadd.f32 %v3229_v31, %v1079_v54 }
 0x211   : > { %v3247_v38 = vadd.f32 %v3246_v0, %v3245_v51 }
 0x212   : > { %v1156_v10 = vpack.c.bf16 %v1085_v26, %v1080_v3  ;;  %v3454_v13 = vpop.f32.mrb[38].mxu0 }
 0x213   : > { %v3248_v14 = vpop.f32.mrb[38].mxu1  ;;  %v1095_v15 = vadd.f32 %v3454_v13, %v3238_v5  ;;  %v1089_v16 = vpop.f32.mrb[39].mxu0 }
 0x214   : > { %1164 = vst [vmem:[#allocation3 + $0x10] sm:$0xff] %v1156_v10  ;;  %v3249_v17 = vpop.f32.mrb[39].mxu1  ;;  %v1090_v18 = vadd.f32 %v3235_v56, %v1089_v16 }
 0x215   : > { %v3250_v19 = vadd.f32 %v3249_v17, %v3248_v14 }
 0x216   : > { %v1157_v12 = vpack.c.bf16 %v1095_v15, %v1090_v18  ;;  %v3457_v21 = vpop.f32.mrb[40].mxu0 }
 0x217   : > { %v3251_v22 = vpop.f32.mrb[40].mxu1  ;;  %v1105_v24 = vadd.f32 %v3457_v21, %v3244_v36  ;;  %v1099_v27 = vpop.f32.mrb[41].mxu0 }
 0x218   : > { %1165 = vst [vmem:[#allocation3 + $0x18] sm:$0xff] %v1157_v12  ;;  %v3252_v28 = vpop.f32.mrb[41].mxu1  ;;  %v1100_v29 = vadd.f32 %v3241_v33, %v1099_v27 }
 0x219   : > { %v3253_v30 = vadd.f32 %v3252_v28, %v3251_v22 }
 0x21a   : > { %v1158_v31 = vpack.c.bf16 %v1105_v24, %v1100_v29  ;;  %v3460_v32 = vpop.f32.mrb[42].mxu0 }
 0x21b   : > { %v3254_v34 = vpop.f32.mrb[42].mxu1  ;;  %v1115_v35 = vadd.f32 %v3460_v32, %v3250_v19  ;;  %v1109_v37 = vpop.f32.mrb[43].mxu0 }
 0x21c   : > { %1166 = vst [vmem:[#allocation3 + $0x20] sm:$0xff] %v1158_v31  ;;  %v3255_v40 = vpop.f32.mrb[43].mxu1  ;;  %v1110_v41 = vadd.f32 %v3247_v38, %v1109_v37 }
 0x21d   : > { %v3256_v42 = vadd.f32 %v3255_v40, %v3254_v34 }
 0x21e   : > { %v1159_v43 = vpack.c.bf16 %v1115_v35, %v1110_v41  ;;  %v3463_v44 = vpop.f32.mrb[44].mxu0 }
 0x21f   : > { %v3257_v47 = vpop.f32.mrb[44].mxu1  ;;  %v1125_v48 = vadd.f32 %v3463_v44, %v3256_v42  ;;  %v1119_v45 = vpop.f32.mrb[45].mxu0 }
 0x220   : > { %1167 = vst [vmem:[#allocation3 + $0x28] sm:$0xff] %v1159_v43  ;;  %v3258_v52 = vpop.f32.mrb[45].mxu1  ;;  %v1120_v55 = vadd.f32 %v3253_v30, %v1119_v45 }
 0x221   : > { %v3259_v56 = vadd.f32 %v3258_v52, %v3257_v47 }
 0x222   : > { %v1160_v58 = vpack.c.bf16 %v1125_v48, %v1120_v55  ;;  %v3466_v59 = vpop.f32.mrb[46].mxu0 }
 0x223   : > { %v3260_v60 = vpop.f32.mrb[46].mxu1  ;;  %v1129_v63 = vpop.f32.mrb[47].mxu0 }
 0x224   : > { %1168 = vst [vmem:[#allocation3 + $0x30] sm:$0xff] %v1160_v58  ;;  %v3261_v62 = vpop.f32.mrb[47].mxu1  ;;  %v1130_v1 = vadd.f32 %v3259_v56, %v1129_v63 }
 0x225   : > { %v3262_v5 = vadd.f32 %v3261_v62, %v3260_v60 }
 0x227   : > { %v1135_v6 = vadd.f32 %v3466_v59, %v3262_v5 }
 0x229   : > { %v1161_v8 = vpack.c.bf16 %v1135_v6, %v1130_v1 }
 0x22b   : > { %1169 = vst [vmem:[#allocation3 + $0x38] sm:$0xff] %v1161_v8 }
 0x22c PF: > { %v1241_v9 = vld [vmem:[#allocation2] sm:$0xff]  ;;  %v1242_v11 = vld [vmem:[#allocation2 + $0x8] sm:$0xff]  ;;  %v1243_v20 = vld [vmem:[#allocation2 + $0x10] sm:$0xff]  ;;  %v1384_v0 = vlaneseq  ;;  %s5118_s4 = sld [smem:[#allocation28_spill]]  ;;  %v4175_v8 = vmov 0   ;;  %vm1685_vm10 = vcmask 0  }
 0x22d   : > { %v1314_v57 = vld [vmem:[#allocation3] sm:$0xff]  ;;  %3467 = vmatprep.subr.bf16.mxu0 %v1241_v9  ;;  %v1315_v49 = vld [vmem:[#allocation3 + $0x8] sm:$0xff]  ;;  %v1316_v25 = vld [vmem:[#allocation3 + $0x10] sm:$0xff]  ;;  %3816 = vset.pattern.permute.xlu1 %v4175_v8  ;;  %vm1620_vm11 = vcmask 7168   ;;  %vm1833_vm12 = vcmask 261120   ;;  %p3063_p10 = scmp.ne.s32.totalorder %s4239_s28, 1 }
 0x22e   : > { %3487 = vmatprep.subr.bf16.mxu1 %v1314_v57  ;;  %3468 = vmatpush3.bf16.msra.mxu0 %v1241_v9  ;;  %v1244_v33 = vld [vmem:[#allocation2 + $0x18] sm:$0xff]  ;;  %v1245_v61 = vld [vmem:[#allocation2 + $0x20] sm:$0xff]  ;;  %v1246_v50 = vld [vmem:[#allocation2 + $0x28] sm:$0xff]  ;;  %v1385_v3 = vshrl.u32 %v1384_v0, 7 }
 0x22f   : > { %3488 = vmatpush3.bf16.msra.mxu1 %v1314_v57  ;;  %3469 = vmatprep.subr.bf16.mxu0 %v1242_v11  ;;  %v3817_v46 = vld [vmem:[%s352_s3] sm:$0xff]   ;;  %v3819_v26 = vld [vmem:[%s352_s3 + $0x8] sm:$0xff]  }
 0x230   : > { %3489 = vmatprep.subr.bf16.mxu1 %v1315_v49  ;;  %v3818_v7 = vld [vmem:[%s361_s7] sm:$0xff]   ;;  %3483 = vmatprep.mubr.bf16.mxu0 %v3817_v46  ;;  %v3820_v54 = vld [vmem:[%s361_s7 + $0x8] sm:$0xff]   ;;  %v4740_v38 = vsub.s32 0, %v1385_v3  ;;  %v1394_v10 = vsub.s32 1, %v1385_v3  ;;  %v1414_v13 = vsub.s32 2, %v1385_v3  ;;  %v1422_v14 = vsub.s32 3, %v1385_v3 }
 0x231   : > { %v1317_v53 = vld [vmem:[#allocation3 + $0x18] sm:$0xff]  ;;  %3503 = vmatprep.mubr.bf16.mxu1 %v3818_v7  ;;  %v1318_v2 = vld [vmem:[#allocation3 + $0x20] sm:$0xff]  ;;  %v1319_v23 = vld [vmem:[#allocation3 + $0x28] sm:$0xff]  ;;  %3815 = vset.pattern.permute.xlu0 %v4175_v8 }
 0x232   : > { %3470 = vmatpush3.bf16.msra.mxu0 %v1242_v11  ;;  %v1247_v36 = vld [vmem:[#allocation2 + $0x30] sm:$0xff]  ;;  %v1248_v39 = vld [vmem:[#allocation2 + $0x38] sm:$0xff]  ;;  %v1383_v15 = vld [vmem:[%s5118_s4] sm:$0xff] }
 0x233   : > { %3490 = vmatpush3.bf16.msra.mxu1 %v1315_v49  ;;  %3471 = vmatprep.subr.bf16.mxu0 %v1243_v20  ;;  %v1320_v4 = vld [vmem:[#allocation3 + $0x30] sm:$0xff]  ;;  %v1321_v51 = vld [vmem:[#allocation3 + $0x38] sm:$0xff]  ;;  %v1387_v16 = vrot.slane %v1383_v15, %v4740_v38  ;;  %v1395_v17 = vrot.slane %v1383_v15, %v1394_v10  ;;  %v1415_v18 = vrot.slane %v1383_v15, %v1414_v13 }
 0x234   : > { %3491 = vmatprep.subr.bf16.mxu1 %v1316_v25  ;;  %v1423_v19 = vrot.slane %v1383_v15, %v1422_v14 }
 0x236   : > { %3472 = vmatpush3.bf16.msra.mxu0 %v1243_v20 }
 0x237   : > { %3492 = vmatpush3.bf16.msra.mxu1 %v1316_v25  ;;  %3473 = vmatprep.subr.bf16.mxu0 %v1244_v33 }
 0x238   : > { %3493 = vmatprep.subr.bf16.mxu1 %v1317_v53 }
 0x23a   : > { %3474 = vmatpush3.bf16.msra.mxu0 %v1244_v33 }
 0x23b   : > { %3494 = vmatpush3.bf16.msra.mxu1 %v1317_v53  ;;  %3475 = vmatprep.subr.bf16.mxu0 %v1245_v61 }
 0x23c   : > { %3495 = vmatprep.subr.bf16.mxu1 %v1318_v2 }
 0x23e   : > { %3476 = vmatpush3.bf16.msra.mxu0 %v1245_v61 }
 0x23f   : > { %3496 = vmatpush3.bf16.msra.mxu1 %v1318_v2  ;;  %3477 = vmatprep.subr.bf16.mxu0 %v1246_v50 }
 0x240   : > { %3497 = vmatprep.subr.bf16.mxu1 %v1319_v23 }
 0x242   : > { %3478 = vmatpush3.bf16.msra.mxu0 %v1246_v50 }
 0x243   : > { %3498 = vmatpush3.bf16.msra.mxu1 %v1319_v23  ;;  %3479 = vmatprep.subr.bf16.mxu0 %v1247_v36 }
 0x244   : > { %3499 = vmatprep.subr.bf16.mxu1 %v1320_v4 }
 0x246   : > { %3480 = vmatpush3.bf16.msra.mxu0 %v1247_v36 }
 0x247   : > { %3500 = vmatpush3.bf16.msra.mxu1 %v1320_v4  ;;  %3481 = vmatprep.subr.bf16.mxu0 %v1248_v39 }
 0x248   : > { %3501 = vmatprep.subr.bf16.mxu1 %v1321_v51 }
 0x24a   : > { %3482 = vmatpush3.bf16.msra.mxu0 %v1248_v39 }
 0x24b   : > { %3502 = vmatpush3.bf16.msra.mxu1 %v1321_v51 }
 0x24d   : > { %3484 = vmatmul.mubr.bf16.vlgmr.msra.gmra.mrb[0].mxu0 %v3819_v26 }
 0x24e   : > { %3504 = vmatmul.mubr.bf16.vlgmr.msra.gmra.mrb[0].mxu1 %v3820_v54  ;;  %1890 = vmatprep.mubr.bf16.mxu0 %v4175_v8 }
 0x320   : > { %v4746_v12 = vpop.f32.mrb[0].mxu0 }
 0x321   : > { %v4748_v21 = vpop.f32.mrb[0].mxu1  ;;  %v4750_v22 = vpop.f32.mrb[1].mxu0  ;;  %v1390_v27 = vmul.f32 %v4746_v12, %v1387_v16  ;;  %v1418_v29 = vmul.f32 %v4746_v12, %v1415_v18 }
 0x322   : > { %v4752_v24 = vpop.f32.mrb[1].mxu1  ;;  %v1398_v28 = vmul.f32 %v4748_v21, %v1395_v17  ;;  %v1426_v30 = vmul.f32 %v4748_v21, %v1423_v19  ;;  %v4758_v31 = vpop.f32.mrb[2].mxu0  ;;  %v1388_v34 = vmul.f32 %v1387_v16, %v4750_v22  ;;  %v1416_v37 = vmul.f32 %v1415_v18, %v4750_v22 }
 0x323   : > { %v4760_v32 = vpop.f32.mrb[2].mxu1  ;;  %v1396_v35 = vmul.f32 %v1395_v17, %v4752_v24  ;;  %v1424_v40 = vmul.f32 %v1423_v19, %v4752_v24  ;;  %v4766_v41 = vpop.f32.mrb[3].mxu0  ;;  %v1391_v44 = vmul.f32 %v4758_v31, %v1387_v16  ;;  %v1419_v48 = vmul.f32 %v4758_v31, %v1415_v18 }
 0x324   : > { %v4768_v42 = vpop.f32.mrb[3].mxu1  ;;  %v1402_v43 = vadd.f32 %v1398_v28, %v1390_v27  ;;  %v1399_v47 = vmul.f32 %v4760_v32, %v1395_v17  ;;  %v1417_v55 = vmul.f32 %v1415_v18, %v4766_v41  ;;  %v1389_v59 = vmul.f32 %v1387_v16, %v4766_v41 }
 0x325   : > { %v1400_v45 = vadd.f32 %v1396_v35, %v1388_v34  ;;  %v1428_v52 = vadd.f32 %v1424_v40, %v1416_v37  ;;  %v1425_v56 = vmul.f32 %v1423_v19, %v4768_v42  ;;  %v1397_v60 = vmul.f32 %v1395_v17, %v4768_v42  ;;  %v1464_v37 = vld [vmem:[#allocation7] sm:$0x1] }
 0x326   : > { %1408 = vadd.xlane.f32.xlu1 %v1402_v43  ;;  %v1403_v58 = vadd.f32 %v1399_v47, %v1391_v44  ;;  %v1427_v63 = vmul.f32 %v4760_v32, %v1423_v19  ;;  %v1430_v1 = vadd.f32 %v1426_v30, %v1418_v29 }
 0x327   : > { %1404 = vadd.xlane.f32.xlu0 %v1400_v45  ;;  %v1429_v62 = vadd.f32 %v1425_v56, %v1417_v55  ;;  %v1401_v5 = vadd.f32 %v1397_v60, %v1389_v59 }
 0x328   : > { %v1431_v6 = vadd.f32 %v1427_v63, %v1419_v48 }
 0x32a   : > { %1410 = vadd.xlane.f32.xlu1 %v1403_v58 }
 0x32b   : > { %1432 = vadd.xlane.f32.xlu0 %v1428_v52 }
 0x32e   : > { %1434 = vadd.xlane.f32.xlu1 %v1429_v62 }
 0x32f   : > { %1406 = vadd.xlane.f32.xlu0 %v1401_v5 }
 0x332   : > { %1438 = vadd.xlane.f32.xlu1 %v1431_v6 }
 0x333   : > { %1436 = vadd.xlane.f32.xlu0 %v1430_v1 }
 0x3b3   : > { %v1409_v9 = vpop.xlane.xlu1 %1408 }
 0x3b4   : > { %v1405_v57 = vpop.xlane.xlu0 %1404  ;;  %v1446_v53 = vmul.f32 0.01, %v1409_v9  ;;  %vm1442_vm6 = vcmp.ge.f32.partialorder %v1409_v9, 0.0 }
 0x3b5   : > { %v1444_v2 = vmul.f32 0.01, %v1405_v57  ;;  %vm1440_vm7 = vcmp.ge.f32.partialorder %v1405_v57, 0.0 }
 0x3b6   : > { %v1450_v10 = vsel %vm1442_vm6, %v1409_v9, %v1446_v53 }
 0x3b7   : > { %v1411_v11 = vpop.xlane.xlu1 %1410  ;;  %v1448_v13 = vsel %vm1440_vm7, %v1405_v57, %v1444_v2  ;;  %v1594_v2 = vld [vmem:[#allocation5 + $0x38] sm:$0xff] }
 0x3b8   : > { %v1433_v49 = vpop.xlane.xlu0 %1432  ;;  %v1447_v61 = vmul.f32 0.01, %v1411_v11  ;;  %vm1443_vm5 = vcmp.ge.f32.partialorder %v1411_v11, 0.0 }
 0x3b9   : > { %v1456_v46 = vmul.f32 0.01, %v1433_v49  ;;  %vm1452_vm4 = vcmp.ge.f32.partialorder %v1433_v49, 0.0 }
 0x3ba   : > { %v1451_v54 = vsel %vm1443_vm5, %v1411_v11, %v1447_v61  ;;  %v1591_v61 = vld [vmem:[#allocation5 + $0x20] sm:$0xff] }
 0x3bb   : > { %v1435_v20 = vpop.xlane.xlu1 %1434  ;;  %v1460_v51 = vsel %vm1452_vm4, %v1433_v49, %v1456_v46  ;;  %v1589_v46 = vld [vmem:[#allocation5 + $0x10] sm:$0xff] }
 0x3bc   : > { %vm1453_vm2 = vcmp.ge.f32.partialorder %v1435_v20, 0.0  ;;  %v1457_v25 = vmul.f32 0.01, %v1435_v20  ;;  %v1407_v33 = vpop.xlane.xlu0 %1406  ;;  %v1465_v16 = vmax.f32 %v1448_v13, %v1460_v51 }
 0x3bd   : > { %vm1441_vm3 = vcmp.ge.f32.partialorder %v1407_v33, 0.0  ;;  %v1445_v7 = vmul.f32 0.01, %v1407_v33 }
 0x3be   : > { %v1461_v50 = vsel %vm1453_vm2, %v1435_v20, %v1457_v25  ;;  %v1588_v20 = vld [vmem:[#allocation5 + $0x8] sm:$0xff]  ;;  %v1587_v25 = vld [vmem:[#allocation5] sm:$0xff] }
 0x3bf   : > { %v1449_v23 = vsel %vm1441_vm3, %v1407_v33, %v1445_v7  ;;  %v1439_v36 = vpop.xlane.xlu1 %1438  ;;  %v1590_v33 = vld [vmem:[#allocation5 + $0x18] sm:$0xff]  ;;  %v1592_v7 = vld [vmem:[#allocation5 + $0x28] sm:$0xff] }
 0x3c0   : > { %vm1455_vm8 = vcmp.ge.f32.partialorder %v1439_v36, 0.0  ;;  %v1459_v4 = vmul.f32 0.01, %v1439_v36  ;;  %v1437_v39 = vpop.xlane.xlu0 %1436  ;;  %v1466_v0 = vmax.f32 %v1449_v23, %v1461_v50 }
 0x3c1   : > { %vm1454_vm9 = vcmp.ge.f32.partialorder %v1437_v39, 0.0  ;;  %v1458_v26 = vmul.f32 0.01, %v1437_v39 }
 0x3c2   : > { %v1463_v3 = vsel %vm1455_vm8, %v1439_v36, %v1459_v4  ;;  %v1469_v18 = vmax.f32 %v1465_v16, %v1466_v0  ;;  %v1596_v36 = vld [vmem:[#allocation5 + $0x48] sm:$0xff]  ;;  %v1595_v4 = vld [vmem:[#allocation5 + $0x40] sm:$0xff]  ;;  %v1601_v16 = vld [vmem:[#allocation5 + $0x70] sm:$0xff] }
 0x3c3   : > { %v1468_v14 = vmax.f32 %v1451_v54, %v1463_v3  ;;  %v1462_v15 = vsel %vm1454_vm9, %v1437_v39, %v1458_v26  ;;  %v1598_v39 = vld [vmem:[#allocation5 + $0x58] sm:$0xff]  ;;  %v1597_v26 = vld [vmem:[#allocation5 + $0x50] sm:$0xff]  ;;  %v1599_v0 = vld [vmem:[#allocation5 + $0x60] sm:$0xff] }
 0x3c4   : > { %v1467_v17 = vmax.f32 %v1450_v10, %v1462_v15 }
 0x3c6   : > { %v1470_v19 = vmax.f32 %v1467_v17, %v1468_v14  ;;  %v1638_v17 = vld [vmem:[#allocation6 + $0x8] sm:$0xff] }
 0x3c8   : > { %v1471_v27 = vmax.f32 %v1469_v18, %v1470_v19 }
 0x3ca   : > { %v1472_v28 = vrot.slane %v1471_v27, 4 }
 0x3cc   : > { %v1473_v29 = vmax.f32 %v1471_v27, %v1472_v28 }
 0x3ce   : > { %v1474_v30 = vrot.slane %v1473_v29, 2 }
 0x3d0   : > { %v1475_v34 = vmax.f32 %v1473_v29, %v1474_v30  ;;  %v1637_v30 = vld [vmem:[#allocation6] sm:$0xff] }
 0x3d2   : > { %v1476_v35 = vrot.slane %v1475_v34, 1 }
 0x3d4   : > { %v1477_v40 = vmax.f32 %v1475_v34, %v1476_v35  ;;  %v1640_v34 = vld [vmem:[#allocation6 + $0x18] sm:$0xff]  ;;  %v1639_v35 = vld [vmem:[#allocation6 + $0x10] sm:$0xff] }
 0x3d6   : > { %v1478_v43 = vmax.f32 %v1464_v37, %v1477_v40 }
 0x3d8   : > { %v1479_v44 = vsub.f32 %v1464_v37, %v1478_v43  ;;  %1686 = vst.msk [vmem:[#allocation7] sm:$0x1] %vm1685_vm10, %v1478_v43  ;;  %v1691_v47 = vrot.slane %v1478_v43, %v4740_v38 }
 0x3da   : > { %v1480_v48 = vmul.f32 1.442695, %v1479_v44  ;;  %v1707_v45 = vsub.f32 %v1462_v15, %v1691_v47  ;;  %v1706_v52 = vsub.f32 %v1461_v50, %v1691_v47  ;;  %v1705_v55 = vsub.f32 %v1460_v51, %v1691_v47  ;;  %v1593_v50 = vld [vmem:[#allocation5 + $0x30] sm:$0xff]  ;;  %v1602_v15 = vld [vmem:[#allocation5 + $0x78] sm:$0xff] }
 0x3db   : > { %v1693_v56 = vsub.f32 %v1448_v13, %v1691_v47  ;;  %v1694_v58 = vsub.f32 %v1449_v23, %v1691_v47  ;;  %v1695_v59 = vsub.f32 %v1450_v10, %v1691_v47  ;;  %v1696_v60 = vsub.f32 %v1451_v54, %v1691_v47  ;;  %v1600_v54 = vld [vmem:[#allocation5 + $0x68] sm:$0xff] }
 0x3dc   : > { %3825 = vpow2.f32 %v1480_v48  ;;  %v1713_v63 = vmul.f32 1.442695, %v1707_v45  ;;  %v1711_v62 = vmul.f32 1.442695, %v1706_v52  ;;  %v1709_v1 = vmul.f32 1.442695, %v1705_v55 }
 0x3dd   : > { %v1697_v5 = vmul.f32 1.442695, %v1693_v56  ;;  %v1708_v6 = vsub.f32 %v1463_v3, %v1691_v47  ;;  %v1699_v9 = vmul.f32 1.442695, %v1694_v58  ;;  %v1701_v57 = vmul.f32 1.442695, %v1695_v59 }
 0x3de   : > { %3827 = vpow2.f32 %v1713_v63  ;;  %v1703_v11 = vmul.f32 1.442695, %v1696_v60  ;;  %v1642_v47 = vld [vmem:[#allocation6 + $0x28] sm:$0xff]  ;;  %v1641_v48 = vld [vmem:[#allocation6 + $0x20] sm:$0xff]  ;;  %v1644_v45 = vld [vmem:[#allocation6 + $0x38] sm:$0xff] }
 0x3df   : > { %3829 = vpow2.f32 %v1711_v62  ;;  %v1715_v49 = vmul.f32 1.442695, %v1708_v6  ;;  %v1643_v60 = vld [vmem:[#allocation6 + $0x30] sm:$0xff]  ;;  %v1646_v63 = vld [vmem:[#allocation6 + $0x48] sm:$0xff]  ;;  %v1645_v62 = vld [vmem:[#allocation6 + $0x40] sm:$0xff] }
 0x3e0   : > { %3831 = vpow2.f32 %v1709_v1 }
 0x3e1   : > { %3833 = vpow2.f32 %v1697_v5 }
 0x3e2   : > { %3835 = vpow2.f32 %v1699_v9 }
 0x3e3   : > { %3837 = vpow2.f32 %v1701_v57 }
 0x3e4   : > { %3839 = vpow2.f32 %v1703_v11  ;;  %v1648_v11 = vld [vmem:[#allocation6 + $0x58] sm:$0xff] }
 0x3e5   : > { %3841 = vpow2.f32 %v1715_v49  ;;  %v1647_v49 = vld [vmem:[#allocation6 + $0x50] sm:$0xff] }
 0x3e6   : > { %v3826_v53 = vpop.eup %3825 }
 0x3e7   : > { %v4783_v23 = vrot.slane %v3826_v53, %v4740_v38 }
 0x3e8   : > { %v4785_v51 = vpop.eup %3827 }
 0x3e9   : > { %v4787_v3 = vpop.eup %3829  ;;  %v1605_v10 = vmul.f32 %v1588_v20, %v4783_v23  ;;  %v1604_v13 = vmul.f32 %v1587_v25, %v4783_v23  ;;  %v1607_v14 = vmul.f32 %v1590_v33, %v4783_v23  ;;  %v1606_v38 = vmul.f32 %v1589_v46, %v4783_v23  ;;  %v1650_v20 = vld [vmem:[#allocation6 + $0x68] sm:$0xff] }
 0x3ea   : > { %v4793_v18 = vpop.eup %3831  ;;  %1748 = vperm.xlu1 %3816, %v4787_v3   ;;  %v1609_v19 = vmul.f32 %v1592_v7, %v4783_v23  ;;  %v1608_v27 = vmul.f32 %v1591_v61, %v4783_v23  ;;  %v1611_v28 = vmul.f32 %v1594_v2, %v4783_v23  ;;  %v1610_v29 = vmul.f32 %v1593_v50, %v4783_v23  ;;  %v1649_v61 = vld [vmem:[#allocation6 + $0x60] sm:$0xff]  ;;  %v1652_v2 = vld [vmem:[#allocation6 + $0x78] sm:$0xff]  ;;  %v1651_v50 = vld [vmem:[#allocation6 + $0x70] sm:$0xff] }
 0x3eb   : > { %v3834_v37 = vpop.eup %3833  ;;  %1743 = vperm.xlu0 %3815, %v4793_v18   ;;  %1622 = vst.msk [vmem:[#allocation5 + $0x8] sm:$0xff] %vm1620_vm11, %v1605_v10  ;;  %1621 = vst.msk [vmem:[#allocation5] sm:$0xff] %vm1620_vm11, %v1604_v13  ;;  %v1613_v40 = vmul.f32 %v1596_v36, %v4783_v23  ;;  %v1612_v43 = vmul.f32 %v1595_v4, %v4783_v23  ;;  %v1615_v44 = vmul.f32 %v1598_v39, %v4783_v23 }
 0x3ec   : > { %1624 = vst.msk [vmem:[#allocation5 + $0x18] sm:$0xff] %vm1620_vm11, %v1607_v14  ;;  %1623 = vst.msk [vmem:[#allocation5 + $0x10] sm:$0xff] %vm1620_vm11, %v1606_v38  ;;  %v3836_v52 = vpop.eup %3835  ;;  %v1614_v55 = vmul.f32 %v1597_v26, %v4783_v23  ;;  %v1617_v56 = vmul.f32 %v1600_v54, %v4783_v23  ;;  %v1616_v58 = vmul.f32 %v1599_v0, %v4783_v23 }
 0x3ed   : > { %1626 = vst.msk [vmem:[#allocation5 + $0x28] sm:$0xff] %vm1620_vm11, %v1609_v19  ;;  %1625 = vst.msk [vmem:[#allocation5 + $0x20] sm:$0xff] %vm1620_vm11, %v1608_v27  ;;  %v1619_v59 = vmul.f32 %v1602_v15, %v4783_v23  ;;  %v3838_v1 = vpop.eup %3837  ;;  %v3699_v5 = vpack.c.bf16 %v3836_v52, %v3834_v37  ;;  %v1618_v6 = vmul.f32 %v1601_v16, %v4783_v23  ;;  %v1769_v27 = vld [vmem:[%s370_s10] sm:$0xff]  }
 0x3ee   : > { %1628 = vst.msk [vmem:[#allocation5 + $0x38] sm:$0xff] %vm1620_vm11, %v1611_v28  ;;  %1627 = vst.msk [vmem:[#allocation5 + $0x30] sm:$0xff] %vm1620_vm11, %v1610_v29  ;;  %v1654_v9 = vmul.f32 %v1638_v17, %v4783_v23  ;;  %v1653_v57 = vmul.f32 %v1637_v30, %v4783_v23  ;;  %v3840_v25 = vpop.eup %3839  ;;  %1719 = vperm.xlu1 %3816, %v3834_v37   ;;  %v1656_v33 = vmul.f32 %v1640_v34, %v4783_v23 }
 0x3ef   : > { %1630 = vst.msk [vmem:[#allocation5 + $0x48] sm:$0xff] %vm1620_vm11, %v1613_v40  ;;  %1629 = vst.msk [vmem:[#allocation5 + $0x40] sm:$0xff] %vm1620_vm11, %v1612_v43  ;;  %v1655_v46 = vmul.f32 %v1639_v35, %v4783_v23  ;;  %v1658_v7 = vmul.f32 %v1642_v47, %v4783_v23  ;;  %v1657_v53 = vmul.f32 %v1641_v48, %v4783_v23  ;;  %v3842_v36 = vpop.eup %3841  ;;  %3700 = vmatprep.subr.bf16.mxu1 %v3699_v5 }
 0x3f0   : > { %1632 = vst.msk [vmem:[#allocation5 + $0x58] sm:$0xff] %vm1620_vm11, %v1615_v44  ;;  %1631 = vst.msk [vmem:[#allocation5 + $0x50] sm:$0xff] %vm1620_vm11, %v1614_v55  ;;  %v3703_v4 = vpack.c.bf16 %v3840_v25, %v3838_v1  ;;  %v1660_v39 = vmul.f32 %v1644_v45, %v4783_v23  ;;  %v1659_v26 = vmul.f32 %v1643_v60, %v4783_v23  ;;  %3702 = vmatpush3.bf16.msra.mxu1 %v3699_v5 }
 0x3f1   : > { %1634 = vst.msk [vmem:[#allocation5 + $0x68] sm:$0xff] %vm1620_vm11, %v1617_v56  ;;  %1633 = vst.msk [vmem:[#allocation5 + $0x60] sm:$0xff] %vm1620_vm11, %v1616_v58  ;;  %v1662_v54 = vmul.f32 %v1646_v63, %v4783_v23  ;;  %v4837_v0 = vpack.c.bf16 %v3842_v36, %v4785_v51  ;;  %v1661_v10 = vmul.f32 %v1645_v62, %v4783_v23  ;;  %v2036_v28 = vunpack.c.h.bf16 %v1769_v27 }
 0x3f2   : > { %1636 = vst.msk [vmem:[#allocation5 + $0x78] sm:$0xff] %vm1620_vm11, %v1619_v59  ;;  %1635 = vst.msk [vmem:[#allocation5 + $0x70] sm:$0xff] %vm1620_vm11, %v1618_v6  ;;  %v1664_v13 = vmul.f32 %v1648_v11, %v4783_v23  ;;  %v1663_v14 = vmul.f32 %v1647_v49, %v4783_v23  ;;  %3704 = vmatprep.subr.bf16.mxu1 %v3703_v4  ;;  %v1666_v38 = vmul.f32 %v1650_v20, %v4783_v23 }
 0x3f3   : > { %1670 = vst.msk [vmem:[#allocation6 + $0x8] sm:$0xff] %vm1620_vm11, %v1654_v9  ;;  %1669 = vst.msk [vmem:[#allocation6] sm:$0xff] %vm1620_vm11, %v1653_v57  ;;  %v1665_v15 = vmul.f32 %v1649_v61, %v4783_v23  ;;  %v1668_v16 = vmul.f32 %v1652_v2, %v4783_v23  ;;  %v1667_v17 = vmul.f32 %v1651_v50, %v4783_v23  ;;  %1724 = vperm.xlu1 %3816, %v3836_v52  }
 0x3f4   : > { %1672 = vst.msk [vmem:[#allocation6 + $0x18] sm:$0xff] %vm1620_vm11, %v1656_v33  ;;  %1671 = vst.msk [vmem:[#allocation6 + $0x10] sm:$0xff] %vm1620_vm11, %v1655_v46  ;;  %v4858_v19 = vpack.c.bf16 %v4787_v3, %v4793_v18  ;;  %3706 = vmatpush3.bf16.msra.mxu1 %v3703_v4  ;;  %v1771_v3 = vld [vmem:[%s370_s10 + $0x8] sm:$0xff]   ;;  %v2035_v18 = vunpack.c.l.bf16 %v1769_v27 }
 0x3f5   : > { %1674 = vst.msk [vmem:[#allocation6 + $0x28] sm:$0xff] %vm1620_vm11, %v1658_v7  ;;  %1673 = vst.msk [vmem:[#allocation6 + $0x20] sm:$0xff] %vm1620_vm11, %v1657_v53  ;;  %v2037_v29 = vunpack.c.l.bf16 %v1771_v3  ;;  %v2038_v30 = vunpack.c.h.bf16 %v1771_v3  ;;  %v1482_v4 = vld [vmem:[#allocation4] sm:$0xff] }
 0x3f6   : > { %1676 = vst.msk [vmem:[#allocation6 + $0x38] sm:$0xff] %vm1620_vm11, %v1660_v39  ;;  %1675 = vst.msk [vmem:[#allocation6 + $0x30] sm:$0xff] %vm1620_vm11, %v1659_v26  ;;  %3708 = vmatprep.subr.bf16.mxu1 %v4858_v19  ;;  %v1483_v39 = vld [vmem:[#allocation4 + $0x8] sm:$0xff]  ;;  %v1484_v26 = vld [vmem:[#allocation4 + $0x10] sm:$0xff] }
 0x3f7   : > { %1678 = vst.msk [vmem:[#allocation6 + $0x48] sm:$0xff] %vm1620_vm11, %v1662_v54  ;;  %1677 = vst.msk [vmem:[#allocation6 + $0x40] sm:$0xff] %vm1620_vm11, %v1661_v10  ;;  %1753 = vperm.xlu1 %3816, %v4785_v51  }
 0x3f8   : > { %1680 = vst.msk [vmem:[#allocation6 + $0x58] sm:$0xff] %vm1620_vm11, %v1664_v13  ;;  %1679 = vst.msk [vmem:[#allocation6 + $0x50] sm:$0xff] %vm1620_vm11, %v1663_v14 }
 0x3f9   : > { %1682 = vst.msk [vmem:[#allocation6 + $0x68] sm:$0xff] %vm1620_vm11, %v1666_v38  ;;  %1681 = vst.msk [vmem:[#allocation6 + $0x60] sm:$0xff] %vm1620_vm11, %v1665_v15 }
 0x3fa   : > { %1684 = vst.msk [vmem:[#allocation6 + $0x78] sm:$0xff] %vm1620_vm11, %v1668_v16  ;;  %1683 = vst.msk [vmem:[#allocation6 + $0x70] sm:$0xff] %vm1620_vm11, %v1667_v17 }
 0x3fb   : > { %1758 = vperm.xlu1 %3816, %v3842_v36  }
 0x3ff   : > { %1729 = vperm.xlu1 %3816, %v3838_v1  }
 0x403   : > { %1734 = vperm.xlu1 %3816, %v3840_v25  }
 0x409   : > { %1817 = vxpose.xlu0.c.b16.start [1/2] (short) %v1769_v27, 128 }
 0x40d   : > { %1818 = vxpose.xlu0.c.b16.end [2/2] (short) %v1771_v3, 128 }
 0x42c   : > { %2055 = vxpose.xlu1.b32.start [1/4] (short) %v2035_v18, 128 }
 0x42e   : > { %1520 = vperm.xlu0 %3815, %v4783_v23  }
 0x430   : > { %2056 = vxpose.xlu1.b32.cont [2/4] (short) %v2036_v28, 128  ;;  %v1486_v28 = vld [vmem:[#allocation4 + $0x20] sm:$0xff] }
 0x434   : > { %2057 = vxpose.xlu1.b32.cont [3/4] (short) %v2037_v29, 128  ;;  %v1487_v29 = vld [vmem:[#allocation4 + $0x28] sm:$0xff] }
 0x438   : > { %2058 = vxpose.xlu1.b32.end [4/4] (short) %v2038_v30, 128  ;;  %v1488_v30 = vld [vmem:[#allocation4 + $0x30] sm:$0xff] }
 0x469   : > { %v1749_v51 = vpop.permute.xlu1 %1748 }
 0x46a   : > { %v1762_v34 = vmul.f32 %v1749_v51, %v4768_v42  ;;  %v1744_v35 = vpop.permute.xlu0 %1743 }
 0x46b   : > { %v1761_v37 = vmul.f32 %v1744_v35, %v4752_v24 }
 0x46d   : > { %v1766_v40 = vpack.c.bf16 %v1762_v34, %v1761_v37  ;;  %v1720_v43 = vpop.permute.xlu1 %1719  ;;  %v1489_v34 = vld [vmem:[#allocation4 + $0x38] sm:$0xff] }
 0x46e   : > { %v1737_v47 = vmul.f32 %v1720_v43, %v4750_v22 }
 0x46f   : > { %1858 = vmatprep.subr.bf16.mxu0 %v1766_v40  ;;  %v1825_v22 = vpop.trf.xlu0 }
 0x472   : > { %v1725_v44 = vpop.permute.xlu1 %1724 }
 0x473   : > { %v1738_v48 = vmul.f32 %v1725_v44, %v4766_v41  ;;  %v1826_v41 = vpop.trf.xlu0 }
 0x475   : > { %v1765_v23 = vpack.c.bf16 %v1738_v48, %v1737_v47 }
 0x476   : > { %v1754_v45 = vpop.permute.xlu1 %1753 }
 0x477   : > { %1859 = vmatpush1.bf16.msra.mxu0 %v1765_v23  ;;  %v1763_v55 = vmul.f32 %v4748_v21, %v1754_v45  ;;  %v1827_v21 = vpop.trf.xlu0 }
 0x47a   : > { %v1759_v52 = vpop.permute.xlu1 %1758 }
 0x47b   : > { %v1764_v56 = vmul.f32 %v4760_v32, %v1759_v52 }
 0x47d   : > { %v1768_v42 = vpack.c.bf16 %v1764_v56, %v1763_v55  ;;  %v1490_v56 = vld [vmem:[#allocation4 + $0x40] sm:$0xff] }
 0x47e   : > { %v1730_v58 = vpop.permute.xlu1 %1729 }
 0x47f   : > { %1860 = vmatprep.subr.bf16.mxu0 %v1768_v42  ;;  %v1739_v59 = vmul.f32 %v4746_v12, %v1730_v58  ;;  %v1828_v12 = vpop.trf.xlu0  ;;  %v1491_v42 = vld [vmem:[#allocation4 + $0x48] sm:$0xff]  ;;  %v1492_v58 = vld [vmem:[#allocation4 + $0x50] sm:$0xff] }
 0x482   : > { %v1735_v24 = vpop.permute.xlu1 %1734 }
 0x483   : > { %v1740_v60 = vmul.f32 %v4758_v31, %v1735_v24  ;;  %v1829_v31 = vpop.trf.xlu0 }
 0x485   : > { %v1767_v63 = vpack.c.bf16 %v1740_v60, %v1739_v59  ;;  %v1493_v59 = vld [vmem:[#allocation4 + $0x58] sm:$0xff] }
 0x487   : > { %1861 = vmatpush1.bf16.msra.mxu0 %v1767_v63  ;;  %v1830_v1 = vpop.trf.xlu0 }
 0x48a   : > { %3023 = vmatmul.mubr.msk.bf16.vlgmr.msra.gmra.mrb[4].mxu0 %vm1833_vm12, %v1825_v22 }
 0x48b   : > { %1900 = vmatprep.mubr.bf16.mxu0 %v4175_v8  ;;  %v1831_v9 = vpop.trf.xlu0 }
 0x48f   : > { %v1832_v49 = vpop.trf.xlu0 }
 0x492   : > { %3024 = vmatmul.mubr.msk.bf16.gmra.mrb[8].mxu0 %vm1833_vm12, %v1826_v41 }
 0x493   : > { %1910 = vmatprep.mubr.bf16.mxu0 %v4175_v8 }
 0x49a   : > { %3025 = vmatmul.mubr.msk.bf16.gmra.mrb[12].mxu0 %vm1833_vm12, %v1827_v21 }
 0x49b   : > { %1920 = vmatprep.mubr.bf16.mxu0 %v4175_v8 }
 0x4a2   : > { %3026 = vmatmul.mubr.msk.bf16.gmra.mrb[16].mxu0 %vm1833_vm12, %v1828_v12 }
 0x4a3   : > { %1930 = vmatprep.mubr.bf16.mxu0 %v4175_v8 }
 0x4aa   : > { %3027 = vmatmul.mubr.msk.bf16.gmra.mrb[20].mxu0 %vm1833_vm12, %v1829_v31 }
 0x4ab   : > { %1940 = vmatprep.mubr.bf16.mxu0 %v4175_v8 }
 0x4ac   : > { %v2071_v32 = vpop.trf.xlu1 }
 0x4ad   : > { %3515 = vmatprep.mubr.msk.f32.mxu1 %vm1833_vm12, %v2071_v32  ;;  %v4929_v36 = vpop.permute.xlu0 %1520 }
 0x4ae   : > { %v1523_v54 = vmul.f32 %v4929_v36, %v1482_v4  ;;  %v1524_v13 = vmul.f32 %v4929_v36, %v1483_v39  ;;  %v1525_v15 = vmul.f32 %v4929_v36, %v1484_v26  ;;  %v1527_v51 = vmul.f32 %v4929_v36, %v1486_v28  ;;  %v1498_v39 = vld [vmem:[#allocation4 + $0x80] sm:$0xff]  ;;  %v1499_v26 = vld [vmem:[#allocation4 + $0x88] sm:$0xff] }
 0x4af   : > { %v1528_v37 = vmul.f32 %v4929_v36, %v1487_v29  ;;  %v1529_v44 = vmul.f32 %v4929_v36, %v1488_v30  ;;  %v1530_v23 = vmul.f32 %v4929_v36, %v1489_v34  ;;  %v1531_v24 = vmul.f32 %v4929_v36, %v1490_v56  ;;  %v1502_v29 = vld [vmem:[#allocation4 + $0xa0] sm:$0xff]  ;;  %v1503_v30 = vld [vmem:[#allocation4 + $0xa8] sm:$0xff] }
 0x4b0   : > { %v2072_v62 = vpop.trf.xlu1  ;;  %v1532_v63 = vmul.f32 %v4929_v36, %v1491_v42  ;;  %v1533_v21 = vmul.f32 %v4929_v36, %v1492_v58  ;;  %v2040_v34 = vld [vmem:[#allocation5 + $0x8] sm:$0xff] }
 0x4b1   : > { %3516 = vmatmul.mubr.msk.f32.vlgmr.msra.gmra.mrb[4].mxu1 %vm1833_vm12, %v2072_v62 }
 0x4b2   : > { %3710 = vmatpush3.bf16.msra.mxu1 %v4858_v19  ;;  %3028 = vmatmul.mubr.msk.bf16.gmra.mrb[24].mxu0 %vm1833_vm12, %v1830_v1 }
 0x4b3   : > { %3712 = vmatprep.subr.bf16.mxu1 %v4837_v0  ;;  %1950 = vmatprep.mubr.bf16.mxu0 %v4175_v8 }
 0x4b4   : > { %v2073_v5 = vpop.trf.xlu1 }
 0x4b5   : > { %3518 = vmatprep.mubr.msk.f32.mxu1 %vm1833_vm12, %v2073_v5 }
 0x4b6   : > { %3714 = vmatpush3.bf16.msra.mxu1 %v4837_v0  ;;  %v1485_v0 = vld [vmem:[#allocation4 + $0x18] sm:$0xff] }
 0x4b7   : > { %v1526_v19 = vmul.f32 %v4929_v36, %v1485_v0  ;;  %v1539_v0 = vmul.f32 %v4929_v36, %v1498_v39  ;;  %v2044_v39 = vld [vmem:[#allocation5 + $0x28] sm:$0xff] }
 0x4b8   : > { %v2074_v6 = vpop.trf.xlu1 }
 0x4b9   : > { %3519 = vmatmul.mubr.msk.f32.gmra.mrb[6].mxu1 %vm1833_vm12, %v2074_v6 }
 0x4ba   : > { %3029 = vmatmul.mubr.msk.bf16.gmra.mrb[28].mxu0 %vm1833_vm12, %v1831_v9  ;;  %v1495_v9 = vld [vmem:[#allocation4 + $0x68] sm:$0xff] }
 0x4bb   : > { %1960 = vmatprep.mubr.bf16.mxu0 %v4175_v8 }
 0x4bc   : > { %v2075_v57 = vpop.trf.xlu1 }
 0x4bd   : > { %3521 = vmatprep.mubr.msk.f32.mxu1 %vm1833_vm12, %v2075_v57 }
 0x4c0   : > { %v2076_v11 = vpop.trf.xlu1 }
 0x4c1   : > { %3522 = vmatmul.mubr.msk.f32.gmra.mrb[8].mxu1 %vm1833_vm12, %v2076_v11 }
 0x4c2   : > { %3030 = vmatmul.mubr.msk.bf16.gmra.mrb[32].mxu0 %vm1833_vm12, %v1832_v49  ;;  %v1497_v49 = vld [vmem:[#allocation4 + $0x78] sm:$0xff] }
 0x4c4   : > { %v2077_v20 = vpop.trf.xlu1 }
 0x4c5   : > { %3524 = vmatprep.mubr.msk.f32.mxu1 %vm1833_vm12, %v2077_v20 }
 0x4c8   : > { %v2078_v25 = vpop.trf.xlu1 }
 0x4c9   : > { %3525 = vmatmul.mubr.msk.f32.gmra.mrb[10].mxu1 %vm1833_vm12, %v2078_v25 }
 0x4cc   : > { %v2079_v33 = vpop.trf.xlu1 }
 0x4cd   : > { %3527 = vmatprep.mubr.msk.f32.mxu1 %vm1833_vm12, %v2079_v33 }
 0x4d0   : > { %v2080_v46 = vpop.trf.xlu1 }
 0x4d1   : > { %3528 = vmatmul.mubr.msk.f32.gmra.mrb[12].mxu1 %vm1833_vm12, %v2080_v46 }
 0x4d4   : > { %v2081_v8 = vpop.trf.xlu1 }
 0x4d5   : > { %3530 = vmatprep.mubr.msk.f32.mxu1 %vm1833_vm12, %v2081_v8 }
 0x4d8   : > { %v2082_v7 = vpop.trf.xlu1 }
 0x4d9   : > { %3531 = vmatmul.mubr.msk.f32.gmra.mrb[14].mxu1 %vm1833_vm12, %v2082_v7 }
 0x4dc   : > { %v2083_v53 = vpop.trf.xlu1 }
 0x4dd   : > { %3533 = vmatprep.mubr.msk.f32.mxu1 %vm1833_vm12, %v2083_v53 }
 0x4e0   : > { %v2084_v61 = vpop.trf.xlu1 }
 0x4e1   : > { %3534 = vmatmul.mubr.msk.f32.gmra.mrb[16].mxu1 %vm1833_vm12, %v2084_v61 }
 0x4e4   : > { %v2085_v2 = vpop.trf.xlu1 }
 0x4e5   : > { %3536 = vmatprep.mubr.msk.f32.mxu1 %vm1833_vm12, %v2085_v2 }
 0x4e8   : > { %v2086_v50 = vpop.trf.xlu1 }
 0x4e9   : > { %3537 = vmatmul.mubr.msk.f32.gmra.mrb[18].mxu1 %vm1833_vm12, %v2086_v50 }
 0x4ea   : > { %3547 = vmatprep.mubr.msk.f32.mxu1 %vm1833_vm12, %v2071_v32  ;;  %v1534_v32 = vmul.f32 %v4929_v36, %v1493_v59 }
 0x4ed   : > { %3548 = vmatmul.mubr.msk.f32.vlgmr.msra.gmra.mrb[20].mxu1 %vm1833_vm12, %v2072_v62 }
 0x4ee   : > { %3550 = vmatprep.mubr.msk.f32.mxu1 %vm1833_vm12, %v2073_v5 }
 0x4f1   : > { %3551 = vmatmul.mubr.msk.f32.gmra.mrb[22].mxu1 %vm1833_vm12, %v2074_v6  ;;  %v1494_v6 = vld [vmem:[#allocation4 + $0x60] sm:$0xff] }
 0x4f2   : > { %3553 = vmatprep.mubr.msk.f32.mxu1 %vm1833_vm12, %v2075_v57  ;;  %v1496_v57 = vld [vmem:[#allocation4 + $0x70] sm:$0xff] }
 0x4f5   : > { %3554 = vmatmul.mubr.msk.f32.gmra.mrb[24].mxu1 %vm1833_vm12, %v2076_v11  ;;  %v1535_v11 = vmul.f32 %v4929_v36, %v1494_v6  ;;  %v2041_v6 = vld [vmem:[#allocation5 + $0x10] sm:$0xff] }
 0x4f6   : > { %3556 = vmatprep.mubr.msk.f32.mxu1 %vm1833_vm12, %v2077_v20 }
 0x4f9   : > { %3557 = vmatmul.mubr.msk.f32.gmra.mrb[26].mxu1 %vm1833_vm12, %v2078_v25  ;;  %v1536_v25 = vmul.f32 %v4929_v36, %v1495_v9 }
 0x4fa   : > { %3559 = vmatprep.mubr.msk.f32.mxu1 %vm1833_vm12, %v2079_v33 }
 0x4fd   : > { %3560 = vmatmul.mubr.msk.f32.gmra.mrb[28].mxu1 %vm1833_vm12, %v2080_v46 }
 0x4fe   : > { %3562 = vmatprep.mubr.msk.f32.mxu1 %vm1833_vm12, %v2081_v8  ;;  %v1537_v8 = vmul.f32 %v4929_v36, %v1496_v57 }
 0x501   : > { %3563 = vmatmul.mubr.msk.f32.gmra.mrb[30].mxu1 %vm1833_vm12, %v2082_v7 }
 0x502   : > { %3565 = vmatprep.mubr.msk.f32.mxu1 %vm1833_vm12, %v2083_v53 }
 0x505   : > { %3566 = vmatmul.mubr.msk.f32.gmra.mrb[32].mxu1 %vm1833_vm12, %v2084_v61  ;;  %v1538_v61 = vmul.f32 %v4929_v36, %v1497_v49 }
 0x506   : > { %3568 = vmatprep.mubr.msk.f32.mxu1 %vm1833_vm12, %v2085_v2 }
 0x509   : > { %3569 = vmatmul.mubr.msk.f32.gmra.mrb[34].mxu1 %vm1833_vm12, %v2086_v50 }
 0x55d   : > { %v1892_v10 = vpop.f32.mrb[4].mxu0 }
 0x55e   : > { %v1971_v14 = vadd.f32 %v1892_v10, %v1523_v54  ;;  %v1894_v38 = vpop.f32.mrb[5].mxu0  ;;  %v1500_v54 = vld [vmem:[#allocation4 + $0x90] sm:$0xff]  ;;  %v1501_v10 = vld [vmem:[#allocation4 + $0x98] sm:$0xff] }
 0x55f   : > { %v1972_v16 = vadd.f32 %v1894_v38, %v1524_v13  ;;  %v1896_v17 = vpop.f32.mrb[6].mxu0 }
 0x560   : > { %2003 = vst [vmem:[#allocation4] sm:$0xff] %v1971_v14  ;;  %v1973_v27 = vadd.f32 %v1896_v17, %v1525_v15  ;;  %v1898_v3 = vpop.f32.mrb[7].mxu0  ;;  %v1540_v14 = vmul.f32 %v4929_v36, %v1499_v26 }
 0x561   : > { %2004 = vst [vmem:[#allocation4 + $0x8] sm:$0xff] %v1972_v16  ;;  %v1974_v18 = vadd.f32 %v1898_v3, %v1526_v19  ;;  %v1541_v16 = vmul.f32 %v4929_v36, %v1500_v54 }
 0x562   : > { %2005 = vst [vmem:[#allocation4 + $0x10] sm:$0xff] %v1973_v27  ;;  %v1542_v27 = vmul.f32 %v4929_v36, %v1501_v10 }
 0x563   : > { %2006 = vst [vmem:[#allocation4 + $0x18] sm:$0xff] %v1974_v18 }
 0x565   : > { %v1902_v35 = vpop.f32.mrb[8].mxu0 }
 0x566   : > { %v1975_v40 = vadd.f32 %v1902_v35, %v1527_v51  ;;  %v1904_v43 = vpop.f32.mrb[9].mxu0  ;;  %v1504_v51 = vld [vmem:[#allocation4 + $0xb0] sm:$0xff] }
 0x567   : > { %v1976_v47 = vadd.f32 %v1904_v43, %v1528_v37  ;;  %v1906_v48 = vpop.f32.mrb[10].mxu0  ;;  %v1543_v37 = vmul.f32 %v4929_v36, %v1502_v29  ;;  %v1545_v56 = vmul.f32 %v4929_v36, %v1504_v51 }
 0x568   : > { %2007 = vst [vmem:[#allocation4 + $0x20] sm:$0xff] %v1975_v40  ;;  %v1977_v45 = vadd.f32 %v1906_v48, %v1529_v44  ;;  %v1908_v52 = vpop.f32.mrb[11].mxu0  ;;  %v1505_v40 = vld [vmem:[#allocation4 + $0xb8] sm:$0xff] }
 0x569   : > { %2008 = vst [vmem:[#allocation4 + $0x28] sm:$0xff] %v1976_v47  ;;  %v1978_v55 = vadd.f32 %v1908_v52, %v1530_v23  ;;  %v2039_v47 = vld [vmem:[#allocation5] sm:$0xff]  ;;  %v1544_v23 = vmul.f32 %v4929_v36, %v1503_v30 }
 0x56a   : > { %2009 = vst [vmem:[#allocation4 + $0x30] sm:$0xff] %v1977_v45 }
 0x56b   : > { %2010 = vst [vmem:[#allocation4 + $0x38] sm:$0xff] %v1978_v55 }
 0x56d   : > { %v1912_v60 = vpop.f32.mrb[12].mxu0 }
 0x56e   : > { %v1979_v22 = vadd.f32 %v1912_v60, %v1531_v24  ;;  %v1914_v41 = vpop.f32.mrb[13].mxu0  ;;  %v1546_v24 = vmul.f32 %v4929_v36, %v1505_v40  ;;  %v2045_v40 = vld [vmem:[#allocation5 + $0x30] sm:$0xff] }
 0x56f   : > { %v1980_v12 = vadd.f32 %v1914_v41, %v1532_v63  ;;  %v1916_v31 = vpop.f32.mrb[14].mxu0  ;;  %v1507_v41 = vld [vmem:[#allocation4 + $0xc8] sm:$0xff] }
 0x570   : > { %2011 = vst [vmem:[#allocation4 + $0x40] sm:$0xff] %v1979_v22  ;;  %v1981_v62 = vadd.f32 %v1916_v31, %v1533_v21  ;;  %v1918_v1 = vpop.f32.mrb[15].mxu0  ;;  %v1506_v22 = vld [vmem:[#allocation4 + $0xc0] sm:$0xff]  ;;  %v1508_v21 = vld [vmem:[#allocation4 + $0xd0] sm:$0xff]  ;;  %v1548_v57 = vmul.f32 %v4929_v36, %v1507_v41 }
 0x571   : > { %2012 = vst [vmem:[#allocation4 + $0x48] sm:$0xff] %v1980_v12  ;;  %v1982_v5 = vadd.f32 %v1918_v1, %v1534_v32  ;;  %v2042_v12 = vld [vmem:[#allocation5 + $0x18] sm:$0xff]  ;;  %v1547_v32 = vmul.f32 %v4929_v36, %v1506_v22  ;;  %v2051_v41 = vld [vmem:[#allocation5 + $0x60] sm:$0xff] }
 0x572   : > { %2013 = vst [vmem:[#allocation4 + $0x50] sm:$0xff] %v1981_v62  ;;  %v1509_v62 = vld [vmem:[#allocation4 + $0xd8] sm:$0xff] }
 0x573   : > { %2014 = vst [vmem:[#allocation4 + $0x58] sm:$0xff] %v1982_v5 }
 0x575   : > { %v1922_v20 = vpop.f32.mrb[16].mxu0 }
 0x576   : > { %v1983_v33 = vadd.f32 %v1922_v20, %v1535_v11  ;;  %v1924_v46 = vpop.f32.mrb[17].mxu0 }
 0x577   : > { %v1984_v7 = vadd.f32 %v1924_v46, %v1536_v25  ;;  %v1926_v53 = vpop.f32.mrb[18].mxu0  ;;  %v1549_v25 = vmul.f32 %v4929_v36, %v1508_v21 }
 0x578   : > { %2015 = vst [vmem:[#allocation4 + $0x60] sm:$0xff] %v1983_v33  ;;  %v1985_v2 = vadd.f32 %v1926_v53, %v1537_v8  ;;  %v1928_v50 = vpop.f32.mrb[19].mxu0  ;;  %v1550_v8 = vmul.f32 %v4929_v36, %v1509_v62 }
 0x579   : > { %2016 = vst [vmem:[#allocation4 + $0x68] sm:$0xff] %v1984_v7  ;;  %v1986_v4 = vadd.f32 %v1928_v50, %v1538_v61  ;;  %v1511_v50 = vld [vmem:[#allocation4 + $0xe8] sm:$0xff] }
 0x57a   : > { %2017 = vst [vmem:[#allocation4 + $0x70] sm:$0xff] %v1985_v2  ;;  %v1510_v2 = vld [vmem:[#allocation4 + $0xe0] sm:$0xff] }
 0x57b   : > { %2018 = vst [vmem:[#allocation4 + $0x78] sm:$0xff] %v1986_v4  ;;  %v1512_v4 = vld [vmem:[#allocation4 + $0xf0] sm:$0xff]  ;;  %v1551_v54 = vmul.f32 %v4929_v36, %v1510_v2  ;;  %v2317_v2 = vld [vmem:[#allocation6 + $0x28] sm:$0xff] }
 0x57d   : > { %v1932_v13 = vpop.f32.mrb[20].mxu0 }
 0x57e   : > { %v1987_v38 = vadd.f32 %v1932_v13, %v1539_v0  ;;  %v1934_v15 = vpop.f32.mrb[21].mxu0  ;;  %v1513_v0 = vld [vmem:[#allocation4 + $0xf8] sm:$0xff] }
 0x57f   : > { %v1988_v17 = vadd.f32 %v1934_v15, %v1540_v14  ;;  %v1936_v19 = vpop.f32.mrb[22].mxu0  ;;  %v2043_v14 = vld [vmem:[#allocation5 + $0x20] sm:$0xff]  ;;  %v1552_v15 = vmul.f32 %v4929_v36, %v1511_v50 }
 0x580   : > { %2019 = vst [vmem:[#allocation4 + $0x80] sm:$0xff] %v1987_v38  ;;  %v1989_v3 = vadd.f32 %v1936_v19, %v1541_v16  ;;  %v1938_v18 = vpop.f32.mrb[23].mxu0 }
 0x581   : > { %2020 = vst [vmem:[#allocation4 + $0x88] sm:$0xff] %v1988_v17  ;;  %v1990_v28 = vadd.f32 %v1938_v18, %v1542_v27  ;;  %v1553_v27 = vmul.f32 %v4929_v36, %v1512_v4 }
 0x582   : > { %2021 = vst [vmem:[#allocation4 + $0x90] sm:$0xff] %v1989_v3 }
 0x583   : > { %2022 = vst [vmem:[#allocation4 + $0x98] sm:$0xff] %v1990_v28  ;;  %v1554_v28 = vmul.f32 %v4929_v36, %v1513_v0  ;;  %v2048_v36 = vld [vmem:[#allocation5 + $0x48] sm:$0xff]  ;;  %v2319_v0 = vld [vmem:[#allocation6 + $0x38] sm:$0xff] }
 0x584   : > { %v3517_v35 = vpop.f32.mrb[4].mxu1 }
 0x585   : > { %v2281_v43 = vadd.f32 %v3517_v35, %v2040_v34  ;;  %v1942_v44 = vpop.f32.mrb[24].mxu0  ;;  %v2201_v48 = vpop.f32.mrb[5].mxu1  ;;  %v2046_v34 = vld [vmem:[#allocation5 + $0x38] sm:$0xff] }
 0x586   : > { %v1991_v45 = vadd.f32 %v1942_v44, %v1543_v37  ;;  %v2280_v52 = vadd.f32 %v2201_v48, %v2039_v47  ;;  %v1944_v55 = vpop.f32.mrb[25].mxu0 }
 0x587   : > { %2297 = vst.msk [vmem:[#allocation5 + $0x8] sm:$0xff] %vm1620_vm11, %v2281_v43  ;;  %v1992_v42 = vadd.f32 %v1944_v55, %v1544_v23  ;;  %v1946_v58 = vpop.f32.mrb[26].mxu0  ;;  %v2047_v23 = vld [vmem:[#allocation5 + $0x40] sm:$0xff]  ;;  %v2050_v55 = vld [vmem:[#allocation5 + $0x58] sm:$0xff] }
 0x588   : > { %2023 = vst [vmem:[#allocation4 + $0xa0] sm:$0xff] %v1991_v45  ;;  %2296 = vst.msk [vmem:[#allocation5] sm:$0xff] %vm1620_vm11, %v2280_v52  ;;  %v1993_v59 = vadd.f32 %v1946_v58, %v1545_v56  ;;  %v1948_v60 = vpop.f32.mrb[27].mxu0  ;;  %v2049_v58 = vld [vmem:[#allocation5 + $0x50] sm:$0xff] }
 0x589   : > { %2024 = vst [vmem:[#allocation4 + $0xa8] sm:$0xff] %v1992_v42  ;;  %v1994_v63 = vadd.f32 %v1948_v60, %v1546_v24  ;;  %v2052_v60 = vld [vmem:[#allocation5 + $0x68] sm:$0xff] }
 0x58a   : > { %2025 = vst [vmem:[#allocation4 + $0xb0] sm:$0xff] %v1993_v59 }
 0x58b   : > { %2026 = vst [vmem:[#allocation4 + $0xb8] sm:$0xff] %v1994_v63 }
 0x58c   : > { %v3520_v31 = vpop.f32.mrb[6].mxu1 }
 0x58d   : > { %v2283_v1 = vadd.f32 %v3520_v31, %v2042_v12  ;;  %v1952_v5 = vpop.f32.mrb[28].mxu0  ;;  %v2211_v9 = vpop.f32.mrb[7].mxu1  ;;  %v2054_v31 = vld [vmem:[#allocation5 + $0x78] sm:$0xff] }
 0x58e   : > { %v1995_v11 = vadd.f32 %v1952_v5, %v1547_v32  ;;  %v2282_v49 = vadd.f32 %v2211_v9, %v2041_v6  ;;  %v1954_v20 = vpop.f32.mrb[29].mxu0  ;;  %v2313_v9 = vld [vmem:[#allocation6 + $0x8] sm:$0xff] }
 0x58f   : > { %2299 = vst.msk [vmem:[#allocation5 + $0x18] sm:$0xff] %vm1620_vm11, %v2283_v1  ;;  %v1996_v33 = vadd.f32 %v1954_v20, %v1548_v57  ;;  %v1956_v46 = vpop.f32.mrb[30].mxu0  ;;  %v2053_v1 = vld [vmem:[#allocation5 + $0x70] sm:$0xff] }
 0x590   : > { %2027 = vst [vmem:[#allocation4 + $0xc0] sm:$0xff] %v1995_v11  ;;  %2298 = vst.msk [vmem:[#allocation5 + $0x10] sm:$0xff] %vm1620_vm11, %v2282_v49  ;;  %v1997_v7 = vadd.f32 %v1956_v46, %v1549_v25  ;;  %v1958_v53 = vpop.f32.mrb[31].mxu0  ;;  %v2312_v49 = vld [vmem:[#allocation6] sm:$0xff] }
 0x591   : > { %2028 = vst [vmem:[#allocation4 + $0xc8] sm:$0xff] %v1996_v33  ;;  %v1998_v61 = vadd.f32 %v1958_v53, %v1550_v8  ;;  %v2315_v33 = vld [vmem:[#allocation6 + $0x18] sm:$0xff] }
 0x592   : > { %2029 = vst [vmem:[#allocation4 + $0xd0] sm:$0xff] %v1997_v7  ;;  %v2314_v7 = vld [vmem:[#allocation6 + $0x10] sm:$0xff] }
 0x593   : > { %2030 = vst [vmem:[#allocation4 + $0xd8] sm:$0xff] %v1998_v61 }
 0x594   : > { %v3523_v26 = vpop.f32.mrb[8].mxu1 }
 0x595   : > { %v2285_v10 = vadd.f32 %v3523_v26, %v2044_v39  ;;  %v1962_v13 = vpop.f32.mrb[32].mxu0  ;;  %v2221_v38 = vpop.f32.mrb[9].mxu1  ;;  %v2316_v39 = vld [vmem:[#allocation6 + $0x20] sm:$0xff] }
 0x596   : > { %v1999_v16 = vadd.f32 %v1962_v13, %v1551_v54  ;;  %v2284_v17 = vadd.f32 %v2221_v38, %v2043_v14  ;;  %v1964_v19 = vpop.f32.mrb[33].mxu0  ;;  %v2318_v14 = vld [vmem:[#allocation6 + $0x30] sm:$0xff] }
 0x597   : > { %2301 = vst.msk [vmem:[#allocation5 + $0x28] sm:$0xff] %vm1620_vm11, %v2285_v10  ;;  %v2000_v3 = vadd.f32 %v1964_v19, %v1552_v15  ;;  %v1966_v18 = vpop.f32.mrb[34].mxu0 }
 0x598   : > { %2031 = vst [vmem:[#allocation4 + $0xe0] sm:$0xff] %v1999_v16  ;;  %2300 = vst.msk [vmem:[#allocation5 + $0x20] sm:$0xff] %vm1620_vm11, %v2284_v17  ;;  %v2001_v29 = vadd.f32 %v1966_v18, %v1553_v27  ;;  %v1968_v30 = vpop.f32.mrb[35].mxu0  ;;  %v2321_v16 = vld [vmem:[#allocation6 + $0x48] sm:$0xff]  ;;  %v2320_v27 = vld [vmem:[#allocation6 + $0x40] sm:$0xff] }
 0x599   : > { %2032 = vst [vmem:[#allocation4 + $0xe8] sm:$0xff] %v2000_v3  ;;  %v2002_v51 = vadd.f32 %v1968_v30, %v1554_v28  ;;  %v2323_v28 = vld [vmem:[#allocation6 + $0x58] sm:$0xff] }
 0x59a   : > { %2033 = vst [vmem:[#allocation4 + $0xf0] sm:$0xff] %v2001_v29 }
 0x59b   : > { %2034 = vst [vmem:[#allocation4 + $0xf8] sm:$0xff] %v2002_v51  ;;  %v2322_v51 = vld [vmem:[#allocation6 + $0x50] sm:$0xff] }
 0x59c   : > { %v3526_v35 = vpop.f32.mrb[10].mxu1 }
 0x59d   : > { %v2287_v37 = vadd.f32 %v3526_v35, %v2046_v34  ;;  %v2231_v43 = vpop.f32.mrb[11].mxu1 }
 0x59e   : > { %v2286_v44 = vadd.f32 %v2231_v43, %v2045_v40 }
 0x59f   : > { %2303 = vst.msk [vmem:[#allocation5 + $0x38] sm:$0xff] %vm1620_vm11, %v2287_v37  ;;  %v2325_v37 = vld [vmem:[#allocation6 + $0x68] sm:$0xff] }
 0x5a0   : > { %2302 = vst.msk [vmem:[#allocation5 + $0x30] sm:$0xff] %vm1620_vm11, %v2286_v44  ;;  %v2324_v44 = vld [vmem:[#allocation6 + $0x60] sm:$0xff] }
 0x5a4   : > { %v3529_v47 = vpop.f32.mrb[12].mxu1 }
 0x5a5   : > { %v2289_v48 = vadd.f32 %v3529_v47, %v2048_v36  ;;  %v2241_v45 = vpop.f32.mrb[13].mxu1 }
 0x5a6   : > { %v2288_v52 = vadd.f32 %v2241_v45, %v2047_v23 }
 0x5a7   : > { %2305 = vst.msk [vmem:[#allocation5 + $0x48] sm:$0xff] %vm1620_vm11, %v2289_v48  ;;  %v2327_v48 = vld [vmem:[#allocation6 + $0x78] sm:$0xff] }
 0x5a8   : > { %2304 = vst.msk [vmem:[#allocation5 + $0x40] sm:$0xff] %vm1620_vm11, %v2288_v52  ;;  %v2326_v52 = vld [vmem:[#allocation6 + $0x70] sm:$0xff] }
 0x5ac   : > { %v3532_v56 = vpop.f32.mrb[14].mxu1 }
 0x5ad   : > { %v2291_v42 = vadd.f32 %v3532_v56, %v2050_v55  ;;  %v2251_v24 = vpop.f32.mrb[15].mxu1 }
 0x5ae   : > { %v2290_v59 = vadd.f32 %v2251_v24, %v2049_v58  ;;  %v2541_v58 = vld [vmem:[#allocation5] sm:$0xff] (!%p3063_p10)  ;;  %v2544_v24 = vld [vmem:[#allocation5 + $0x18] sm:$0xff] (!%p3063_p10) }
 0x5af   : > { %2307 = vst.msk [vmem:[#allocation5 + $0x58] sm:$0xff] %vm1620_vm11, %v2291_v42  ;;  %v2543_v42 = vld [vmem:[#allocation5 + $0x10] sm:$0xff] (!%p3063_p10) }
 0x5b0   : > { %2306 = vst.msk [vmem:[#allocation5 + $0x50] sm:$0xff] %vm1620_vm11, %v2290_v59  ;;  %v4176_v59 = vmov (!%p3063_p10), 0  }
 0x5b1   : > { %3844 = vset.pattern.permute.xlu1 (!%p3063_p10), %v4176_v59  ;;  %3843 = vset.pattern.permute.xlu0 (!%p3063_p10), %v4176_v59 }
 0x5b4   : > { %v3535_v63 = vpop.f32.mrb[16].mxu1 }
 0x5b5   : > { %v2293_v22 = vadd.f32 %v3535_v63, %v2052_v60  ;;  %v2261_v21 = vpop.f32.mrb[17].mxu1  ;;  %v2559_v60 = vadd.f32 (!%p3063_p10), 1e-16, %v2543_v42  ;;  %v2557_v63 = vadd.f32 (!%p3063_p10), 1e-16, %v2541_v58 }
 0x5b6   : > { %v2292_v12 = vadd.f32 %v2261_v21, %v2051_v41  ;;  %v2542_v41 = vld [vmem:[#allocation5 + $0x8] sm:$0xff] (!%p3063_p10) }
 0x5b7   : > { %2309 = vst.msk [vmem:[#allocation5 + $0x68] sm:$0xff] %vm1620_vm11, %v2293_v22  ;;  %v2560_v22 = vadd.f32 (!%p3063_p10), 1e-16, %v2544_v24  ;;  %v2546_v21 = vld [vmem:[#allocation5 + $0x28] sm:$0xff] (!%p3063_p10)  ;;  %3845 = vrcp.f32 (!%p3063_p10), %v2559_v60 }
 0x5b8   : > { %2308 = vst.msk [vmem:[#allocation5 + $0x60] sm:$0xff] %vm1620_vm11, %v2292_v12  ;;  %v2558_v12 = vadd.f32 (!%p3063_p10), 1e-16, %v2542_v41  ;;  %3847 = vrcp.f32 (!%p3063_p10), %v2557_v63 }
 0x5b9   : > { %3849 = vrcp.f32 (!%p3063_p10), %v2560_v22 }
 0x5ba   : > { %3851 = vrcp.f32 (!%p3063_p10), %v2558_v12 }
 0x5bc   : > { %v3538_v32 = vpop.f32.mrb[18].mxu1 }
 0x5bd   : > { %v2295_v62 = vadd.f32 %v3538_v32, %v2054_v31  ;;  %v2271_v5 = vpop.f32.mrb[19].mxu1  ;;  %v2545_v31 = vld [vmem:[#allocation5 + $0x20] sm:$0xff] (!%p3063_p10)  ;;  %v2562_v32 = vadd.f32 (!%p3063_p10), 1e-16, %v2546_v21 }
 0x5be   : > { %v2294_v6 = vadd.f32 %v2271_v5, %v2053_v1  ;;  %v2548_v1 = vld [vmem:[#allocation5 + $0x38] sm:$0xff] (!%p3063_p10)  ;;  %v2547_v5 = vld [vmem:[#allocation5 + $0x30] sm:$0xff] (!%p3063_p10) }
 0x5bf   : > { %2311 = vst.msk [vmem:[#allocation5 + $0x78] sm:$0xff] %vm1620_vm11, %v2295_v62  ;;  %v2561_v62 = vadd.f32 (!%p3063_p10), 1e-16, %v2545_v31  ;;  %3853 = vrcp.f32 (!%p3063_p10), %v2562_v32 }
 0x5c0   : > { %2310 = vst.msk [vmem:[#allocation5 + $0x70] sm:$0xff] %vm1620_vm11, %v2294_v6  ;;  %v3549_v57 = vpop.f32.mrb[20].mxu1  ;;  %v2564_v6 = vadd.f32 (!%p3063_p10), 1e-16, %v2548_v1 }
 0x5c1   : > { %v2474_v11 = vadd.f32 %v3549_v57, %v2313_v9  ;;  %v2394_v20 = vpop.f32.mrb[21].mxu1  ;;  %3855 = vrcp.f32 (!%p3063_p10), %v2561_v62  ;;  %v2563_v9 = vadd.f32 (!%p3063_p10), 1e-16, %v2547_v5  ;;  %v2550_v57 = vld [vmem:[#allocation5 + $0x48] sm:$0xff] (!%p3063_p10) }
 0x5c2   : > { %v2473_v25 = vadd.f32 %v2394_v20, %v2312_v49  ;;  %v3846_v49 = vpop.eup (!%p3063_p10), %3845  ;;  %3857 = vrcp.f32 (!%p3063_p10), %v2564_v6  ;;  %v2566_v20 = vadd.f32 (!%p3063_p10), 1e-16, %v2550_v57 }
 0x5c3   : > { %2490 = vst.msk [vmem:[#allocation6 + $0x8] sm:$0xff] %vm1620_vm11, %v2474_v11  ;;  %v2549_v11 = vld [vmem:[#allocation5 + $0x40] sm:$0xff] (!%p3063_p10)  ;;  %2649 = vperm.xlu1 (!%p3063_p10), %3844, %v3846_v49   ;;  %3859 = vrcp.f32 (!%p3063_p10), %v2563_v9 }
 0x5c4   : > { %2489 = vst.msk [vmem:[#allocation6] sm:$0xff] %vm1620_vm11, %v2473_v25  ;;  %v3552_v46 = vpop.f32.mrb[22].mxu1  ;;  %v3848_v25 = vpop.eup (!%p3063_p10), %3847  ;;  %3861 = vrcp.f32 (!%p3063_p10), %v2566_v20 }
 0x5c5   : > { %v2476_v8 = vadd.f32 %v3552_v46, %v2315_v33  ;;  %v2404_v53 = vpop.f32.mrb[23].mxu1  ;;  %v2565_v33 = vadd.f32 (!%p3063_p10), 1e-16, %v2549_v11  ;;  %v2552_v46 = vld [vmem:[#allocation5 + $0x58] sm:$0xff] (!%p3063_p10)  ;;  %2639 = vperm.xlu0 (!%p3063_p10), %3843, %v3848_v25  }
 0x5c6   : > { %v2475_v61 = vadd.f32 %v2404_v53, %v2314_v7  ;;  %v2551_v7 = vld [vmem:[#allocation5 + $0x50] sm:$0xff] (!%p3063_p10) }
 0x5c7   : > { %2492 = vst.msk [vmem:[#allocation6 + $0x18] sm:$0xff] %vm1620_vm11, %v2476_v8  ;;  %v3850_v8 = vpop.eup (!%p3063_p10), %3849  ;;  %3863 = vrcp.f32 (!%p3063_p10), %v2565_v33 }
 0x5c8   : > { %2491 = vst.msk [vmem:[#allocation6 + $0x10] sm:$0xff] %vm1620_vm11, %v2475_v61  ;;  %v3555_v50 = vpop.f32.mrb[24].mxu1  ;;  %v3852_v53 = vpop.eup (!%p3063_p10), %3851  ;;  %v2568_v61 = vadd.f32 (!%p3063_p10), 1e-16, %v2552_v46  ;;  %2654 = vperm.xlu1 (!%p3063_p10), %3844, %v3850_v8  }
 0x5c9   : > { %v2478_v4 = vadd.f32 %v3555_v50, %v2317_v2  ;;  %v2414_v26 = vpop.f32.mrb[25].mxu1  ;;  %v2567_v2 = vadd.f32 (!%p3063_p10), 1e-16, %v2551_v7  ;;  %v2554_v50 = vld [vmem:[#allocation5 + $0x68] sm:$0xff] (!%p3063_p10)  ;;  %2644 = vperm.xlu0 (!%p3063_p10), %3843, %v3852_v53  }
 0x5ca   : > { %v2477_v54 = vadd.f32 %v2414_v26, %v2316_v39  ;;  %v2553_v39 = vld [vmem:[#allocation5 + $0x60] sm:$0xff] (!%p3063_p10)  ;;  %3865 = vrcp.f32 (!%p3063_p10), %v2568_v61 }
 0x5cb   : > { %2494 = vst.msk [vmem:[#allocation6 + $0x28] sm:$0xff] %vm1620_vm11, %v2478_v4  ;;  %v3854_v4 = vpop.eup (!%p3063_p10), %3853  ;;  %3867 = vrcp.f32 (!%p3063_p10), %v2567_v2 }
 0x5cc   : > { %2493 = vst.msk [vmem:[#allocation6 + $0x20] sm:$0xff] %vm1620_vm11, %v2477_v54  ;;  %v3558_v10 = vpop.f32.mrb[26].mxu1  ;;  %v3856_v26 = vpop.eup (!%p3063_p10), %3855  ;;  %v2570_v54 = vadd.f32 (!%p3063_p10), 1e-16, %v2554_v50  ;;  %2664 = vperm.xlu1 (!%p3063_p10), %3844, %v3854_v4  }
 0x5cd   : > { %v2480_v13 = vadd.f32 %v3558_v10, %v2319_v0  ;;  %v2424_v38 = vpop.f32.mrb[27].mxu1  ;;  %v2569_v0 = vadd.f32 (!%p3063_p10), 1e-16, %v2553_v39  ;;  %v2556_v10 = vld [vmem:[#allocation5 + $0x78] sm:$0xff] (!%p3063_p10)  ;;  %2659 = vperm.xlu0 (!%p3063_p10), %3843, %v3856_v26  }
 0x5ce   : > { %v2479_v15 = vadd.f32 %v2424_v38, %v2318_v14  ;;  %v2555_v14 = vld [vmem:[#allocation5 + $0x70] sm:$0xff] (!%p3063_p10)  ;;  %3869 = vrcp.f32 (!%p3063_p10), %v2570_v54 }
 0x5cf   : > { %2496 = vst.msk [vmem:[#allocation6 + $0x38] sm:$0xff] %vm1620_vm11, %v2480_v13  ;;  %v3858_v13 = vpop.eup (!%p3063_p10), %3857  ;;  %3871 = vrcp.f32 (!%p3063_p10), %v2569_v0 }
 0x5d0   : > { %2495 = vst.msk [vmem:[#allocation6 + $0x30] sm:$0xff] %vm1620_vm11, %v2479_v15  ;;  %v3561_v17 = vpop.f32.mrb[28].mxu1  ;;  %v3860_v38 = vpop.eup (!%p3063_p10), %3859  ;;  %v2572_v15 = vadd.f32 (!%p3063_p10), 1e-16, %v2556_v10  ;;  %2674 = vperm.xlu1 (!%p3063_p10), %3844, %v3858_v13  }
 0x5d1   : > { %v2482_v19 = vadd.f32 %v3561_v17, %v2321_v16  ;;  %v2434_v3 = vpop.f32.mrb[29].mxu1  ;;  %v2571_v16 = vadd.f32 (!%p3063_p10), 1e-16, %v2555_v14  ;;  %v2590_v17 = vld [vmem:[#allocation6 + $0x8] sm:$0xff] (!%p3063_p10)  ;;  %2669 = vperm.xlu0 (!%p3063_p10), %3843, %v3860_v38  }
 0x5d2   : > { %v2481_v18 = vadd.f32 %v2434_v3, %v2320_v27  ;;  %v2589_v27 = vld [vmem:[#allocation6] sm:$0xff] (!%p3063_p10)  ;;  %3873 = vrcp.f32 (!%p3063_p10), %v2572_v15 }
 0x5d3   : > { %2498 = vst.msk [vmem:[#allocation6 + $0x48] sm:$0xff] %vm1620_vm11, %v2482_v19  ;;  %v3862_v19 = vpop.eup (!%p3063_p10), %3861  ;;  %3875 = vrcp.f32 (!%p3063_p10), %v2571_v16 }
 0x5d4   : > { %2497 = vst.msk [vmem:[#allocation6 + $0x40] sm:$0xff] %vm1620_vm11, %v2481_v18  ;;  %v3564_v29 = vpop.f32.mrb[30].mxu1  ;;  %v3864_v3 = vpop.eup (!%p3063_p10), %3863  ;;  %v2606_v18 = vadd.f32 (!%p3063_p10), 1e-16, %v2590_v17  ;;  %2684 = vperm.xlu1 (!%p3063_p10), %3844, %v3862_v19  }
 0x5d5   : > { %v2484_v30 = vadd.f32 %v3564_v29, %v2323_v28  ;;  %v2444_v34 = vpop.f32.mrb[31].mxu1  ;;  %v2605_v28 = vadd.f32 (!%p3063_p10), 1e-16, %v2589_v27  ;;  %v2592_v29 = vld [vmem:[#allocation6 + $0x18] sm:$0xff] (!%p3063_p10)  ;;  %2679 = vperm.xlu0 (!%p3063_p10), %3843, %v3864_v3  }
 0x5d6   : > { %v2483_v35 = vadd.f32 %v2444_v34, %v2322_v51  ;;  %v2591_v51 = vld [vmem:[#allocation6 + $0x10] sm:$0xff] (!%p3063_p10)  ;;  %3877 = vrcp.f32 (!%p3063_p10), %v2606_v18 }
 0x5d7   : > { %2500 = vst.msk [vmem:[#allocation6 + $0x58] sm:$0xff] %vm1620_vm11, %v2484_v30  ;;  %v3866_v30 = vpop.eup (!%p3063_p10), %3865  ;;  %3879 = vrcp.f32 (!%p3063_p10), %v2605_v28 }
 0x5d8   : > { %2499 = vst.msk [vmem:[#allocation6 + $0x50] sm:$0xff] %vm1620_vm11, %v2483_v35  ;;  %v3567_v40 = vpop.f32.mrb[32].mxu1  ;;  %v3868_v34 = vpop.eup (!%p3063_p10), %3867  ;;  %v2608_v35 = vadd.f32 (!%p3063_p10), 1e-16, %v2592_v29  ;;  %2694 = vperm.xlu1 (!%p3063_p10), %3844, %v3866_v30  }
 0x5d9   : > { %v2486_v43 = vadd.f32 %v3567_v40, %v2325_v37  ;;  %v2454_v36 = vpop.f32.mrb[33].mxu1  ;;  %v2607_v37 = vadd.f32 (!%p3063_p10), 1e-16, %v2591_v51  ;;  %v2594_v40 = vld [vmem:[#allocation6 + $0x28] sm:$0xff] (!%p3063_p10)  ;;  %2689 = vperm.xlu0 (!%p3063_p10), %3843, %v3868_v34   ;;  %v2511_v51 = vld [vmem:[#allocation4 + $0x10] sm:$0xff] (!%p3063_p10)  ;;  %v2512_v34 = vld [vmem:[#allocation4 + $0x18] sm:$0xff] (!%p3063_p10) }
 0x5da   : > { %v2485_v47 = vadd.f32 %v2454_v36, %v2324_v44  ;;  %2508 = sbr.rel (%p3063_p10) target bundleno = 1670 (0x686), region = 80  ;;  %v2593_v44 = vld [vmem:[#allocation6 + $0x20] sm:$0xff] (!%p3063_p10)  ;;  %3881 = vrcp.f32 (!%p3063_p10), %v2608_v35  ;;  %v2598_v58 = vld [vmem:[#allocation6 + $0x48] sm:$0xff] (!%p3063_p10) }
 0x5db   : > { %2502 = vst.msk [vmem:[#allocation6 + $0x68] sm:$0xff] %vm1620_vm11, %v2486_v43  ;;  %v3870_v43 = vpop.eup (!%p3063_p10), %3869  ;;  %3883 = vrcp.f32 (!%p3063_p10), %v2607_v37  ;;  %v2597_v59 = vld [vmem:[#allocation6 + $0x40] sm:$0xff] (!%p3063_p10)  ;;  %v2614_v63 = vadd.f32 (!%p3063_p10), 1e-16, %v2598_v58  ;;  %v2510_v37 = vld [vmem:[#allocation4 + $0x8] sm:$0xff] (!%p3063_p10) }
 0x5dc   : > { %2501 = vst.msk [vmem:[#allocation6 + $0x60] sm:$0xff] %vm1620_vm11, %v2485_v47  ;;  %v3570_v23 = vpop.f32.mrb[34].mxu1  ;;  %v3872_v36 = vpop.eup (!%p3063_p10), %3871  ;;  %v2610_v47 = vadd.f32 (!%p3063_p10), 1e-16, %v2594_v40  ;;  %2704 = vperm.xlu1 (!%p3063_p10), %3844, %v3870_v43   ;;  %v2613_v22 = vadd.f32 (!%p3063_p10), 1e-16, %v2597_v59 }
 0x5dd   : > { %v2488_v45 = vadd.f32 %v3570_v23, %v2327_v48  ;;  %v2464_v55 = vpop.f32.mrb[35].mxu1  ;;  %v2609_v48 = vadd.f32 (!%p3063_p10), 1e-16, %v2593_v44  ;;  %v2596_v23 = vld [vmem:[#allocation6 + $0x38] sm:$0xff] (!%p3063_p10)  ;;  %2699 = vperm.xlu0 (!%p3063_p10), %3843, %v3872_v36   ;;  %v2509_v35 = vld [vmem:[#allocation4] sm:$0xff] (!%p3063_p10) }
 0x5de   : > { %v2487_v56 = vadd.f32 %v2464_v55, %v2326_v52  ;;  %v2595_v52 = vld [vmem:[#allocation6 + $0x30] sm:$0xff] (!%p3063_p10)  ;;  %3885 = vrcp.f32 (!%p3063_p10), %v2610_v47  ;;  %v2600_v41 = vld [vmem:[#allocation6 + $0x58] sm:$0xff] (!%p3063_p10) }
 0x5df   : > { %2504 = vst.msk [vmem:[#allocation6 + $0x78] sm:$0xff] %vm1620_vm11, %v2488_v45  ;;  %v3874_v45 = vpop.eup (!%p3063_p10), %3873  ;;  %3887 = vrcp.f32 (!%p3063_p10), %v2609_v48  ;;  %v2611_v42 = vadd.f32 (!%p3063_p10), 1e-16, %v2595_v52  ;;  %v2599_v12 = vld [vmem:[#allocation6 + $0x50] sm:$0xff] (!%p3063_p10)  ;;  %v2616_v32 = vadd.f32 (!%p3063_p10), 1e-16, %v2600_v41 }
 0x5e0   : > { %2503 = vst.msk [vmem:[#allocation6 + $0x70] sm:$0xff] %vm1620_vm11, %v2487_v56  ;;  %v3876_v55 = vpop.eup (!%p3063_p10), %3875  ;;  %v2612_v56 = vadd.f32 (!%p3063_p10), 1e-16, %v2596_v23  ;;  %2714 = vperm.xlu1 (!%p3063_p10), %3844, %v3874_v45   ;;  %v2615_v62 = vadd.f32 (!%p3063_p10), 1e-16, %v2599_v12  ;;  %v2515_v48 = vld [vmem:[#allocation4 + $0x30] sm:$0xff] (!%p3063_p10) }
 0x5e1   : > { %v3878_v24 = vpop.eup %3877  ;;  %2709 = vperm.xlu0 %3843, %v3876_v55   ;;  %v2516_v45 = vld [vmem:[#allocation4 + $0x38] sm:$0xff]  ;;  %v2513_v52 = vld [vmem:[#allocation4 + $0x20] sm:$0xff] }
 0x5e2   : > { %v3880_v60 = vpop.eup %3879  ;;  %3889 = vrcp.f32 %v2612_v56  ;;  %v2602_v1 = vld [vmem:[#allocation6 + $0x68] sm:$0xff]  ;;  %v2517_v12 = vld [vmem:[#allocation4 + $0x40] sm:$0xff] }
 0x5e3   : > { %3891 = vrcp.f32 %v2611_v42  ;;  %v2601_v6 = vld [vmem:[#allocation6 + $0x60] sm:$0xff]  ;;  %v2618_v57 = vadd.f32 1e-16, %v2602_v1  ;;  %v2514_v56 = vld [vmem:[#allocation4 + $0x28] sm:$0xff] }
 0x5e4   : > { %2740 = vperm.xlu1 %3844, %v3878_v24   ;;  %v3882_v21 = vpop.eup %3881  ;;  %3893 = vrcp.f32 %v2614_v63  ;;  %v2617_v11 = vadd.f32 1e-16, %v2601_v6 }
 0x5e5   : > { %2735 = vperm.xlu0 %3843, %v3880_v60   ;;  %v3884_v31 = vpop.eup %3883  ;;  %3895 = vrcp.f32 %v2613_v22  ;;  %v2519_v22 = vld [vmem:[#allocation4 + $0x50] sm:$0xff] }
 0x5e6   : > { %3897 = vrcp.f32 %v2616_v32  ;;  %v2604_v49 = vld [vmem:[#allocation6 + $0x78] sm:$0xff]  ;;  %v2518_v32 = vld [vmem:[#allocation4 + $0x48] sm:$0xff] }
 0x5e7   : > { %3899 = vrcp.f32 %v2615_v62  ;;  %v2603_v25 = vld [vmem:[#allocation6 + $0x70] sm:$0xff]  ;;  %v2620_v46 = vadd.f32 1e-16, %v2604_v49 }
 0x5e8   : > { %2750 = vperm.xlu1 %3844, %v3882_v21   ;;  %v3886_v5 = vpop.eup %3885  ;;  %3901 = vrcp.f32 %v2618_v57  ;;  %v2619_v8 = vadd.f32 1e-16, %v2603_v25  ;;  %v2520_v21 = vld [vmem:[#allocation4 + $0x58] sm:$0xff]  ;;  %v2521_v25 = vld [vmem:[#allocation4 + $0x60] sm:$0xff] }
 0x5e9   : > { %2745 = vperm.xlu0 %3843, %v3884_v31   ;;  %v3888_v9 = vpop.eup %3887  ;;  %3903 = vrcp.f32 %v2617_v11  ;;  %v2523_v11 = vld [vmem:[#allocation4 + $0x70] sm:$0xff] }
 0x5ea   : > { %3905 = vrcp.f32 %v2620_v46  ;;  %v2522_v46 = vld [vmem:[#allocation4 + $0x68] sm:$0xff] }
 0x5eb   : > { %3907 = vrcp.f32 %v2619_v8 }
 0x5ec   : > { %2760 = vperm.xlu1 %3844, %v3886_v5   ;;  %v3890_v20 = vpop.eup %3889 }
 0x5ed   : > { %2755 = vperm.xlu0 %3843, %v3888_v9   ;;  %v3892_v33 = vpop.eup %3891 }
 0x5ee   : > { %v3894_v7 = vpop.eup %3893 }
 0x5ef   : > { %v3896_v53 = vpop.eup %3895 }
 0x5f0   : > { %2770 = vperm.xlu1 %3844, %v3890_v20   ;;  %v3898_v61 = vpop.eup %3897  ;;  %v2524_v20 = vld [vmem:[#allocation4 + $0x78] sm:$0xff] }
 0x5f1   : > { %2765 = vperm.xlu0 %3843, %v3892_v33   ;;  %v3900_v2 = vpop.eup %3899 }
 0x5f2   : > { %v3902_v50 = vpop.eup %3901 }
 0x5f3   : > { %v3904_v4 = vpop.eup %3903 }
 0x5f4   : > { %2780 = vperm.xlu1 %3844, %v3894_v7   ;;  %v3906_v39 = vpop.eup %3905 }
 0x5f5   : > { %2775 = vperm.xlu0 %3843, %v3896_v53   ;;  %v3908_v26 = vpop.eup %3907 }
 0x5f8   : > { %2790 = vperm.xlu1 %3844, %v3898_v61  }
 0x5f9   : > { %2785 = vperm.xlu0 %3843, %v3900_v2  }
 0x5fc   : > { %2800 = vperm.xlu1 %3844, %v3902_v50  }
 0x5fd   : > { %2795 = vperm.xlu0 %3843, %v3904_v4   ;;  %v2527_v4 = vld [vmem:[#allocation4 + $0x90] sm:$0xff] }
 0x600   : > { %2810 = vperm.xlu1 %3844, %v3906_v39  }
 0x601   : > { %2805 = vperm.xlu0 %3843, %v3908_v26   ;;  %v2528_v26 = vld [vmem:[#allocation4 + $0x98] sm:$0xff] }
 0x642   : > { %v2650_v54 = vpop.permute.xlu1 %2649 }
 0x643   : > { %v2719_v63 = vmul.f32 %v2650_v54, %v2513_v52  ;;  %v2525_v54 = vld [vmem:[#allocation4 + $0x80] sm:$0xff]  ;;  %v2535_v52 = vld [vmem:[#allocation4 + $0xd0] sm:$0xff] }
 0x644   : > { %v2640_v0 = vpop.permute.xlu0 %2639 }
 0x645   : > { %v2717_v47 = vmul.f32 %v2640_v0, %v2509_v35  ;;  %v2531_v35 = vld [vmem:[#allocation4 + $0xb0] sm:$0xff] }
 0x647   : > { %v2655_v10 = vpop.permute.xlu1 %2654 }
 0x648   : > { %v2645_v13 = vpop.permute.xlu0 %2644  ;;  %v2720_v24 = vmul.f32 %v2655_v10, %v2515_v48  ;;  %v2526_v10 = vld [vmem:[#allocation4 + $0x88] sm:$0xff] }
 0x649   : > { %v2718_v43 = vmul.f32 %v2645_v13, %v2511_v51 }
 0x64b   : > { %v2665_v14 = vpop.permute.xlu1 %2664 }
 0x64c   : > { %v2660_v38 = vpop.permute.xlu0 %2659  ;;  %v2722_v5 = vmul.f32 %v2665_v14, %v2519_v22 }
 0x64d   : > { %v2721_v57 = vmul.f32 %v2660_v38, %v2517_v12  ;;  %v2537_v12 = vld [vmem:[#allocation4 + $0xe0] sm:$0xff] }
 0x64f   : > { %v2675_v15 = vpop.permute.xlu1 %2674 }
 0x650   : > { %v2670_v16 = vpop.permute.xlu0 %2669  ;;  %v2724_v53 = vmul.f32 %v2675_v15, %v2523_v11 }
 0x651   : > { %v2723_v50 = vmul.f32 %v2670_v16, %v2521_v25  ;;  %v2532_v16 = vld [vmem:[#allocation4 + $0xb8] sm:$0xff] }
 0x653   : > { %v4996_v17 = vpop.permute.xlu1 %2684 }
 0x654   : > { %v4998_v19 = vpop.permute.xlu0 %2679  ;;  %v2726_v38 = vmul.f32 %v4996_v17, %v2527_v4 }
 0x655   : > { %v2725_v15 = vmul.f32 %v4998_v19, %v2525_v54  ;;  %v2536_v19 = vld [vmem:[#allocation4 + $0xd8] sm:$0xff] }
 0x657   : > { %v5000_v27 = vpop.permute.xlu1 %2694 }
 0x658   : > { %v5002_v3 = vpop.permute.xlu0 %2689  ;;  %v2728_v48 = vmul.f32 %v5000_v27, %v2531_v35 }
 0x65b   : > { %v5004_v18 = vpop.permute.xlu1 %2704 }
 0x65c   : > { %v5006_v28 = vpop.permute.xlu0 %2699 }
 0x65f   : > { %v5008_v29 = vpop.permute.xlu1 %2714 }
 0x660   : > { %v5010_v30 = vpop.permute.xlu0 %2709 }
 0x663   : > { %v2741_v40 = vpop.permute.xlu1 %2740 }
 0x664   : > { %v2814_v44 = vmul.f32 %v2741_v40, %v2512_v34  ;;  %v2736_v36 = vpop.permute.xlu0 %2735  ;;  %v2529_v40 = vld [vmem:[#allocation4 + $0xa0] sm:$0xff] }
 0x665   : > { %v2813_v23 = vmul.f32 %v2736_v36, %v2510_v37  ;;  %v2727_v17 = vmul.f32 %v5002_v3, %v2529_v40  ;;  %v2540_v3 = vld [vmem:[#allocation4 + $0xf8] sm:$0xff] }
 0x666   : > { %v2830_v55 = vadd.f32 %v2814_v44, %v2718_v43  ;;  %v2530_v44 = vld [vmem:[#allocation4 + $0xa8] sm:$0xff] }
 0x667   : > { %v2829_v42 = vadd.f32 %v2813_v23, %v2717_v47  ;;  %v2751_v58 = vpop.permute.xlu1 %2750 }
 0x668   : > { %2846 = vst [vmem:[#allocation19 + $0x8] sm:$0xff] %v2830_v55  ;;  %v2816_v59 = vmul.f32 %v2751_v58, %v2516_v45  ;;  %v2746_v60 = vpop.permute.xlu0 %2745  ;;  %v2534_v58 = vld [vmem:[#allocation4 + $0xc8] sm:$0xff] }
 0x669   : > { %2845 = vst [vmem:[#allocation19] sm:$0xff] %v2829_v42  ;;  %v2815_v41 = vmul.f32 %v2746_v60, %v2514_v56  ;;  %v2533_v56 = vld [vmem:[#allocation4 + $0xc0] sm:$0xff]  ;;  %v2730_v60 = vmul.f32 %v5004_v18, %v2535_v52  ;;  %v2731_v18 = vmul.f32 %v5010_v30, %v2537_v12 }
 0x66a   : > { %v2832_v31 = vadd.f32 %v2816_v59, %v2720_v24  ;;  %v2729_v27 = vmul.f32 %v5006_v28, %v2533_v56 }
 0x66b   : > { %v2831_v62 = vadd.f32 %v2815_v41, %v2719_v63  ;;  %v2761_v1 = vpop.permute.xlu1 %2760  ;;  %v2539_v41 = vld [vmem:[#allocation4 + $0xf0] sm:$0xff] }
 0x66c   : > { %2848 = vst [vmem:[#allocation19 + $0x18] sm:$0xff] %v2832_v31  ;;  %v2818_v6 = vmul.f32 %v2761_v1, %v2520_v21  ;;  %v2756_v9 = vpop.permute.xlu0 %2755 }
 0x66d   : > { %2847 = vst [vmem:[#allocation19 + $0x10] sm:$0xff] %v2831_v62  ;;  %v2817_v49 = vmul.f32 %v2756_v9, %v2518_v32  ;;  %v2538_v32 = vld [vmem:[#allocation4 + $0xe8] sm:$0xff] }
 0x66e   : > { %v2834_v33 = vadd.f32 %v2818_v6, %v2722_v5  ;;  %v2732_v5 = vmul.f32 %v5008_v29, %v2539_v41 }
 0x66f   : > { %v2833_v8 = vadd.f32 %v2817_v49, %v2721_v57  ;;  %v2771_v7 = vpop.permute.xlu1 %2770 }
 0x670   : > { %2850 = vst [vmem:[#allocation19 + $0x28] sm:$0xff] %v2834_v33  ;;  %v2820_v61 = vmul.f32 %v2771_v7, %v2524_v20  ;;  %v2766_v2 = vpop.permute.xlu0 %2765 }
 0x671   : > { %2849 = vst [vmem:[#allocation19 + $0x20] sm:$0xff] %v2833_v8  ;;  %v2819_v39 = vmul.f32 %v2766_v2, %v2522_v46 }
 0x672   : > { %v2836_v0 = vadd.f32 %v2820_v61, %v2724_v53 }
 0x673   : > { %v2835_v13 = vadd.f32 %v2819_v39, %v2723_v50  ;;  %v2781_v14 = vpop.permute.xlu1 %2780 }
 0x674   : > { %2852 = vst [vmem:[#allocation19 + $0x38] sm:$0xff] %v2836_v0  ;;  %v2822_v51 = vmul.f32 %v2781_v14, %v2528_v26  ;;  %v2776_v34 = vpop.permute.xlu0 %2775 }
 0x675   : > { %2851 = vst [vmem:[#allocation19 + $0x30] sm:$0xff] %v2835_v13  ;;  %v2821_v37 = vmul.f32 %v2776_v34, %v2526_v10 }
 0x676   : > { %v2838_v43 = vadd.f32 %v2822_v51, %v2726_v38 }
 0x677   : > { %v2837_v36 = vadd.f32 %v2821_v37, %v2725_v15  ;;  %v2791_v47 = vpop.permute.xlu1 %2790 }
 0x678   : > { %2854 = vst [vmem:[#allocation19 + $0x48] sm:$0xff] %v2838_v43  ;;  %v2824_v23 = vmul.f32 %v2791_v47, %v2532_v16  ;;  %v2786_v45 = vpop.permute.xlu0 %2785 }
 0x679   : > { %2853 = vst [vmem:[#allocation19 + $0x40] sm:$0xff] %v2837_v36  ;;  %v2823_v55 = vmul.f32 %v2786_v45, %v2530_v44 }
 0x67a   : > { %v2840_v42 = vadd.f32 %v2824_v23, %v2728_v48 }
 0x67b   : > { %v2839_v24 = vadd.f32 %v2823_v55, %v2727_v17  ;;  %v2801_v59 = vpop.permute.xlu1 %2800 }
 0x67c   : > { %2856 = vst [vmem:[#allocation19 + $0x58] sm:$0xff] %v2840_v42  ;;  %v2826_v63 = vmul.f32 %v2801_v59, %v2536_v19  ;;  %v2796_v22 = vpop.permute.xlu0 %2795 }
 0x67d   : > { %2855 = vst [vmem:[#allocation19 + $0x50] sm:$0xff] %v2839_v24  ;;  %v2825_v21 = vmul.f32 %v2796_v22, %v2534_v58 }
 0x67e   : > { %v2842_v31 = vadd.f32 %v2826_v63, %v2730_v60 }
 0x67f   : > { %v2841_v62 = vadd.f32 %v2825_v21, %v2729_v27  ;;  %v2811_v1 = vpop.permute.xlu1 %2810 }
 0x680   : > { %2858 = vst [vmem:[#allocation19 + $0x68] sm:$0xff] %v2842_v31  ;;  %v2828_v6 = vmul.f32 %v2811_v1, %v2540_v3  ;;  %v2806_v9 = vpop.permute.xlu0 %2805 }
 0x681   : > { %2857 = vst [vmem:[#allocation19 + $0x60] sm:$0xff] %v2841_v62  ;;  %v2827_v57 = vmul.f32 %v2806_v9, %v2538_v32 }
 0x682   : > { %v2844_v11 = vadd.f32 %v2828_v6, %v2732_v5 }
 0x683   : > { %v2843_v28 = vadd.f32 %v2827_v57, %v2731_v18 }
 0x684   : > { %2860 = vst [vmem:[#allocation19 + $0x78] sm:$0xff] %v2844_v11 }
 0x685   : > { %2859 = vst [vmem:[#allocation19 + $0x70] sm:$0xff] %v2843_v28 }
 0x686 PF: > { %p3764_p8 = scmp.eq.s32.totalorder %s4239_s28, 1  ;;  %s4177_s15 = smov [#allocation19]  }
 0x687   : > { %s2867_s8 = sshll.u32 %s4177_s15, 4  ;;  %s2868_s8 = int_to_ptr.vmem [resolvable:$true] %s2867_s8 }
 0x688   : > { %s4083_s9 = scalar_lea.vmem %s2868_s8, 2048  ;;  %p4090_p4 = scmp.lt.s32.totalorder %s2868_s8, %s2868_s8 }
 0x689   : > { %p4084_p6 = scmp.ne.s32.totalorder %s2868_s8, %s4083_s9  ;;  %p4091_p5 = scmp.lt.s32.totalorder %s4083_s9, %s4083_s9 }
 0x68b   : > { %p4085_p7 = pnand %p4084_p6, %p3764_p8  ;;  %p4092_p1 = por %p4091_p5, %p4090_p4 }
 0x68d   : > { %p4086_p11 = pneg %p4085_p7 }
 0x68f   : > { %p4093_p12 = pnand %p4092_p1, %p4086_p11 }
 0x691   : > { %4096 = shalt.err (!%p4093_p12)
}
 0x692   : > { %s5119_s17 = sld [smem:[#allocation30_spill]] }
 0x698   : > { %s4097_s22 = scalar_lea.hbm %s5119_s17, 2048 }
 0x699   : > { %p4098_p9 = scmp.ne.s32.totalorder %s5119_s17, %s4097_s22  ;;  %p4103_p0 = scmp.lt.u32.totalorder %s4097_s22, %s5119_s17 }
 0x69b   : > { %p4099_p13 = pnand %p4098_p9, %p3764_p8 }
 0x69d   : > { %p4100_p2 = pneg %p4099_p13 }
 0x69f   : > { %p4105_p3 = pnand %p4103_p0, %p4100_p2 }
 0x6a1   : > { %4108 = shalt.err (!%p4105_p3)
}
 0x6a2   : > { %s4178_s27 = smov 128   ;;  %s4179_s13 = smov 8  }
 0x6a3   : > { %3734 = dma.vmem_to_hbm [thread:$0]  (%p3764_p8), %s2868_s8, 2048, %s5119_s17, [#allocation10], %s4178_s27, %s4178_s27, %s4179_s13  }
 0x6a4   : > { %4142 = dma.done.wait (%p3764_p8), [#allocation10], 2048  }
 0x6a5   : > { %4144 = vsyncadd (%p3764_p8), [#allocation10], 4294965248 }
 0x6a6 PF: > { %s5120_s27 = sld [smem:[#allocation25_spill]]  ;;  %s5121_s18 = sld [smem:[#allocation26_spill]] }
 0x6a7   : > { %s5122_s24 = smov %s4151_s25  ;;  %s5123_s25 = smov %s4155_s26 }
 0x6ac   : > { %p23_p10 = scmp.ge.s32.totalorder %s5120_s27, 4   ;;  %s5124_s26 = smov %s5121_s18 }
 0x6ae   :  { %25 = sbr.rel (!%p23_p10) target bundleno = 13 (0xd), region = 130 }
 0x6b5   :  { %2883 = vsyncpa [#allocation9], 1 }
 0x6b6   :  { %2885 = vsyncpa [#allocation9 + $0x1], 1 }
 0x6b7   :  { %2886 = vsyncpa [#allocation12], 1 }
 0x6b8   :  { %2887 = vsyncpa [#allocation15], 1 }
 0x6b9   :  { %2889 = vsyncpa [#allocation15 + $0x1], 1 }
 0x6ba   :  { %2890 = vsyncpa [#allocation18], 1 }
 0x6bb   :  { %2892 = vsyncpa [#allocation18 + $0x1], 1 }
 0x6bc   :  { %2893 = vsyncpa [#allocation10], 1 }
 0x6bd   :  { %2895 = vsyncpa [#allocation10 + $0x1], 1 }

</bundles_post_ra>
